<compile_context>
chip_gen: v7x
topology: tpu7x:2x2x1
jax: 0.10.0
libtpu: 0.0.40
codegen_flags: <defaults>
</compile_context>

<pallas_src>
import numpy as np

import jax
import jax.numpy as jnp
from jax.experimental import pallas as pl
from jax.experimental.pallas import tpu as pltpu


# Geometry fixed by the PyTorch module (fc1 = Linear(64 * 10 * 17, 256)).
H, W = 10, 17
HP, WP = H + 2, W + 2            # zero-padded grid (pad=1): 12 x 19
P = HP * WP                      # 228 flattened padded positions per image
NW = 256                         # lane-dense working width (P rounded to 128)
E = 128                          # ring width (needs >= 20; 128 keeps stores dense)
EXT = NW + 2 * E                 # 512: [ring E][valid P | dead][ring E]
C1, C2, C3 = 16, 32, 64
HID = 256
FEAT = C3 * H * W                # 10880
FC1_K_TILE = 17 * 128            # 2176;  10880 = 5 * 2176 (lane-aligned K tile)
K1 = 16                          # conv1 contraction (9 taps zero-padded to 16)

# fc1 weight / conv-feature dtype.  bfloat16 halves the dominant HBM weight
# stream; accumulation and the bias/ReLU/fc2 epilogue stay float32.
FC1_COMPUTE_DTYPE = jnp.bfloat16

_TAPS = tuple((ky, kx) for ky in range(3) for kx in range(3))


# ----------------------------------------------------------------------------
# Kernel 1: fused conv1/conv2/conv3 (+ReLU) for one image, all in VMEM.
# ----------------------------------------------------------------------------
def _conv_stack_kernel(x_ref, w1_ref, b1_ref, w2_ref, b2_ref, w3_ref, b3_ref,
                       mask_ref, sout_ref, o_ref, a1_ref, a2_ref, im_ref):
    """Activations live as (C, EXT) rows: flattened padded spatial positions
    0..227 on lanes [E, E+228), dead lanes up to E+NW, and 128-lane zero rings
    on both sides so every 3x3 tap is a static lane slice.  Each conv layer is
    one im2col build + one (Cout, 9*Cin) @ (9*Cin, NW) MXU matmul; non-interior
    outputs are masked to zero so they act as the next layer's zero padding."""
    interior = mask_ref[...] > 0.5                        # (1, NW) bool

    # Re-zero the rings each step (4 dense 128-wide stores).  Only ring lanes
    # ever read by the tap slices matter; interior lanes are rewritten below.
    zc1 = jnp.zeros((C1, E), jnp.float32)
    zc2 = jnp.zeros((C2, E), jnp.float32)
    a1_ref[:, 0:E] = zc1
    a1_ref[:, E + NW:EXT] = zc1
    a2_ref[:, 0:E] = zc2
    a2_ref[:, E + NW:EXT] = zc2

    # ---- conv1: 1 -> 16  (im2col (16, NW), K zero-padded 9 -> 16) -----------
    for t, (ky, kx) in enumerate(_TAPS):
        s = (ky - 1) * WP + (kx - 1)
        im_ref[t:t + 1, :] = x_ref[:, E + s:E + s + NW]
    im_ref[9:K1, :] = jnp.zeros((K1 - 9, NW), jnp.float32)
    acc = jnp.dot(w1_ref[...], im_ref[0:K1, :],
                  preferred_element_type=jnp.float32)     # (C1, NW)
    a1_ref[:, E:E + NW] = jnp.where(
        interior, jnp.maximum(acc + b1_ref[...], 0.0), 0.0)

    # ---- conv2: 16 -> 32 (im2col (144, NW), single matmul) -------------------
    for t, (ky, kx) in enumerate(_TAPS):
        s = (ky - 1) * WP + (kx - 1)
        im_ref[t * C1:(t + 1) * C1, :] = a1_ref[:, E + s:E + s + NW]
    acc = jnp.dot(w2_ref[...], im_ref[0:9 * C1, :],
                  preferred_element_type=jnp.float32)     # (C2, NW)
    a2_ref[:, E:E + NW] = jnp.where(
        interior, jnp.maximum(acc + b2_ref[...], 0.0), 0.0)

    # ---- conv3: 32 -> 64 (im2col (288, NW), single matmul; no mask needed) ---
    for t, (ky, kx) in enumerate(_TAPS):
        s = (ky - 1) * WP + (kx - 1)
        im_ref[t * C2:(t + 1) * C2, :] = a2_ref[:, E + s:E + s + NW]
    acc = jnp.dot(w3_ref[...], im_ref[...],
                  preferred_element_type=jnp.float32)     # (C3, NW)
    a3 = jnp.maximum(acc + b3_ref[...], 0.0)              # finite everywhere

    # ---- interior extraction as one MXU matmul -> dense (C3, 170) store -----
    # S_out only has 1s at interior rows, so padding/dead columns contribute 0.
    o_ref[...] = jnp.dot(a3, sout_ref[...],
                         preferred_element_type=jnp.float32).astype(o_ref.dtype)


def conv_stack(x_rows, p):
    """x_rows: (B, 1, EXT) f32 pre-padded rows -> (B, C3, H*W) features
    (NCHW-flatten order) in FC1_COMPUTE_DTYPE."""
    B = x_rows.shape[0]
    return pl.pallas_call(
        _conv_stack_kernel,
        out_shape=jax.ShapeDtypeStruct((B, C3, H * W), FC1_COMPUTE_DTYPE),
        grid_spec=pltpu.PrefetchScalarGridSpec(
            num_scalar_prefetch=0,
            grid=(B,),                                    # one image per step
            in_specs=[
                pl.BlockSpec((None, 1, EXT), lambda b: (b, 0, 0)),    # x row
                pl.BlockSpec((C1, K1), lambda b: (0, 0)),             # w1
                pl.BlockSpec((C1, 1), lambda b: (0, 0)),              # b1
                pl.BlockSpec((C2, 9 * C1), lambda b: (0, 0)),         # w2
                pl.BlockSpec((C2, 1), lambda b: (0, 0)),              # b2
                pl.BlockSpec((C3, 9 * C2), lambda b: (0, 0)),         # w3
                pl.BlockSpec((C3, 1), lambda b: (0, 0)),              # b3
                pl.BlockSpec((1, NW), lambda b: (0, 0)),              # interior mask
                pl.BlockSpec((NW, H * W), lambda b: (0, 0)),          # S_out
            ],
            out_specs=pl.BlockSpec((None, C3, H * W), lambda b: (b, 0, 0)),
            scratch_shapes=[
                pltpu.VMEM((C1, EXT), jnp.float32),       # padded conv1 output
                pltpu.VMEM((C2, EXT), jnp.float32),       # padded conv2 output
                pltpu.VMEM((9 * C2, NW), jnp.float32),    # shared im2col buffer
            ],
        ),
        compiler_params=pltpu.CompilerParams(
            dimension_semantics=("parallel",)),           # batches independent
    )(x_rows, p["w1k"], p["b1k"], p["w2k"], p["b2k"], p["w3k"], p["b3k"],
      p["mask"], p["sout"])


# ----------------------------------------------------------------------------
# Kernel 2: fused fc1 (K-tiled, f32 accumulation) + ReLU + fc2.
# ----------------------------------------------------------------------------
def _fc_head_kernel(x_ref, w1_ref, b1_ref, w2_ref, b2_ref, o_ref, acc_ref):
    k = pl.program_id(0)

    @pl.when(k == 0)
    def _():
        acc_ref[...] = jnp.zeros_like(acc_ref)

    # Activations and fc1 weights share FC1_COMPUTE_DTYPE -> no per-step cast.
    acc_ref[...] += jnp.dot(x_ref[...], w1_ref[...],
                            preferred_element_type=jnp.float32)

    @pl.when(k == pl.num_programs(0) - 1)
    def _():
        hidden = jnp.maximum(acc_ref[...] + b1_ref[...], 0.0)      # f32 epilogue
        out = jnp.dot(hidden, w2_ref[...],
                      preferred_element_type=jnp.float32) + b2_ref[...]
        o_ref[...] = out.astype(o_ref.dtype)


def fc_head(x, p):
    """x: (B, FEAT) in FC1_COMPUTE_DTYPE -> (B, action_count) f32."""
    B, K = x.shape
    A = p["wfc2k"].shape[1]
    assert K == FEAT and K % FC1_K_TILE == 0
    nk = K // FC1_K_TILE
    return pl.pallas_call(
        _fc_head_kernel,
        out_shape=jax.ShapeDtypeStruct((B, A), jnp.float32),
        grid_spec=pltpu.PrefetchScalarGridSpec(
            num_scalar_prefetch=0,
            grid=(nk,),
            in_specs=[
                pl.BlockSpec((B, FC1_K_TILE), lambda k: (0, k)),
                pl.BlockSpec((FC1_K_TILE, HID), lambda k: (k, 0)),
                pl.BlockSpec((1, HID), lambda k: (0, 0)),
                pl.BlockSpec((HID, A), lambda k: (0, 0)),
                pl.BlockSpec((1, A), lambda k: (0, 0)),
            ],
            out_specs=pl.BlockSpec((B, A), lambda k: (0, 0)),
            scratch_shapes=[pltpu.VMEM((B, HID), jnp.float32)],
        ),
        compiler_params=pltpu.CompilerParams(
            dimension_semantics=("arbitrary",)),          # K reduction
    )(x, p["wfc1k"], p["bfc1k"], p["wfc2k"], p["bfc2k"])


# ----------------------------------------------------------------------------
# Forward pass + parameter handling
# ----------------------------------------------------------------------------
def conv_dqn_forward(x, prepared):
    """x: (B, 1, 10, 17) f32 NCHW -> (B, action_count) f32."""
    B = x.shape[0]
    # Tiny one-time input layout prep (B*512 floats): zero-pad 10x17 -> 12x19,
    # flatten, and place at lane offset E inside an EXT-wide zero row.
    xp = jnp.pad(x, ((0, 0), (0, 0), (1, 1), (1, 1))).reshape(B, 1, P)
    x_rows = jnp.pad(xp, ((0, 0), (0, 0), (E, EXT - E - P)))
    feat = conv_stack(x_rows, prepared)            # (B, 64, 170)
    flat = feat.reshape(B, FEAT)                   # nn.Flatten on NCHW
    return fc_head(flat, prepared)


def init_params(key, action_count):
    """PyTorch-layout parameters (conv OIHW, fc stored as (K, N) = weight.T)."""
    ks = jax.random.split(key, 10)
    s = 0.05
    return {
        "w1": s * jax.random.normal(ks[0], (C1, 1, 3, 3), jnp.float32),
        "b1": s * jax.random.normal(ks[1], (C1,), jnp.float32),
        "w2": s * jax.random.normal(ks[2], (C2, C1, 3, 3), jnp.float32),
        "b2": s * jax.random.normal(ks[3], (C2,), jnp.float32),
        "w3": s * jax.random.normal(ks[4], (C3, C2, 3, 3), jnp.float32),
        "b3": s * jax.random.normal(ks[5], (C3,), jnp.float32),
        "wfc1": s * jax.random.normal(ks[6], (FEAT, HID), jnp.float32),
        "bfc1": s * jax.random.normal(ks[7], (HID,), jnp.float32),
        "wfc2": s * jax.random.normal(ks[8], (HID, action_count), jnp.float32),
        "bfc2": s * jax.random.normal(ks[9], (action_count,), jnp.float32),
    }


def prepare_params(params, fc1_dtype=FC1_COMPUTE_DTYPE):
    """One-time repack (outside the hot forward): conv weights -> (Cout, 9*Cin)
    with columns in (ky, kx, ci) order (conv1 zero-padded to K1=16 columns);
    biases -> (Cout, 1); interior mask and interior-selection matrix built for
    the NW=256 working width; fc1 weights cast to the compute dtype."""
    w1k = np.zeros((C1, K1), np.float32)
    w1k[:, :9] = np.asarray(params["w1"]).reshape(C1, 9)

    mask = np.zeros((1, NW), np.float32)
    sout = np.zeros((NW, H * W), np.float32)
    for h in range(H):
        for w in range(W):
            p_pad = (h + 1) * WP + (w + 1)        # interior padded position
            mask[0, p_pad] = 1.0
            sout[p_pad, h * W + w] = 1.0

    return {
        "w1k": jnp.asarray(w1k),
        "b1k": params["b1"].reshape(C1, 1),
        "w2k": jnp.transpose(params["w2"], (0, 2, 3, 1)).reshape(C2, 9 * C1),
        "b2k": params["b2"].reshape(C2, 1),
        "w3k": jnp.transpose(params["w3"], (0, 2, 3, 1)).reshape(C3, 9 * C2),
        "b3k": params["b3"].reshape(C3, 1),
        "mask": jnp.asarray(mask),
        "sout": jnp.asarray(sout),
        "wfc1k": params["wfc1"].astype(fc1_dtype),
        "bfc1k": params["bfc1"].reshape(1, HID).astype(jnp.float32),
        "wfc2k": params["wfc2"].astype(jnp.float32),
        "bfc2k": params["bfc2"].reshape(1, -1).astype(jnp.float32),
    }


def reference_forward(x, params):
    """Pure-JAX f32 reference identical to the PyTorch module."""
    def conv(h, w, b):
        y = jax.lax.conv_general_dilated(
            h, w, window_strides=(1, 1), padding=((1, 1), (1, 1)),
            dimension_numbers=("NCHW", "OIHW", "NCHW"))
        return jax.nn.relu(y + b[None, :, None, None])
    h = conv(x, params["w1"], params["b1"])
    h = conv(h, params["w2"], params["b2"])
    h = conv(h, params["w3"], params["b3"])
    h = h.reshape(h.shape[0], -1)
    h = jax.nn.relu(h @ params["wfc1"] + params["bfc1"])
    return h @ params["wfc2"] + params["bfc2"]


if __name__ == "__main__":
    ACTION_COUNT = 6
    B = 2                       # spatial dims (10, 17) are fixed by fc1's fan-in

    key = jax.random.PRNGKey(0)
    k_in, k_par = jax.random.split(key)
    x = jax.random.normal(k_in, (B, 1, H, W), jnp.float32)
    params = init_params(k_par, ACTION_COUNT)
    prepared = prepare_params(params)        # one-time weight repack

    fwd = jax.jit(conv_dqn_forward)
    out = fwd(x, prepared)
    jax.block_until_ready(out)

    assert out.shape == (B, ACTION_COUNT), out.shape
    assert out.dtype == jnp.float32

    # Parity check against a pure-JAX f32 reference of the PyTorch module.
    with jax.default_matmul_precision("float32"):
        ref = jax.jit(reference_forward)(x, params)
    tol = 5e-3 if FC1_COMPUTE_DTYPE == jnp.float32 else 3e-2
    np.testing.assert_allclose(np.asarray(out), np.asarray(ref),
                               rtol=tol, atol=tol)

    print("KERNEL_OK")
</pallas_src>

<mosaic_0001>
module attributes {stable_mosaic.version = 11 : i64} {
  func.func @_conv_stack_kernel(%arg0: i32, %arg1: memref<1x1x512xf32, #tpu.memory_space<vmem>>, %arg2: memref<16x16xf32, #tpu.memory_space<vmem>>, %arg3: memref<16x1xf32, #tpu.memory_space<vmem>>, %arg4: memref<32x144xf32, #tpu.memory_space<vmem>>, %arg5: memref<32x1xf32, #tpu.memory_space<vmem>>, %arg6: memref<64x288xf32, #tpu.memory_space<vmem>>, %arg7: memref<64x1xf32, #tpu.memory_space<vmem>>, %arg8: memref<1x256xf32, #tpu.memory_space<vmem>>, %arg9: memref<256x170xf32, #tpu.memory_space<vmem>>, %arg10: memref<1x64x170xbf16, #tpu.memory_space<vmem>>, %arg11: memref<16x512xf32, #tpu.memory_space<vmem>>, %arg12: memref<32x512xf32, #tpu.memory_space<vmem>>, %arg13: memref<288x256xf32, #tpu.memory_space<vmem>>) attributes {dimension_semantics = [#tpu.dimension_semantics<parallel>], iteration_bounds = array<i64: 2>, scalar_prefetch = 0 : i64, scratch_operands = 3 : i64, tpu.core_type = #tpu.core_type<tc>, window_params = [{transform_indices = @transform_0, window_bounds = array<i64: 1, 1, 512>}, {pipeline_mode = #tpu.pipeline_mode<synchronous>, transform_indices = @transform_1, window_bounds = array<i64: 16, 16>}, {pipeline_mode = #tpu.pipeline_mode<synchronous>, transform_indices = @transform_2, window_bounds = array<i64: 16, 1>}, {pipeline_mode = #tpu.pipeline_mode<synchronous>, transform_indices = @transform_3, window_bounds = array<i64: 32, 144>}, {pipeline_mode = #tpu.pipeline_mode<synchronous>, transform_indices = @transform_4, window_bounds = array<i64: 32, 1>}, {pipeline_mode = #tpu.pipeline_mode<synchronous>, transform_indices = @transform_5, window_bounds = array<i64: 64, 288>}, {pipeline_mode = #tpu.pipeline_mode<synchronous>, transform_indices = @transform_6, window_bounds = array<i64: 64, 1>}, {pipeline_mode = #tpu.pipeline_mode<synchronous>, transform_indices = @transform_7, window_bounds = array<i64: 1, 256>}, {pipeline_mode = #tpu.pipeline_mode<synchronous>, transform_indices = @transform_8, window_bounds = array<i64: 256, 170>}, {transform_indices = @transform_9, window_bounds = array<i64: 1, 64, 170>}]} {
    %c0 = arith.constant 0 : index
    %c0_0 = arith.constant 0 : index
    %0 = vector.load %arg8[%c0, %c0_0] : memref<1x256xf32, #tpu.memory_space<vmem>>, vector<1x256xf32>
    %cst = arith.constant 5.000000e-01 : f32
    %1 = vector.broadcast %cst : f32 to vector<1x256xf32>
    %2 = arith.cmpf ogt, %0, %1 : vector<1x256xf32>
    %cst_1 = arith.constant 0.000000e+00 : f32
    %3 = vector.broadcast %cst_1 : f32 to vector<16x128xf32>
    %cst_2 = arith.constant 0.000000e+00 : f32
    %4 = vector.broadcast %cst_2 : f32 to vector<32x128xf32>
    %c0_3 = arith.constant 0 : index
    %c0_4 = arith.constant 0 : index
    %5 = vector.load %arg11[%c0_3, %c0_4] : memref<16x512xf32, #tpu.memory_space<vmem>>, vector<16x128xf32>
    tpu.vector_store %arg11[%c0_3, %c0_4], %3 {strides = array<i32>} : memref<16x512xf32, #tpu.memory_space<vmem>>, vector<16x128xf32>,
    %c0_5 = arith.constant 0 : index
    %c384 = arith.constant 384 : index
    %6 = vector.load %arg11[%c0_5, %c384] : memref<16x512xf32, #tpu.memory_space<vmem>>, vector<16x128xf32>
    tpu.vector_store %arg11[%c0_5, %c384], %3 {strides = array<i32>} : memref<16x512xf32, #tpu.memory_space<vmem>>, vector<16x128xf32>,
    %c0_6 = arith.constant 0 : index
    %c0_7 = arith.constant 0 : index
    %7 = vector.load %arg12[%c0_6, %c0_7] : memref<32x512xf32, #tpu.memory_space<vmem>>, vector<32x128xf32>
    tpu.vector_store %arg12[%c0_6, %c0_7], %4 {strides = array<i32>} : memref<32x512xf32, #tpu.memory_space<vmem>>, vector<32x128xf32>,
    %c0_8 = arith.constant 0 : index
    %c384_9 = arith.constant 384 : index
    %8 = vector.load %arg12[%c0_8, %c384_9] : memref<32x512xf32, #tpu.memory_space<vmem>>, vector<32x128xf32>
    tpu.vector_store %arg12[%c0_8, %c384_9], %4 {strides = array<i32>} : memref<32x512xf32, #tpu.memory_space<vmem>>, vector<32x128xf32>,
    %c0_10 = arith.constant 0 : index
    %c0_11 = arith.constant 0 : index
    %c108 = arith.constant 108 : index
    %9 = vector.load %arg1[%c0_10, %c0_11, %c108] : memref<1x1x512xf32, #tpu.memory_space<vmem>>, vector<1x1x256xf32>
    %10 = vector.shape_cast %9 : vector<1x1x256xf32> to vector<1x256xf32>
    %c0_12 = arith.constant 0 : index
    %c0_13 = arith.constant 0 : index
    %11 = vector.load %arg13[%c0_12, %c0_13] : memref<288x256xf32, #tpu.memory_space<vmem>>, vector<1x256xf32>
    tpu.vector_store %arg13[%c0_12, %c0_13], %10 {strides = array<i32>} : memref<288x256xf32, #tpu.memory_space<vmem>>, vector<1x256xf32>,
    %c0_14 = arith.constant 0 : index
    %c0_15 = arith.constant 0 : index
    %c109 = arith.constant 109 : index
    %12 = vector.load %arg1[%c0_14, %c0_15, %c109] : memref<1x1x512xf32, #tpu.memory_space<vmem>>, vector<1x1x256xf32>
    %13 = vector.shape_cast %12 : vector<1x1x256xf32> to vector<1x256xf32>
    %c1 = arith.constant 1 : index
    %c0_16 = arith.constant 0 : index
    %14 = vector.load %arg13[%c1, %c0_16] : memref<288x256xf32, #tpu.memory_space<vmem>>, vector<1x256xf32>
    tpu.vector_store %arg13[%c1, %c0_16], %13 {strides = array<i32>} : memref<288x256xf32, #tpu.memory_space<vmem>>, vector<1x256xf32>,
    %c0_17 = arith.constant 0 : index
    %c0_18 = arith.constant 0 : index
    %c110 = arith.constant 110 : index
    %15 = vector.load %arg1[%c0_17, %c0_18, %c110] : memref<1x1x512xf32, #tpu.memory_space<vmem>>, vector<1x1x256xf32>
    %16 = vector.shape_cast %15 : vector<1x1x256xf32> to vector<1x256xf32>
    %c2 = arith.constant 2 : index
    %c0_19 = arith.constant 0 : index
    %17 = vector.load %arg13[%c2, %c0_19] : memref<288x256xf32, #tpu.memory_space<vmem>>, vector<1x256xf32>
    tpu.vector_store %arg13[%c2, %c0_19], %16 {strides = array<i32>} : memref<288x256xf32, #tpu.memory_space<vmem>>, vector<1x256xf32>,
    %c0_20 = arith.constant 0 : index
    %c0_21 = arith.constant 0 : index
    %c127 = arith.constant 127 : index
    %18 = vector.load %arg1[%c0_20, %c0_21, %c127] : memref<1x1x512xf32, #tpu.memory_space<vmem>>, vector<1x1x256xf32>
    %19 = vector.shape_cast %18 : vector<1x1x256xf32> to vector<1x256xf32>
    %c3 = arith.constant 3 : index
    %c0_22 = arith.constant 0 : index
    %20 = vector.load %arg13[%c3, %c0_22] : memref<288x256xf32, #tpu.memory_space<vmem>>, vector<1x256xf32>
    tpu.vector_store %arg13[%c3, %c0_22], %19 {strides = array<i32>} : memref<288x256xf32, #tpu.memory_space<vmem>>, vector<1x256xf32>,
    %c0_23 = arith.constant 0 : index
    %c0_24 = arith.constant 0 : index
    %c128 = arith.constant 128 : index
    %21 = vector.load %arg1[%c0_23, %c0_24, %c128] : memref<1x1x512xf32, #tpu.memory_space<vmem>>, vector<1x1x256xf32>
    %22 = vector.shape_cast %21 : vector<1x1x256xf32> to vector<1x256xf32>
    %c4 = arith.constant 4 : index
    %c0_25 = arith.constant 0 : index
    %23 = vector.load %arg13[%c4, %c0_25] : memref<288x256xf32, #tpu.memory_space<vmem>>, vector<1x256xf32>
    tpu.vector_store %arg13[%c4, %c0_25], %22 {strides = array<i32>} : memref<288x256xf32, #tpu.memory_space<vmem>>, vector<1x256xf32>,
    %c0_26 = arith.constant 0 : index
    %c0_27 = arith.constant 0 : index
    %c129 = arith.constant 129 : index
    %24 = vector.load %arg1[%c0_26, %c0_27, %c129] : memref<1x1x512xf32, #tpu.memory_space<vmem>>, vector<1x1x256xf32>
    %25 = vector.shape_cast %24 : vector<1x1x256xf32> to vector<1x256xf32>
    %c5 = arith.constant 5 : index
    %c0_28 = arith.constant 0 : index
    %26 = vector.load %arg13[%c5, %c0_28] : memref<288x256xf32, #tpu.memory_space<vmem>>, vector<1x256xf32>
    tpu.vector_store %arg13[%c5, %c0_28], %25 {strides = array<i32>} : memref<288x256xf32, #tpu.memory_space<vmem>>, vector<1x256xf32>,
    %c0_29 = arith.constant 0 : index
    %c0_30 = arith.constant 0 : index
    %c146 = arith.constant 146 : index
    %27 = vector.load %arg1[%c0_29, %c0_30, %c146] : memref<1x1x512xf32, #tpu.memory_space<vmem>>, vector<1x1x256xf32>
    %28 = vector.shape_cast %27 : vector<1x1x256xf32> to vector<1x256xf32>
    %c6 = arith.constant 6 : index
    %c0_31 = arith.constant 0 : index
    %29 = vector.load %arg13[%c6, %c0_31] : memref<288x256xf32, #tpu.memory_space<vmem>>, vector<1x256xf32>
    tpu.vector_store %arg13[%c6, %c0_31], %28 {strides = array<i32>} : memref<288x256xf32, #tpu.memory_space<vmem>>, vector<1x256xf32>,
    %c0_32 = arith.constant 0 : index
    %c0_33 = arith.constant 0 : index
    %c147 = arith.constant 147 : index
    %30 = vector.load %arg1[%c0_32, %c0_33, %c147] : memref<1x1x512xf32, #tpu.memory_space<vmem>>, vector<1x1x256xf32>
    %31 = vector.shape_cast %30 : vector<1x1x256xf32> to vector<1x256xf32>
    %c7 = arith.constant 7 : index
    %c0_34 = arith.constant 0 : index
    %32 = vector.load %arg13[%c7, %c0_34] : memref<288x256xf32, #tpu.memory_space<vmem>>, vector<1x256xf32>
    tpu.vector_store %arg13[%c7, %c0_34], %31 {strides = array<i32>} : memref<288x256xf32, #tpu.memory_space<vmem>>, vector<1x256xf32>,
    %c0_35 = arith.constant 0 : index
    %c0_36 = arith.constant 0 : index
    %c148 = arith.constant 148 : index
    %33 = vector.load %arg1[%c0_35, %c0_36, %c148] : memref<1x1x512xf32, #tpu.memory_space<vmem>>, vector<1x1x256xf32>
    %34 = vector.shape_cast %33 : vector<1x1x256xf32> to vector<1x256xf32>
    %c8 = arith.constant 8 : index
    %c0_37 = arith.constant 0 : index
    %35 = vector.load %arg13[%c8, %c0_37] : memref<288x256xf32, #tpu.memory_space<vmem>>, vector<1x256xf32>
    tpu.vector_store %arg13[%c8, %c0_37], %34 {strides = array<i32>} : memref<288x256xf32, #tpu.memory_space<vmem>>, vector<1x256xf32>,
    %cst_38 = arith.constant 0.000000e+00 : f32
    %36 = vector.broadcast %cst_38 : f32 to vector<7x256xf32>
    %c9 = arith.constant 9 : index
    %c0_39 = arith.constant 0 : index
    %37 = vector.load %arg13[%c9, %c0_39] : memref<288x256xf32, #tpu.memory_space<vmem>>, vector<7x256xf32>
    tpu.vector_store %arg13[%c9, %c0_39], %36 {strides = array<i32>} : memref<288x256xf32, #tpu.memory_space<vmem>>, vector<7x256xf32>,
    %c0_40 = arith.constant 0 : index
    %c0_41 = arith.constant 0 : index
    %38 = vector.load %arg2[%c0_40, %c0_41] : memref<16x16xf32, #tpu.memory_space<vmem>>, vector<16x16xf32>
    %c0_42 = arith.constant 0 : index
    %c0_43 = arith.constant 0 : index
    %39 = vector.load %arg13[%c0_42, %c0_43] : memref<288x256xf32, #tpu.memory_space<vmem>>, vector<16x256xf32>
    %cst_44 = arith.constant dense<0.000000e+00> : vector<16x256xf32>
    %40 = tpu.matmul %38, %39, %cst_44 {dimension_numbers = #tpu.dot_dimension_numbers<[1], [0], [0], [1], [0, 0, 1, 1], [], []>} : vector<16x16xf32>, vector<16x256xf32>, vector<16x256xf32> -> vector<16x256xf32>
    %c0_45 = arith.constant 0 : index
    %c0_46 = arith.constant 0 : index
    %41 = vector.load %arg3[%c0_45, %c0_46] : memref<16x1xf32, #tpu.memory_space<vmem>>, vector<16x1xf32>
    %42 = vector.broadcast %41 : vector<16x1xf32> to vector<16x256xf32>
    %43 = arith.addf %40, %42 : vector<16x256xf32>
    %cst_47 = arith.constant 0.000000e+00 : f32
    %44 = vector.broadcast %cst_47 : f32 to vector<16x256xf32>
    %45 = arith.maximumf %43, %44 : vector<16x256xf32>
    %cst_48 = arith.constant 0.000000e+00 : f32
    %46 = vector.shape_cast %2 : vector<1x256xi1> to vector<1x256xi1>
    %47 = vector.broadcast %46 : vector<1x256xi1> to vector<16x256xi1>
    %48 = vector.broadcast %cst_48 : f32 to vector<16x256xf32>
    %49 = arith.select %47, %45, %48 : vector<16x256xi1>, vector<16x256xf32>
    %c0_49 = arith.constant 0 : index
    %c128_50 = arith.constant 128 : index
    %50 = vector.load %arg11[%c0_49, %c128_50] : memref<16x512xf32, #tpu.memory_space<vmem>>, vector<16x256xf32>
    tpu.vector_store %arg11[%c0_49, %c128_50], %49 {strides = array<i32>} : memref<16x512xf32, #tpu.memory_space<vmem>>, vector<16x256xf32>,
    %c0_51 = arith.constant 0 : index
    %c108_52 = arith.constant 108 : index
    %51 = vector.load %arg11[%c0_51, %c108_52] : memref<16x512xf32, #tpu.memory_space<vmem>>, vector<16x256xf32>
    %c0_53 = arith.constant 0 : index
    %c0_54 = arith.constant 0 : index
    %52 = vector.load %arg13[%c0_53, %c0_54] : memref<288x256xf32, #tpu.memory_space<vmem>>, vector<16x256xf32>
    tpu.vector_store %arg13[%c0_53, %c0_54], %51 {strides = array<i32>} : memref<288x256xf32, #tpu.memory_space<vmem>>, vector<16x256xf32>,
    %c0_55 = arith.constant 0 : index
    %c109_56 = arith.constant 109 : index
    %53 = vector.load %arg11[%c0_55, %c109_56] : memref<16x512xf32, #tpu.memory_space<vmem>>, vector<16x256xf32>
    %c16 = arith.constant 16 : index
    %c0_57 = arith.constant 0 : index
    %54 = vector.load %arg13[%c16, %c0_57] : memref<288x256xf32, #tpu.memory_space<vmem>>, vector<16x256xf32>
    tpu.vector_store %arg13[%c16, %c0_57], %53 {strides = array<i32>} : memref<288x256xf32, #tpu.memory_space<vmem>>, vector<16x256xf32>,
    %c0_58 = arith.constant 0 : index
    %c110_59 = arith.constant 110 : index
    %55 = vector.load %arg11[%c0_58, %c110_59] : memref<16x512xf32, #tpu.memory_space<vmem>>, vector<16x256xf32>
    %c32 = arith.constant 32 : index
    %c0_60 = arith.constant 0 : index
    %56 = vector.load %arg13[%c32, %c0_60] : memref<288x256xf32, #tpu.memory_space<vmem>>, vector<16x256xf32>
    tpu.vector_store %arg13[%c32, %c0_60], %55 {strides = array<i32>} : memref<288x256xf32, #tpu.memory_space<vmem>>, vector<16x256xf32>,
    %c0_61 = arith.constant 0 : index
    %c127_62 = arith.constant 127 : index
    %57 = vector.load %arg11[%c0_61, %c127_62] : memref<16x512xf32, #tpu.memory_space<vmem>>, vector<16x256xf32>
    %c48 = arith.constant 48 : index
    %c0_63 = arith.constant 0 : index
    %58 = vector.load %arg13[%c48, %c0_63] : memref<288x256xf32, #tpu.memory_space<vmem>>, vector<16x256xf32>
    tpu.vector_store %arg13[%c48, %c0_63], %57 {strides = array<i32>} : memref<288x256xf32, #tpu.memory_space<vmem>>, vector<16x256xf32>,
    %c0_64 = arith.constant 0 : index
    %c128_65 = arith.constant 128 : index
    %59 = vector.load %arg11[%c0_64, %c128_65] : memref<16x512xf32, #tpu.memory_space<vmem>>, vector<16x256xf32>
    %c64 = arith.constant 64 : index
    %c0_66 = arith.constant 0 : index
    %60 = vector.load %arg13[%c64, %c0_66] : memref<288x256xf32, #tpu.memory_space<vmem>>, vector<16x256xf32>
    tpu.vector_store %arg13[%c64, %c0_66], %59 {strides = array<i32>} : memref<288x256xf32, #tpu.memory_space<vmem>>, vector<16x256xf32>,
    %c0_67 = arith.constant 0 : index
    %c129_68 = arith.constant 129 : index
    %61 = vector.load %arg11[%c0_67, %c129_68] : memref<16x512xf32, #tpu.memory_space<vmem>>, vector<16x256xf32>
    %c80 = arith.constant 80 : index
    %c0_69 = arith.constant 0 : index
    %62 = vector.load %arg13[%c80, %c0_69] : memref<288x256xf32, #tpu.memory_space<vmem>>, vector<16x256xf32>
    tpu.vector_store %arg13[%c80, %c0_69], %61 {strides = array<i32>} : memref<288x256xf32, #tpu.memory_space<vmem>>, vector<16x256xf32>,
    %c0_70 = arith.constant 0 : index
    %c146_71 = arith.constant 146 : index
    %63 = vector.load %arg11[%c0_70, %c146_71] : memref<16x512xf32, #tpu.memory_space<vmem>>, vector<16x256xf32>
    %c96 = arith.constant 96 : index
    %c0_72 = arith.constant 0 : index
    %64 = vector.load %arg13[%c96, %c0_72] : memref<288x256xf32, #tpu.memory_space<vmem>>, vector<16x256xf32>
    tpu.vector_store %arg13[%c96, %c0_72], %63 {strides = array<i32>} : memref<288x256xf32, #tpu.memory_space<vmem>>, vector<16x256xf32>,
    %c0_73 = arith.constant 0 : index
    %c147_74 = arith.constant 147 : index
    %65 = vector.load %arg11[%c0_73, %c147_74] : memref<16x512xf32, #tpu.memory_space<vmem>>, vector<16x256xf32>
    %c112 = arith.constant 112 : index
    %c0_75 = arith.constant 0 : index
    %66 = vector.load %arg13[%c112, %c0_75] : memref<288x256xf32, #tpu.memory_space<vmem>>, vector<16x256xf32>
    tpu.vector_store %arg13[%c112, %c0_75], %65 {strides = array<i32>} : memref<288x256xf32, #tpu.memory_space<vmem>>, vector<16x256xf32>,
    %c0_76 = arith.constant 0 : index
    %c148_77 = arith.constant 148 : index
    %67 = vector.load %arg11[%c0_76, %c148_77] : memref<16x512xf32, #tpu.memory_space<vmem>>, vector<16x256xf32>
    %c128_78 = arith.constant 128 : index
    %c0_79 = arith.constant 0 : index
    %68 = vector.load %arg13[%c128_78, %c0_79] : memref<288x256xf32, #tpu.memory_space<vmem>>, vector<16x256xf32>
    tpu.vector_store %arg13[%c128_78, %c0_79], %67 {strides = array<i32>} : memref<288x256xf32, #tpu.memory_space<vmem>>, vector<16x256xf32>,
    %c0_80 = arith.constant 0 : index
    %c0_81 = arith.constant 0 : index
    %69 = vector.load %arg4[%c0_80, %c0_81] : memref<32x144xf32, #tpu.memory_space<vmem>>, vector<32x144xf32>
    %c0_82 = arith.constant 0 : index
    %c0_83 = arith.constant 0 : index
    %70 = vector.load %arg13[%c0_82, %c0_83] : memref<288x256xf32, #tpu.memory_space<vmem>>, vector<144x256xf32>
    %cst_84 = arith.constant dense<0.000000e+00> : vector<32x256xf32>
    %71 = tpu.matmul %69, %70, %cst_84 {dimension_numbers = #tpu.dot_dimension_numbers<[1], [0], [0], [1], [0, 0, 1, 1], [], []>} : vector<32x144xf32>, vector<144x256xf32>, vector<32x256xf32> -> vector<32x256xf32>
    %c0_85 = arith.constant 0 : index
    %c0_86 = arith.constant 0 : index
    %72 = vector.load %arg5[%c0_85, %c0_86] : memref<32x1xf32, #tpu.memory_space<vmem>>, vector<32x1xf32>
    %73 = vector.broadcast %72 : vector<32x1xf32> to vector<32x256xf32>
    %74 = arith.addf %71, %73 : vector<32x256xf32>
    %cst_87 = arith.constant 0.000000e+00 : f32
    %75 = vector.broadcast %cst_87 : f32 to vector<32x256xf32>
    %76 = arith.maximumf %74, %75 : vector<32x256xf32>
    %cst_88 = arith.constant 0.000000e+00 : f32
    %77 = vector.shape_cast %2 : vector<1x256xi1> to vector<1x256xi1>
    %78 = vector.broadcast %77 : vector<1x256xi1> to vector<32x256xi1>
    %79 = vector.broadcast %cst_88 : f32 to vector<32x256xf32>
    %80 = arith.select %78, %76, %79 : vector<32x256xi1>, vector<32x256xf32>
    %c0_89 = arith.constant 0 : index
    %c128_90 = arith.constant 128 : index
    %81 = vector.load %arg12[%c0_89, %c128_90] : memref<32x512xf32, #tpu.memory_space<vmem>>, vector<32x256xf32>
    tpu.vector_store %arg12[%c0_89, %c128_90], %80 {strides = array<i32>} : memref<32x512xf32, #tpu.memory_space<vmem>>, vector<32x256xf32>,
    %c0_91 = arith.constant 0 : index
    %c108_92 = arith.constant 108 : index
    %82 = vector.load %arg12[%c0_91, %c108_92] : memref<32x512xf32, #tpu.memory_space<vmem>>, vector<32x256xf32>
    %c0_93 = arith.constant 0 : index
    %c0_94 = arith.constant 0 : index
    %83 = vector.load %arg13[%c0_93, %c0_94] : memref<288x256xf32, #tpu.memory_space<vmem>>, vector<32x256xf32>
    tpu.vector_store %arg13[%c0_93, %c0_94], %82 {strides = array<i32>} : memref<288x256xf32, #tpu.memory_space<vmem>>, vector<32x256xf32>,
    %c0_95 = arith.constant 0 : index
    %c109_96 = arith.constant 109 : index
    %84 = vector.load %arg12[%c0_95, %c109_96] : memref<32x512xf32, #tpu.memory_space<vmem>>, vector<32x256xf32>
    %c32_97 = arith.constant 32 : index
    %c0_98 = arith.constant 0 : index
    %85 = vector.load %arg13[%c32_97, %c0_98] : memref<288x256xf32, #tpu.memory_space<vmem>>, vector<32x256xf32>
    tpu.vector_store %arg13[%c32_97, %c0_98], %84 {strides = array<i32>} : memref<288x256xf32, #tpu.memory_space<vmem>>, vector<32x256xf32>,
    %c0_99 = arith.constant 0 : index
    %c110_100 = arith.constant 110 : index
    %86 = vector.load %arg12[%c0_99, %c110_100] : memref<32x512xf32, #tpu.memory_space<vmem>>, vector<32x256xf32>
    %c64_101 = arith.constant 64 : index
    %c0_102 = arith.constant 0 : index
    %87 = vector.load %arg13[%c64_101, %c0_102] : memref<288x256xf32, #tpu.memory_space<vmem>>, vector<32x256xf32>
    tpu.vector_store %arg13[%c64_101, %c0_102], %86 {strides = array<i32>} : memref<288x256xf32, #tpu.memory_space<vmem>>, vector<32x256xf32>,
    %c0_103 = arith.constant 0 : index
    %c127_104 = arith.constant 127 : index
    %88 = vector.load %arg12[%c0_103, %c127_104] : memref<32x512xf32, #tpu.memory_space<vmem>>, vector<32x256xf32>
    %c96_105 = arith.constant 96 : index
    %c0_106 = arith.constant 0 : index
    %89 = vector.load %arg13[%c96_105, %c0_106] : memref<288x256xf32, #tpu.memory_space<vmem>>, vector<32x256xf32>
    tpu.vector_store %arg13[%c96_105, %c0_106], %88 {strides = array<i32>} : memref<288x256xf32, #tpu.memory_space<vmem>>, vector<32x256xf32>,
    %c0_107 = arith.constant 0 : index
    %c128_108 = arith.constant 128 : index
    %90 = vector.load %arg12[%c0_107, %c128_108] : memref<32x512xf32, #tpu.memory_space<vmem>>, vector<32x256xf32>
    %c128_109 = arith.constant 128 : index
    %c0_110 = arith.constant 0 : index
    %91 = vector.load %arg13[%c128_109, %c0_110] : memref<288x256xf32, #tpu.memory_space<vmem>>, vector<32x256xf32>
    tpu.vector_store %arg13[%c128_109, %c0_110], %90 {strides = array<i32>} : memref<288x256xf32, #tpu.memory_space<vmem>>, vector<32x256xf32>,
    %c0_111 = arith.constant 0 : index
    %c129_112 = arith.constant 129 : index
    %92 = vector.load %arg12[%c0_111, %c129_112] : memref<32x512xf32, #tpu.memory_space<vmem>>, vector<32x256xf32>
    %c160 = arith.constant 160 : index
    %c0_113 = arith.constant 0 : index
    %93 = vector.load %arg13[%c160, %c0_113] : memref<288x256xf32, #tpu.memory_space<vmem>>, vector<32x256xf32>
    tpu.vector_store %arg13[%c160, %c0_113], %92 {strides = array<i32>} : memref<288x256xf32, #tpu.memory_space<vmem>>, vector<32x256xf32>,
    %c0_114 = arith.constant 0 : index
    %c146_115 = arith.constant 146 : index
    %94 = vector.load %arg12[%c0_114, %c146_115] : memref<32x512xf32, #tpu.memory_space<vmem>>, vector<32x256xf32>
    %c192 = arith.constant 192 : index
    %c0_116 = arith.constant 0 : index
    %95 = vector.load %arg13[%c192, %c0_116] : memref<288x256xf32, #tpu.memory_space<vmem>>, vector<32x256xf32>
    tpu.vector_store %arg13[%c192, %c0_116], %94 {strides = array<i32>} : memref<288x256xf32, #tpu.memory_space<vmem>>, vector<32x256xf32>,
    %c0_117 = arith.constant 0 : index
    %c147_118 = arith.constant 147 : index
    %96 = vector.load %arg12[%c0_117, %c147_118] : memref<32x512xf32, #tpu.memory_space<vmem>>, vector<32x256xf32>
    %c224 = arith.constant 224 : index
    %c0_119 = arith.constant 0 : index
    %97 = vector.load %arg13[%c224, %c0_119] : memref<288x256xf32, #tpu.memory_space<vmem>>, vector<32x256xf32>
    tpu.vector_store %arg13[%c224, %c0_119], %96 {strides = array<i32>} : memref<288x256xf32, #tpu.memory_space<vmem>>, vector<32x256xf32>,
    %c0_120 = arith.constant 0 : index
    %c148_121 = arith.constant 148 : index
    %98 = vector.load %arg12[%c0_120, %c148_121] : memref<32x512xf32, #tpu.memory_space<vmem>>, vector<32x256xf32>
    %c256 = arith.constant 256 : index
    %c0_122 = arith.constant 0 : index
    %99 = vector.load %arg13[%c256, %c0_122] : memref<288x256xf32, #tpu.memory_space<vmem>>, vector<32x256xf32>
    tpu.vector_store %arg13[%c256, %c0_122], %98 {strides = array<i32>} : memref<288x256xf32, #tpu.memory_space<vmem>>, vector<32x256xf32>,
    %c0_123 = arith.constant 0 : index
    %c0_124 = arith.constant 0 : index
    %100 = vector.load %arg6[%c0_123, %c0_124] : memref<64x288xf32, #tpu.memory_space<vmem>>, vector<64x288xf32>
    %c0_125 = arith.constant 0 : index
    %c0_126 = arith.constant 0 : index
    %101 = vector.load %arg13[%c0_125, %c0_126] : memref<288x256xf32, #tpu.memory_space<vmem>>, vector<288x256xf32>
    %cst_127 = arith.constant dense<0.000000e+00> : vector<64x256xf32>
    %102 = tpu.matmul %100, %101, %cst_127 {dimension_numbers = #tpu.dot_dimension_numbers<[1], [0], [0], [1], [0, 0, 1, 1], [], []>} : vector<64x288xf32>, vector<288x256xf32>, vector<64x256xf32> -> vector<64x256xf32>
    %c0_128 = arith.constant 0 : index
    %c0_129 = arith.constant 0 : index
    %103 = vector.load %arg7[%c0_128, %c0_129] : memref<64x1xf32, #tpu.memory_space<vmem>>, vector<64x1xf32>
    %104 = vector.broadcast %103 : vector<64x1xf32> to vector<64x256xf32>
    %105 = arith.addf %102, %104 : vector<64x256xf32>
    %cst_130 = arith.constant 0.000000e+00 : f32
    %106 = vector.broadcast %cst_130 : f32 to vector<64x256xf32>
    %107 = arith.maximumf %105, %106 : vector<64x256xf32>
    %c0_131 = arith.constant 0 : index
    %c0_132 = arith.constant 0 : index
    %108 = vector.load %arg9[%c0_131, %c0_132] : memref<256x170xf32, #tpu.memory_space<vmem>>, vector<256x170xf32>
    %cst_133 = arith.constant dense<0.000000e+00> : vector<64x170xf32>
    %109 = tpu.matmul %107, %108, %cst_133 {dimension_numbers = #tpu.dot_dimension_numbers<[1], [0], [0], [1], [0, 0, 1, 1], [], []>} : vector<64x256xf32>, vector<256x170xf32>, vector<64x170xf32> -> vector<64x170xf32>
    %110 = arith.truncf %109 : vector<64x170xf32> to vector<64x170xbf16>
    %c0_134 = arith.constant 0 : index
    %c0_135 = arith.constant 0 : index
    %c0_136 = arith.constant 0 : index
    %111 = vector.load %arg10[%c0_134, %c0_135, %c0_136] : memref<1x64x170xbf16, #tpu.memory_space<vmem>>, vector<1x64x170xbf16>
    %112 = vector.shape_cast %111 : vector<1x64x170xbf16> to vector<64x170xbf16>
    %113 = vector.shape_cast %110 : vector<64x170xbf16> to vector<1x64x170xbf16>
    tpu.vector_store %arg10[%c0_134, %c0_135, %c0_136], %113 {strides = array<i32>} : memref<1x64x170xbf16, #tpu.memory_space<vmem>>, vector<1x64x170xbf16>,
    return
  }
  func.func @transform_0(%arg0: i32) -> (i32, i32, i32) {
    %c0_i32 = arith.constant 0 : i32
    %c0_i32_0 = arith.constant 0 : i32
    %c0_i32_1 = arith.constant 0 : i32
    return %arg0, %c0_i32, %c0_i32_0 : i32, i32, i32
  }
  func.func @transform_1(%arg0: i32) -> (i32, i32) {
    %c0_i32 = arith.constant 0 : i32
    %c0_i32_0 = arith.constant 0 : i32
    %c0_i32_1 = arith.constant 0 : i32
    return %c0_i32, %c0_i32_0 : i32, i32
  }
  func.func @transform_2(%arg0: i32) -> (i32, i32) {
    %c0_i32 = arith.constant 0 : i32
    %c0_i32_0 = arith.constant 0 : i32
    %c0_i32_1 = arith.constant 0 : i32
    return %c0_i32, %c0_i32_0 : i32, i32
  }
  func.func @transform_3(%arg0: i32) -> (i32, i32) {
    %c0_i32 = arith.constant 0 : i32
    %c0_i32_0 = arith.constant 0 : i32
    %c0_i32_1 = arith.constant 0 : i32
    return %c0_i32, %c0_i32_0 : i32, i32
  }
  func.func @transform_4(%arg0: i32) -> (i32, i32) {
    %c0_i32 = arith.constant 0 : i32
    %c0_i32_0 = arith.constant 0 : i32
    %c0_i32_1 = arith.constant 0 : i32
    return %c0_i32, %c0_i32_0 : i32, i32
  }
  func.func @transform_5(%arg0: i32) -> (i32, i32) {
    %c0_i32 = arith.constant 0 : i32
    %c0_i32_0 = arith.constant 0 : i32
    %c0_i32_1 = arith.constant 0 : i32
    return %c0_i32, %c0_i32_0 : i32, i32
  }
  func.func @transform_6(%arg0: i32) -> (i32, i32) {
    %c0_i32 = arith.constant 0 : i32
    %c0_i32_0 = arith.constant 0 : i32
    %c0_i32_1 = arith.constant 0 : i32
    return %c0_i32, %c0_i32_0 : i32, i32
  }
  func.func @transform_7(%arg0: i32) -> (i32, i32) {
    %c0_i32 = arith.constant 0 : i32
    %c0_i32_0 = arith.constant 0 : i32
    %c0_i32_1 = arith.constant 0 : i32
    return %c0_i32, %c0_i32_0 : i32, i32
  }
  func.func @transform_8(%arg0: i32) -> (i32, i32) {
    %c0_i32 = arith.constant 0 : i32
    %c0_i32_0 = arith.constant 0 : i32
    %c0_i32_1 = arith.constant 0 : i32
    return %c0_i32, %c0_i32_0 : i32, i32
  }
  func.func @transform_9(%arg0: i32) -> (i32, i32, i32) {
    %c0_i32 = arith.constant 0 : i32
    %c0_i32_0 = arith.constant 0 : i32
    %c0_i32_1 = arith.constant 0 : i32
    return %arg0, %c0_i32, %c0_i32_0 : i32, i32, i32
  }
}

module attributes {stable_mosaic.version = 11 : i64} {
  func.func @_fc_head_kernel(%arg0: i32, %arg1: memref<2x2176xbf16, #tpu.memory_space<vmem>>, %arg2: memref<2176x256xbf16, #tpu.memory_space<vmem>>, %arg3: memref<1x256xf32, #tpu.memory_space<vmem>>, %arg4: memref<256x6xf32, #tpu.memory_space<vmem>>, %arg5: memref<1x6xf32, #tpu.memory_space<vmem>>, %arg6: memref<2x6xf32, #tpu.memory_space<vmem>>, %arg7: memref<2x256xf32, #tpu.memory_space<vmem>>) attributes {dimension_semantics = [#tpu.dimension_semantics<arbitrary>], iteration_bounds = array<i64: 5>, scalar_prefetch = 0 : i64, scratch_operands = 1 : i64, tpu.core_type = #tpu.core_type<tc>, window_params = [{transform_indices = @transform_0, window_bounds = array<i64: 2, 2176>}, {transform_indices = @transform_1, window_bounds = array<i64: 2176, 256>}, {pipeline_mode = #tpu.pipeline_mode<synchronous>, transform_indices = @transform_2, window_bounds = array<i64: 1, 256>}, {pipeline_mode = #tpu.pipeline_mode<synchronous>, transform_indices = @transform_3, window_bounds = array<i64: 256, 6>}, {pipeline_mode = #tpu.pipeline_mode<synchronous>, transform_indices = @transform_4, window_bounds = array<i64: 1, 6>}, {pipeline_mode = #tpu.pipeline_mode<synchronous>, transform_indices = @transform_5, window_bounds = array<i64: 2, 6>}]} {
    %c0_i32 = arith.constant 0 : i32
    %0 = arith.cmpi eq, %arg0, %c0_i32 : i32
    %1 = arith.extui %0 : i1 to i32
    %c0_i32_0 = arith.constant 0 : i32
    %2 = arith.cmpi ne, %1, %c0_i32_0 : i32
    scf.if %2 {
      %cst_9 = arith.constant 0.000000e+00 : f32
      %12 = vector.broadcast %cst_9 : f32 to vector<2x256xf32>
      %c0_10 = arith.constant 0 : index
      %c0_11 = arith.constant 0 : index
      %13 = vector.load %arg7[%c0_10, %c0_11] : memref<2x256xf32, #tpu.memory_space<vmem>>, vector<2x256xf32>
      tpu.vector_store %arg7[%c0_10, %c0_11], %12 {strides = array<i32>} : memref<2x256xf32, #tpu.memory_space<vmem>>, vector<2x256xf32>,
    } else {
    }
    %c0 = arith.constant 0 : index
    %c0_1 = arith.constant 0 : index
    %3 = vector.load %arg7[%c0, %c0_1] : memref<2x256xf32, #tpu.memory_space<vmem>>, vector<2x256xf32>
    %c0_2 = arith.constant 0 : index
    %c0_3 = arith.constant 0 : index
    %4 = vector.load %arg1[%c0_2, %c0_3] : memref<2x2176xbf16, #tpu.memory_space<vmem>>, vector<2x2176xbf16>
    %c0_4 = arith.constant 0 : index
    %c0_5 = arith.constant 0 : index
    %5 = vector.load %arg2[%c0_4, %c0_5] : memref<2176x256xbf16, #tpu.memory_space<vmem>>, vector<2176x256xbf16>
    %cst = arith.constant dense<0.000000e+00> : vector<2x256xf32>
    %6 = tpu.matmul %4, %5, %cst {dimension_numbers = #tpu.dot_dimension_numbers<[1], [0], [0], [1], [0, 0, 1, 1], [], []>} : vector<2x2176xbf16>, vector<2176x256xbf16>, vector<2x256xf32> -> vector<2x256xf32>
    %7 = arith.addf %3, %6 : vector<2x256xf32>
    %c0_6 = arith.constant 0 : index
    %c0_7 = arith.constant 0 : index
    %8 = vector.load %arg7[%c0_6, %c0_7] : memref<2x256xf32, #tpu.memory_space<vmem>>, vector<2x256xf32>
    tpu.vector_store %arg7[%c0_6, %c0_7], %7 {strides = array<i32>} : memref<2x256xf32, #tpu.memory_space<vmem>>, vector<2x256xf32>,
    %c4_i32 = arith.constant 4 : i32
    %9 = arith.cmpi eq, %arg0, %c4_i32 : i32
    %10 = arith.extui %9 : i1 to i32
    %c0_i32_8 = arith.constant 0 : i32
    %11 = arith.cmpi ne, %10, %c0_i32_8 : i32
    scf.if %11 {
      %c0_9 = arith.constant 0 : index
      %c0_10 = arith.constant 0 : index
      %12 = vector.load %arg7[%c0_9, %c0_10] : memref<2x256xf32, #tpu.memory_space<vmem>>, vector<2x256xf32>
      %c0_11 = arith.constant 0 : index
      %c0_12 = arith.constant 0 : index
      %13 = vector.load %arg3[%c0_11, %c0_12] : memref<1x256xf32, #tpu.memory_space<vmem>>, vector<1x256xf32>
      %14 = vector.broadcast %13 : vector<1x256xf32> to vector<2x256xf32>
      %15 = arith.addf %12, %14 : vector<2x256xf32>
      %cst_13 = arith.constant 0.000000e+00 : f32
      %16 = vector.broadcast %cst_13 : f32 to vector<2x256xf32>
      %17 = arith.maximumf %15, %16 : vector<2x256xf32>
      %c0_14 = arith.constant 0 : index
      %c0_15 = arith.constant 0 : index
      %18 = vector.load %arg4[%c0_14, %c0_15] : memref<256x6xf32, #tpu.memory_space<vmem>>, vector<256x6xf32>
      %cst_16 = arith.constant dense<0.000000e+00> : vector<2x6xf32>
      %19 = tpu.matmul %17, %18, %cst_16 {dimension_numbers = #tpu.dot_dimension_numbers<[1], [0], [0], [1], [0, 0, 1, 1], [], []>} : vector<2x256xf32>, vector<256x6xf32>, vector<2x6xf32> -> vector<2x6xf32>
      %c0_17 = arith.constant 0 : index
      %c0_18 = arith.constant 0 : index
      %20 = vector.load %arg5[%c0_17, %c0_18] : memref<1x6xf32, #tpu.memory_space<vmem>>, vector<1x6xf32>
      %21 = vector.broadcast %20 : vector<1x6xf32> to vector<2x6xf32>
      %22 = arith.addf %19, %21 : vector<2x6xf32>
      %c0_19 = arith.constant 0 : index
      %c0_20 = arith.constant 0 : index
      %23 = vector.load %arg6[%c0_19, %c0_20] : memref<2x6xf32, #tpu.memory_space<vmem>>, vector<2x6xf32>
      tpu.vector_store %arg6[%c0_19, %c0_20], %22 {strides = array<i32>} : memref<2x6xf32, #tpu.memory_space<vmem>>, vector<2x6xf32>,
    } else {
    }
    return
  }
  func.func @transform_0(%arg0: i32) -> (i32, i32) {
    %c0_i32 = arith.constant 0 : i32
    %c0_i32_0 = arith.constant 0 : i32
    return %c0_i32, %arg0 : i32, i32
  }
  func.func @transform_1(%arg0: i32) -> (i32, i32) {
    %c0_i32 = arith.constant 0 : i32
    %c0_i32_0 = arith.constant 0 : i32
    return %arg0, %c0_i32 : i32, i32
  }
  func.func @transform_2(%arg0: i32) -> (i32, i32) {
    %c0_i32 = arith.constant 0 : i32
    %c0_i32_0 = arith.constant 0 : i32
    %c0_i32_1 = arith.constant 0 : i32
    return %c0_i32, %c0_i32_0 : i32, i32
  }
  func.func @transform_3(%arg0: i32) -> (i32, i32) {
    %c0_i32 = arith.constant 0 : i32
    %c0_i32_0 = arith.constant 0 : i32
    %c0_i32_1 = arith.constant 0 : i32
    return %c0_i32, %c0_i32_0 : i32, i32
  }
  func.func @transform_4(%arg0: i32) -> (i32, i32) {
    %c0_i32 = arith.constant 0 : i32
    %c0_i32_0 = arith.constant 0 : i32
    %c0_i32_1 = arith.constant 0 : i32
    return %c0_i32, %c0_i32_0 : i32, i32
  }
  func.func @transform_5(%arg0: i32) -> (i32, i32) {
    %c0_i32 = arith.constant 0 : i32
    %c0_i32_0 = arith.constant 0 : i32
    %c0_i32_1 = arith.constant 0 : i32
    return %c0_i32, %c0_i32_0 : i32, i32
  }
}

</mosaic_0001>

<bundles_post_ra>
// kernel: conv_dqn_forward.2
= control target key start
LH: loop header
LB: loop body
LE: loop exit
PB: predicated region body
PF: predicated region fallthrough
CT: control target
= control target key end

     0   :  { %14 = vsyncpa [#allocation6], 0  ;;  %s4220_s0 = inlined_call_operand.vmem [shape: f32[2,1,512], index: 0, kind: input, shape index: {}]   ;;  %s4221_s1 = inlined_call_operand.hbm [shape: f32[16,16], index: 1, kind: input, shape index: {}]   ;;  %s4222_s2 = inlined_call_operand.vmem [shape: f32[16,1], index: 2, kind: input, shape index: {}]   ;;  %s4223_s3 = inlined_call_operand.hbm [shape: f32[32,144], index: 3, kind: input, shape index: {}]   ;;  %s4224_s4 = inlined_call_operand.vmem [shape: f32[32,1], index: 4, kind: input, shape index: {}]   ;;  %s4225_s5 = inlined_call_operand.hbm [shape: f32[64,288], index: 5, kind: input, shape index: {}]   ;;  %s4226_s6 = inlined_call_operand.vmem [shape: f32[64,1], index: 6, kind: input, shape index: {}]   ;;  %s4227_s7 = inlined_call_operand.hbm [shape: f32[1,256], index: 7, kind: input, shape index: {}]   ;;  %s4228_s8 = inlined_call_operand.vmem [shape: f32[256,170], index: 8, kind: input, shape index: {}]   ;;  %s4229_s9 = inlined_call_operand.vmem [shape: bf16[2,64,170], index: 9, kind: output, shape index: {}]  }
   0x1   :  { %15 = vsyncpa [#allocation8], 0 }
   0x2   :  { %16 = vsyncpa [#allocation11], 0  ;;  %s3111_s30 = smov 0  }
   0x3 LB: > { %s3041_s10 = smov [#allocation7]   ;;  %s3117_s12 = sadd.s32 4294967295, %s3039_s30   ;;  %s3039_s30 = sphi %s3111_s30, %s22_s30  }
   0x4   : > { %s275_s11 = sshll.u32 %s3041_s10, 4  ;;  %p2449_p0 = scmp.ge.s32.totalorder %s3039_s30, 1  ;;  %s3122_s11 = int_to_ptr.vmem [resolvable:$true] %s275_s11 }
   0x5   : > { %p247_p1 = scmp.lt.s32.totalorder %s3039_s30, 3  ;;  %p4230_p2 = scmp.eq.s32.totalorder %s3117_s12, 0 }
   0x6   : > { %s3042_s14 = smov [#allocation5]   ;;  %s3043_s17 = smov [#allocation9]  }
   0x7   : > { %p3124_p3 = pnand %p2449_p0, %p247_p1  ;;  %s259_s15 = sshll.u32 %s3042_s14, 4  ;;  %s3130_s15 = int_to_ptr.vmem [resolvable:$true] %s259_s15 }
   0x8   : > { %s3138_s18 = sshll.u32 %s3043_s17, 4  ;;  %s2909_s21 = scalar_lea.hbm %s4223_s3, 1024  ;;  %s292_s18 = int_to_ptr.vmem [resolvable:$true] %s3138_s18 }
   0x9   : > { %s4232_s13 = scalar_select %p3124_p3, 1, 0 }
   0xa   : > { %p2720_p4 = pneg %p3124_p3  ;;  %p2910_p6 = scmp.ne.s32.totalorder %s4223_s3, %s2909_s21 }
   0xb   : > { %p2916_p10 = scmp.lt.u32.totalorder %s2909_s21, %s4223_s3 }
   0xc   : > { %p3134_p5 = pnand %p4230_p2, %p2720_p4 }
   0xe   : > { %p3148_p7 = pneg %p3134_p5 }
  0x10   : > { %p2912_p8 = pnand %p3148_p7, %p2910_p6 }
  0x12   : > { %p2913_p9 = pneg %p2912_p8 }
  0x14   : > { %p2918_p11 = pnand %p2916_p10, %p2913_p9 }
  0x16   : > { %2921 = shalt.err (!%p2918_p11)
}
  0x17   : > { %s2922_s27 = scalar_lea.vmem %s3122_s11, 1024  ;;  %p2930_p1 = scmp.lt.s32.totalorder %s3122_s11, %s3122_s11 }
  0x18   : > { %p2923_p12 = scmp.ne.s32.totalorder %s3122_s11, %s2922_s27  ;;  %p2931_p4 = scmp.lt.s32.totalorder %s2922_s27, %s2922_s27 }
  0x1a   : > { %p2925_p13 = pnand %p2923_p12, %p3148_p7  ;;  %p2932_p6 = por %p2931_p4, %p2930_p1 }
  0x1c   : > { %p2926_p0 = pneg %p2925_p13 }
  0x1e   : > { %p2933_p8 = pnand %p2932_p6, %p2926_p0 }
  0x20   : > { %2936 = shalt.err (!%p2933_p8)
}
  0x21   : > { %s3044_s28 = smov 256   ;;  %s3045_s29 = smov 16  }
  0x22   : > { %2726 = dma.hbm_to_vmem [thread:$0]  (!%p3134_p5), %s4223_s3, 1024, %s3122_s11, [#allocation8], %s3044_s28, %s3044_s28, %s3045_s29  }
  0x23   : > { %s2937_s20 = scalar_lea.hbm %s4221_s1, 256 }
  0x24   : > { %p2938_p9 = scmp.ne.s32.totalorder %s4221_s1, %s2937_s20  ;;  %p2944_p12 = scmp.lt.u32.totalorder %s2937_s20, %s4221_s1 }
  0x26   : > { %p2940_p10 = pnand %p2938_p9, %p3148_p7 }
  0x28   : > { %p2941_p11 = pneg %p2940_p10 }
  0x2a   : > { %p2946_p13 = pnand %p2944_p12, %p2941_p11 }
  0x2c   : > { %2949 = shalt.err (!%p2946_p13)
}
  0x2d   : > { %s2950_s11 = scalar_lea.vmem %s3130_s15, 256  ;;  %p2958_p6 = scmp.lt.s32.totalorder %s3130_s15, %s3130_s15 }
  0x2e   : > { %p2951_p0 = scmp.ne.s32.totalorder %s3130_s15, %s2950_s11  ;;  %p2959_p8 = scmp.lt.s32.totalorder %s2950_s11, %s2950_s11 }
  0x30   : > { %p2953_p1 = pnand %p2951_p0, %p3148_p7  ;;  %p2960_p9 = por %p2959_p8, %p2958_p6 }
  0x32   : > { %p2954_p4 = pneg %p2953_p1 }
  0x34   : > { %p2961_p10 = pnand %p2960_p9, %p2954_p4 }
  0x36   : > { %2964 = shalt.err (!%p2961_p10)
}
  0x37   : > { %s3046_s26 = smov 128   ;;  %s3047_s27 = smov 8  }
  0x38   : > { %2723 = dma.hbm_to_vmem [thread:$0]  (!%p3134_p5), %s4221_s1, 256, %s3130_s15, [#allocation6], %s3046_s26, %s3046_s26, %s3047_s27  }
  0x39   : > { %s2965_s17 = scalar_lea.hbm %s4225_s5, 3072 }
  0x3a   : > { %p2966_p11 = scmp.ne.s32.totalorder %s4225_s5, %s2965_s17  ;;  %p2972_p0 = scmp.lt.u32.totalorder %s2965_s17, %s4225_s5 }
  0x3c   : > { %p2968_p12 = pnand %p2966_p11, %p3148_p7 }
  0x3e   : > { %p2969_p13 = pneg %p2968_p12 }
  0x40   : > { %p2974_p1 = pnand %p2972_p0, %p2969_p13 }
  0x42   : > { %2977 = shalt.err (!%p2974_p1)
}
  0x43   : > { %s2978_s23 = scalar_lea.vmem %s292_s18, 3072  ;;  %p2986_p9 = scmp.lt.s32.totalorder %s292_s18, %s292_s18 }
  0x44   : > { %p2979_p4 = scmp.ne.s32.totalorder %s292_s18, %s2978_s23  ;;  %p2987_p10 = scmp.lt.s32.totalorder %s2978_s23, %s2978_s23 }
  0x46   : > { %p2981_p6 = pnand %p2979_p4, %p3148_p7  ;;  %p2988_p2 = por %p2987_p10, %p2986_p9 }
  0x48   : > { %p2982_p8 = pneg %p2981_p6 }
  0x4a   : > { %p2989_p3 = pnand %p2988_p2, %p2982_p8 }
  0x4c   : > { %2992 = shalt.err (!%p2989_p3)
}
  0x4d   : > { %s3048_s15 = smov 384   ;;  %s3049_s25 = smov 24  }
  0x4e   : > { %2729 = dma.hbm_to_vmem [thread:$0]  (!%p3134_p5), %s4225_s5, 3072, %s292_s18, [#allocation8], %s3048_s15, %s3048_s15, %s3049_s25  }
  0x4f   : > { %s3050_s27 = smov [#allocation10]   ;;  %s2993_s14 = scalar_lea.hbm %s4227_s7, 32 }
  0x50   : > { %s308_s28 = sshll.u32 %s3050_s27, 4  ;;  %p2994_p2 = scmp.ne.s32.totalorder %s4227_s7, %s2993_s14  ;;  %s309_s28 = int_to_ptr.vmem [resolvable:$true] %s308_s28 }
  0x51   : > { %p3000_p12 = scmp.lt.u32.totalorder %s2993_s14, %s4227_s7 }
  0x52   : > { %p2996_p3 = pnand %p2994_p2, %p3148_p7 }
  0x54   : > { %p2997_p11 = pneg %p2996_p3 }
  0x56   : > { %p3002_p13 = pnand %p3000_p12, %p2997_p11 }
  0x58   : > { %3005 = shalt.err (!%p3002_p13)
}
  0x59   : > { %s3006_s18 = scalar_lea.vmem %s309_s28, 32  ;;  %p3014_p6 = scmp.lt.s32.totalorder %s309_s28, %s309_s28 }
  0x5a   : > { %p3007_p0 = scmp.ne.s32.totalorder %s309_s28, %s3006_s18  ;;  %p3015_p8 = scmp.lt.s32.totalorder %s3006_s18, %s3006_s18 }
  0x5c   : > { %p3009_p1 = pnand %p3007_p0, %p3148_p7  ;;  %p3016_p9 = por %p3015_p8, %p3014_p6 }
  0x5e   : > { %p3010_p4 = pneg %p3009_p1 }
  0x60   : > { %p3017_p10 = pnand %p3016_p9, %p3010_p4 }
  0x62   : > { %3020 = shalt.err (!%p3017_p10)
}
  0x63   : > { %2732 = dma.hbm_to_vmem [thread:$0]  (!%p3134_p5), %s4227_s7, 32, %s309_s28, [#allocation11]  }
  0x64   : > { %p4235_p2 = scmp.ne.s32.totalorder %s4232_s13, 0 }
  0x65   : > { %p4236_p3 = scmp.eq.s32.totalorder (!%p4235_p2), %s3117_s12, 0 }
  0x66   : > { %331 = sbr.rel (%p4235_p2) target bundleno = 1625 (0x659), region = 56 }
  0x6d   : > { %3026 = dma.done.wait (%p4236_p3), [#allocation6], 256   ;;  %p4237_p7 = pmov %p4236_p3 }
  0x6e   : > { %p4238_p11 = pmov %p4236_p3 }
  0x6f   : > { %3028 = vsyncadd (%p4237_p7), [#allocation6], 4294967040 }
  0x70   : > { %3030 = dma.done.wait (%p4238_p11), [#allocation8], 4096   ;;  %p4239_p12 = pmov %p4236_p3 }
  0x71   : > { %p4240_p13 = pmov %p4236_p3 }
  0x72   : > { %3032 = vsyncadd (%p4239_p12), [#allocation8], 4294963200 }
  0x73   : > { %3034 = dma.done.wait (%p4240_p13), [#allocation11], 32   ;;  %p4241_p5 = pmov %p4236_p3 }
  0x74   : > { %p378_p0 = scmp.lt.s32.totalorder %s3117_s12, 1  ;;  %v409_v0 = vlaneseq  ;;  %s3051_s25 = smov 18   ;;  %v3053_v7 = vmov 0.0   ;;  %v387_v12 = vld [vmem:[#allocation10] sm:$0x3]  ;;  %v504_v14 = vld [vmem:[%s4222_s2] sm:$0xff] }
  0x75   : > { %3036 = vsyncadd (%p4241_p5), [#allocation11], 4294967264  ;;  %s3052_s11 = smov 20   ;;  %497 = vst [vmem:[#allocation4 + $0x18] sm:$0xfe] %v3053_v7  ;;  %587 = vmatprep.mubr.f32.mxu0 %v3053_v7  ;;  %s3054_s26 = smov 1  }
  0x76   : > { %s4251_s12 = smov (!%p378_p0, %s3117_s12), 1  ;;  %vm3253_vm0 = vcmp.lt.s32.totalorder %v409_v0, 256  ;;  %496 = vst [vmem:[#allocation4 + $0x10] sm:$0xfe] %v3053_v7  ;;  %s3055_s27 = smov 19   ;;  %v606_v13 = vshrl.u32 %v409_v0, 7 }
  0x77   : > { %s2460_s13 = sshll.u32 %s4251_s12, 2  ;;  %s3056_s28 = smov 110   ;;  %v505_v15 = vld [vmem:[%s4222_s2 + $0x8] sm:$0xff]  ;;  %v3060_v16 = vmov 0   ;;  %vm388_vm1 = vcmp.gt.f32.partialorder %v387_v12, 0.5  ;;  %vm431_vm2 = vcmask 146432  }
  0x78   : > { %s381_s15 = scalar_lea.vmem %s4220_s0, %s2460_s13  ;;  %s3057_s29 = smov 127   ;;  %2769 = vset.pattern.permute.xlu0 %v3060_v16  ;;  %2770 = vset.pattern.permute.xlu1 %v3060_v16  ;;  %v604_v17 = vsel %vm388_vm1, 1, %v3060_v16  ;;  %v607_v18 = vsub.s32 0, %v606_v13  ;;  %v611_v19 = vsub.s32 1, %v606_v13  ;;  %vm406_vm3 = vcmask 162816   ;;  %v498_v52 = vld [vmem:[#allocation5] sm:$0xff] }
  0x79   : > { %v426_v1 = vld [vmem:[%s381_s15] sm:$0x7]  ;;  %s3058_s10 = smov 108   ;;  %s3059_s14 = smov 109   ;;  %vm442_vm4 = vcmask 7168   ;;  %vm420_vm5 = vcmask 154624  }
  0x7a   : > { %v401_v2 = vld [vmem:[%s381_s15] sm:$0x7]  ;;  %428 = vrot.lane.b32.xlu1 %v426_v1, %s3051_s25  ;;  %v3274_v20 = vrot.slane %v604_v17, %v607_v18  ;;  %v3276_v21 = vrot.slane %v604_v17, %v611_v19  ;;  %vm468_vm6 = vcmask 900096   ;;  %vm457_vm7 = vcmask 1039360   ;;  %v499_v53 = vld [vmem:[#allocation5 + $0x8] sm:$0xff]  ;;  %v965_v13 = vld [vmem:[%s4224_s4 + $0x10] sm:$0xff] }
  0x7b   : > { %403 = vrot.lane.b32.xlu0 %v401_v2, %s3052_s11  ;;  %v437_v3 = vld [vmem:[%s381_s15] sm:$0x7]  ;;  %vm490_vm8 = vcmask 883712   ;;  %vm479_vm9 = vcmask 891904   ;;  %vm516_vm10 = vcmask 130048   ;;  %vm1848_vm15 = vcmask 261120  }
  0x7c   : > { %v415_v4 = vld [vmem:[%s381_s15] sm:$0x7]  ;;  %vm613_vm11 = vcmp.eq.s32.totalorder %v3274_v20, 1  ;;  %vm614_vm12 = vcmp.eq.s32.totalorder %v3276_v21, 1  ;;  %s2487_s18 = sshll.u32 %s4251_s12, 6  ;;  %vm2341_vm1 = vcmask 343044  }
  0x7d   : > { %v448_v6 = vld [vmem:[%s381_s15 + $0x1] sm:$0x3]  ;;  %vm3442_vm13 = vmpackc.low %vm614_vm12, %vm614_vm12  ;;  %s4187_s13 = scalar_lea.vmem %s4229_s9, %s2487_s18 }
  0x7e   : > { %450 = vst.msk [vmem:[#allocation4 + $0x4] ss:$8 sm:$0x3] %vm3253_vm0, %v448_v6  ;;  %439 = vrot.lane.b32.xlu1 %v437_v3, %s3054_s26  ;;  %v463_v8 = vld [vmem:[%s381_s15 + $0x1] sm:$0x7]  ;;  %vm3464_vm14 = vmpackc.low %vm613_vm11, %vm613_vm11 }
  0x7f   : > { %417 = vrot.lane.b32.xlu0 %v415_v4, %s3055_s27  ;;  %v452_v9 = vld [vmem:[%s381_s15 + $0x1] sm:$0x7] }
  0x80   : > { %v485_v10 = vld [vmem:[%s381_s15 + $0x1] sm:$0x7] }
  0x81   : > { %v474_v11 = vld [vmem:[%s381_s15 + $0x1] sm:$0x7] }
  0x82   : > { %465 = vrot.lane.b32.xlu1 %v463_v8, %s3056_s28  ;;  %v963_v12 = vld [vmem:[%s4224_s4] sm:$0xff] }
  0x83   : > { %454 = vrot.lane.b32.xlu0 %v452_v9, %s3057_s29  ;;  %v920_v9 = vld [vmem:[#allocation7 + $0x8] sm:$0xff] }
  0x84   : > { %2465 = vmatprep.mubr.msk.f32.mxu1 %vm516_vm10, %v920_v9 }
  0x86   : > { %487 = vrot.lane.b32.xlu1 %v485_v10, %s3058_s10  ;;  %v964_v10 = vld [vmem:[%s4224_s4 + $0x8] sm:$0xff] }
  0x87   : > { %476 = vrot.lane.b32.xlu0 %v474_v11, %s3059_s14  ;;  %v966_v11 = vld [vmem:[%s4224_s4 + $0x18] sm:$0xff] }
  0x8a   : > { %513 = vperm.xlu1 %2770, %v505_v15  }
  0x8b   : > { %508 = vperm.xlu0 %2769, %v504_v14  }
  0x8e   : > { %2772 = vrot.lane.b32.xlu1 %v3053_v7, %s3052_s11 }
  0x8f   : > { %2777 = vrot.lane.b32.xlu0 %v3053_v7, %s3055_s27 }
  0x92   : > { %2782 = vrot.lane.b32.xlu1 %v3053_v7, %s3051_s25 }
  0x93   : > { %2787 = vrot.lane.b32.xlu0 %v3053_v7, %s3054_s26 }
  0x97   : > { %2792 = vrot.lane.b32.xlu0 %v3053_v7, %s3057_s29 }
  0xec   : > { %v429_v22 = vpop.permute.xlu1 %428 }
  0xed   : > { %v404_v23 = vpop.permute.xlu0 %403  ;;  %v430_v24 = vrot.slane %v429_v22, 1 }
  0xee   : > { %v405_v25 = vrot.slane %v404_v23, 1 }
  0xef   : > { %v432_v26 = vsel %vm431_vm2, %v429_v22, %v430_v24 }
  0xf0   : > { %v407_v27 = vsel %vm406_vm3, %v404_v23, %v405_v25  ;;  %435 = vst.msk [vmem:[#allocation4 + $0x2] ss:$8 sm:$0x3] %vm3253_vm0, %v432_v26  ;;  %v440_v28 = vpop.permute.xlu1 %439 }
  0xf1   : > { %413 = vst.msk [vmem:[#allocation4] ss:$8 sm:$0x3] %vm3253_vm0, %v407_v27  ;;  %v418_v29 = vpop.permute.xlu0 %417  ;;  %v441_v30 = vrot.slane %v440_v28, 1 }
  0xf2   : > { %v419_v31 = vrot.slane %v418_v29, 1 }
  0xf3   : > { %v443_v32 = vsel %vm442_vm4, %v440_v28, %v441_v30 }
  0xf4   : > { %v421_v33 = vsel %vm420_vm5, %v418_v29, %v419_v31  ;;  %446 = vst.msk [vmem:[#allocation4 + $0x3] ss:$8 sm:$0x3] %vm3253_vm0, %v443_v32  ;;  %v466_v34 = vpop.permute.xlu1 %465 }
  0xf5   : > { %424 = vst.msk [vmem:[#allocation4 + $0x1] ss:$8 sm:$0x3] %vm3253_vm0, %v421_v33  ;;  %v455_v35 = vpop.permute.xlu0 %454  ;;  %v467_v36 = vrot.slane %v466_v34, 1 }
  0xf6   : > { %v456_v37 = vrot.slane %v455_v35, 1 }
  0xf7   : > { %v469_v38 = vsel %vm468_vm6, %v466_v34, %v467_v36 }
  0xf8   : > { %v458_v39 = vsel %vm457_vm7, %v455_v35, %v456_v37  ;;  %472 = vst.msk [vmem:[#allocation4 + $0x6] ss:$8 sm:$0x3] %vm3253_vm0, %v469_v38  ;;  %v488_v40 = vpop.permute.xlu1 %487 }
  0xf9   : > { %461 = vst.msk [vmem:[#allocation4 + $0x5] ss:$8 sm:$0x3] %vm3253_vm0, %v458_v39  ;;  %v477_v41 = vpop.permute.xlu0 %476  ;;  %v489_v42 = vrot.slane %v488_v40, 1 }
  0xfa   : > { %v478_v43 = vrot.slane %v477_v41, 1 }
  0xfb   : > { %v491_v44 = vsel %vm490_vm8, %v488_v40, %v489_v42 }
  0xfc   : > { %v480_v45 = vsel %vm479_vm9, %v477_v41, %v478_v43  ;;  %494 = vst.msk [vmem:[#allocation4 + $0x10] ss:$8 sm:$0x3] %vm3253_vm0, %v491_v44 }
  0xfd   : > { %483 = vst.msk [vmem:[#allocation4 + $0x7] ss:$8 sm:$0x3] %vm3253_vm0, %v480_v45  ;;  %vm2340_vm0 = vcmask 1043456  }
 0x103   : > { %v503_v47 = vld [vmem:[#allocation4 + $0x18] sm:$0xff]  ;;  %v502_v50 = vld [vmem:[#allocation4 + $0x10] sm:$0xff] }
 0x104   : > { %v501_v46 = vld [vmem:[#allocation4 + $0x8] sm:$0xff]  ;;  %v500_v48 = vld [vmem:[#allocation4] sm:$0xff] }
 0x105   : > { %v2496_v49 = vpack.c.bf16 %v503_v47, %v501_v46  ;;  %v2498_v51 = vpack.c.bf16 %v502_v50, %v500_v48 }
 0x107   : > { %2497 = vmatprep.subr.bf16.mxu0 %v2496_v49 }
 0x108   : > { %2499 = vmatpush1.bf16.msra.mxu0 %v2498_v51 }
 0x109   : > { %v514_v60 = vpop.permute.xlu1 %513 }
 0x10a   : > { %v509_v54 = vpop.permute.xlu0 %508 }
 0x10b   : > { %2463 = vmatmul.mubr.msk.f32.vlgmr.msra.gmra.mrb[0].mxu0 %vm516_vm10, %v498_v52 }
 0x10c   : > { %593 = vmatprep.mubr.f32.mxu0 %v3053_v7 }
 0x10d   : > { %v2773_v15 = vpop.permute.xlu1 %2772 }
 0x10e   : > { %v2778_v14 = vpop.permute.xlu0 %2777  ;;  %v2775_v35 = vunpack.i.h.bf16 %v2773_v15  ;;  %v2774_v36 = vunpack.i.l.bf16 %v2773_v15 }
 0x10f   : > { %2464 = vmatmul.mubr.msk.f32.gmra.mrb[2].mxu0 %vm516_vm10, %v499_v53  ;;  %v2780_v47 = vunpack.i.h.bf16 %v2778_v14  ;;  %v2779_v48 = vunpack.i.l.bf16 %v2778_v14 }
 0x111   : > { %v2783_v17 = vpop.permute.xlu1 %2782 }
 0x112   : > { %v3410_v16 = vpop.permute.xlu0 %2787 }
 0x116   : > { %v3412_v18 = vpop.permute.xlu0 %2792 }
 0x1de   : > { %v589_v55 = vpop.f32.mrb[0].mxu0 }
 0x1df   : > { %v3315_v56 = vadd.f32 %v589_v55, %v509_v54  ;;  %v591_v57 = vpop.f32.mrb[1].mxu0  ;;  %v2785_v55 = vunpack.i.h.bf16 %v2783_v17 }
 0x1e0   : > { %v3318_v58 = vadd.f32 %v591_v57, %v509_v54 }
 0x1e1   : > { %v600_v59 = vmax.f32 %v3315_v56, 0.0 }
 0x1e2   : > { %v595_v61 = vpop.f32.mrb[2].mxu0  ;;  %v601_v0 = vmax.f32 %v3318_v58, 0.0 }
 0x1e3   : > { %v615_v62 = vsel %vm613_vm11, %v600_v59, 0.0  ;;  %v597_v63 = vpop.f32.mrb[3].mxu0  ;;  %v3344_v5 = vadd.f32 %v595_v61, %v514_v60 }
 0x1e4   : > { %v3326_v1 = vadd.f32 %v597_v63, %v514_v60  ;;  %673 = vrot.lane.b32.xlu0 %v615_v62, %s3055_s27  ;;  %637 = vrot.lane.b32.xlu1 %v615_v62, %s3052_s11  ;;  %v616_v3 = vsel %vm614_vm12, %v601_v0, 0.0  ;;  %v2784_v63 = vunpack.i.l.bf16 %v2783_v17 }
 0x1e5   : > { %v602_v6 = vmax.f32 %v3344_v5, 0.0 }
 0x1e6   : > { %v603_v2 = vmax.f32 %v3326_v1, 0.0 }
 0x1e7   : > { %v617_v8 = vsel %vm613_vm11, %v602_v6, 0.0 }
 0x1e8   : > { %v618_v4 = vsel %vm614_vm12, %v603_v2, 0.0  ;;  %745 = vrot.lane.b32.xlu0 %v615_v62, %s3054_s26  ;;  %709 = vrot.lane.b32.xlu1 %v615_v62, %s3051_s25 }
 0x1ec   : > { %787 = vrot.lane.b32.xlu0 %v615_v62, %s3057_s29  ;;  %675 = vrot.lane.b32.xlu1 %v616_v3, %s3055_s27 }
 0x1f0   : > { %639 = vrot.lane.b32.xlu0 %v616_v3, %s3052_s11  ;;  %747 = vrot.lane.b32.xlu1 %v616_v3, %s3054_s26 }
 0x1f4   : > { %711 = vrot.lane.b32.xlu0 %v616_v3, %s3051_s25  ;;  %789 = vrot.lane.b32.xlu1 %v616_v3, %s3057_s29 }
 0x1f8   : > { %679 = vrot.lane.b32.xlu0 %v617_v8, %s3055_s27  ;;  %643 = vrot.lane.b32.xlu1 %v617_v8, %s3052_s11 }
 0x1fc   : > { %751 = vrot.lane.b32.xlu0 %v617_v8, %s3054_s26  ;;  %715 = vrot.lane.b32.xlu1 %v617_v8, %s3051_s25 }
 0x200   : > { %645 = vrot.lane.b32.xlu0 %v618_v4, %s3052_s11  ;;  %793 = vrot.lane.b32.xlu1 %v617_v8, %s3057_s29 }
 0x204   : > { %825 = vrot.lane.b32.xlu0 %v616_v3, %s3056_s28  ;;  %2797 = vrot.lane.b32.xlu1 %v3053_v7, %s3056_s28 }
 0x208   : > { %717 = vrot.lane.b32.xlu0 %v618_v4, %s3051_s25  ;;  %681 = vrot.lane.b32.xlu1 %v618_v4, %s3055_s27 }
 0x20c   : > { %829 = vrot.lane.b32.xlu0 %v617_v8, %s3056_s28  ;;  %823 = vrot.lane.b32.xlu1 %v615_v62, %s3056_s28 }
 0x210   : > { %2802 = vrot.lane.b32.xlu0 %v3053_v7, %s3059_s14  ;;  %753 = vrot.lane.b32.xlu1 %v618_v4, %s3054_s26 }
 0x214   : > { %859 = vrot.lane.b32.xlu0 %v615_v62, %s3059_s14  ;;  %861 = vrot.lane.b32.xlu1 %v616_v3, %s3059_s14 }
 0x218   : > { %831 = vrot.lane.b32.xlu0 %v618_v4, %s3056_s28  ;;  %795 = vrot.lane.b32.xlu1 %v618_v4, %s3057_s29 }
 0x21c   : > { %897 = vrot.lane.b32.xlu0 %v616_v3, %s3058_s10  ;;  %865 = vrot.lane.b32.xlu1 %v617_v8, %s3059_s14 }
 0x220   : > { %903 = vrot.lane.b32.xlu0 %v618_v4, %s3058_s10  ;;  %867 = vrot.lane.b32.xlu1 %v618_v4, %s3059_s14 }
 0x224   : > { %901 = vrot.lane.b32.xlu0 %v617_v8, %s3058_s10  ;;  %2807 = vrot.lane.b32.xlu1 %v3053_v7, %s3058_s10 }
 0x228   : > { %974 = vperm.xlu0 %2769, %v964_v10   ;;  %895 = vrot.lane.b32.xlu1 %v615_v62, %s3058_s10  ;;  %v2790_v10 = vunpack.i.h.bf16 %v3410_v16 }
 0x22c   : > { %984 = vperm.xlu0 %2769, %v966_v11   ;;  %969 = vperm.xlu1 %2770, %v963_v12  }
 0x230   : > { %979 = vperm.xlu1 %2770, %v965_v13   ;;  %2817 = vrot.lane.b32.xlu0 %v3053_v7, %s3052_s11  ;;  %v2789_v13 = vunpack.i.l.bf16 %v3410_v16  ;;  %v2157_v16 = vld [vmem:[%s4228_s8 + $0x150] sm:$0xff] }
 0x234   : > { %2812 = vrot.lane.b32.xlu1 %v3053_v7, %s3052_s11  ;;  %2827 = vrot.lane.b32.xlu0 %v3053_v7, %s3055_s27 }
 0x238   : > { %2822 = vrot.lane.b32.xlu1 %v3053_v7, %s3055_s27  ;;  %2837 = vrot.lane.b32.xlu0 %v3053_v7, %s3051_s25 }
 0x23c   : > { %2832 = vrot.lane.b32.xlu1 %v3053_v7, %s3051_s25  ;;  %2847 = vrot.lane.b32.xlu0 %v3053_v7, %s3054_s26 }
 0x240   : > { %2852 = vrot.lane.b32.xlu0 %v3053_v7, %s3057_s29  ;;  %2842 = vrot.lane.b32.xlu1 %v3053_v7, %s3054_s26 }
 0x256   : > { %v674_v19 = vpop.permute.xlu0 %673  ;;  %v638_v22 = vpop.permute.xlu1 %637 }
 0x257   : > { %v647_v42 = vsel %vm406_vm3, %v2774_v36, %v638_v22  ;;  %v683_v57 = vsel %vm420_vm5, %v2779_v48, %v674_v19 }
 0x25a   : > { %v746_v23 = vpop.permute.xlu0 %745  ;;  %v710_v24 = vpop.permute.xlu1 %709 }
 0x25b   : > { %v719_v11 = vsel %vm431_vm2, %v2784_v63, %v710_v24 }
 0x25e   : > { %v3414_v25 = vpop.permute.xlu0 %787  ;;  %v676_v26 = vpop.permute.xlu1 %675 }
 0x25f   : > { %v684_v52 = vsel %vm420_vm5, %v674_v19, %v676_v26  ;;  %v755_v26 = vsel %vm442_vm4, %v2789_v13, %v746_v23  ;;  %v926_v13 = vld [vmem:[#allocation7 + $0x38] sm:$0xff] }
 0x262   : > { %v640_v27 = vpop.permute.xlu0 %639  ;;  %v748_v28 = vpop.permute.xlu1 %747 }
 0x263   : > { %v648_v40 = vsel %vm406_vm3, %v638_v22, %v640_v27  ;;  %v756_v17 = vsel %vm442_vm4, %v746_v23, %v748_v28  ;;  %v2892_v23 = vpack.c.bf16 %v603_v2, %v601_v0  ;;  %v2794_v28 = vunpack.i.l.bf16 %v3412_v18 }
 0x266   : > { %v712_v29 = vpop.permute.xlu0 %711  ;;  %v3416_v30 = vpop.permute.xlu1 %789 }
 0x267   : > { %v720_v61 = vsel %vm431_vm2, %v710_v24, %v712_v29  ;;  %v2795_v24 = vunpack.i.h.bf16 %v3412_v18  ;;  %v2895_v18 = vpack.c.bf16 %v602_v6, %v600_v59 }
 0x26a   : > { %v680_v31 = vpop.permute.xlu0 %679  ;;  %v644_v32 = vpop.permute.xlu1 %643 }
 0x26b   : > { %v649_v37 = vsel %vm406_vm3, %v2775_v35, %v644_v32  ;;  %v685_v49 = vsel %vm420_vm5, %v2780_v47, %v680_v31  ;;  %v799_v35 = vsel %vm457_vm7, %v3414_v25, %v3416_v30 }
 0x26c   : > { %v2502_v44 = vpack.c.bf16 %v649_v37, %v647_v42  ;;  %v2506_v62 = vpack.c.bf16 %v685_v49, %v683_v57 }
 0x26e   : > { %v752_v33 = vpop.permute.xlu0 %751  ;;  %v716_v34 = vpop.permute.xlu1 %715 }
 0x26f   : > { %v721_v3 = vsel %vm431_vm2, %v2785_v55, %v716_v34  ;;  %v757_v14 = vsel %vm442_vm4, %v2790_v10, %v752_v33  ;;  %v921_v10 = vld [vmem:[#allocation7 + $0x10] sm:$0xff] }
 0x270   : > { %v2510_v12 = vpack.c.bf16 %v721_v3, %v719_v11  ;;  %v2514_v29 = vpack.c.bf16 %v757_v14, %v755_v26  ;;  %v924_v11 = vld [vmem:[#allocation7 + $0x28] sm:$0xff]  ;;  %v925_v14 = vld [vmem:[#allocation7 + $0x30] sm:$0xff] }
 0x272   : > { %v646_v38 = vpop.permute.xlu0 %645  ;;  %v794_v39 = vpop.permute.xlu1 %793 }
 0x273   : > { %v650_v41 = vsel %vm406_vm3, %v644_v32, %v646_v38  ;;  %v800_v38 = vsel %vm457_vm7, %v3416_v30, %v2794_v28 }
 0x274   : > { %v2500_v43 = vpack.c.bf16 %v650_v41, %v648_v40 }
 0x276   : > { %v3422_v45 = vpop.permute.xlu0 %825  ;;  %v2798_v46 = vpop.permute.xlu1 %2797  ;;  %2501 = vmatprep.subr.bf16.mxu1 %v2500_v43 }
 0x277   : > { %2503 = vmatpush1.bf16.msra.mxu1 %v2502_v44 }
 0x27a   : > { %v718_v50 = vpop.permute.xlu0 %717  ;;  %v682_v51 = vpop.permute.xlu1 %681 }
 0x27b   : > { %v722_v53 = vsel %vm431_vm2, %v716_v34, %v718_v50  ;;  %v686_v54 = vsel %vm420_vm5, %v680_v31, %v682_v51  ;;  %v2799_v34 = vunpack.i.l.bf16 %v2798_v46 }
 0x27c   : > { %v2504_v60 = vpack.c.bf16 %v686_v54, %v684_v52  ;;  %v2508_v9 = vpack.c.bf16 %v722_v53, %v720_v61 }
 0x27e   : > { %v830_v4 = vpop.permute.xlu0 %829  ;;  %v824_v8 = vpop.permute.xlu1 %823  ;;  %2505 = vmatprep.subr.bf16.mxu1 %v2504_v60 }
 0x27f   : > { %2507 = vmatpush1.bf16.msra.mxu1 %v2506_v62  ;;  %v835_v56 = vsel %vm468_vm6, %v824_v8, %v3422_v45  ;;  %v919_v8 = vld [vmem:[#allocation7] sm:$0xff] }
 0x280   : > { %2509 = vmatprep.subr.bf16.mxu1 %v2508_v9  ;;  %v922_v9 = vld [vmem:[#allocation7 + $0x18] sm:$0xff] }
 0x282   : > { %v2803_v15 = vpop.permute.xlu0 %2802  ;;  %v754_v19 = vpop.permute.xlu1 %753 }
 0x283   : > { %v758_v22 = vsel %vm442_vm4, %v752_v33, %v754_v19  ;;  %2511 = vmatpush1.bf16.msra.mxu1 %v2510_v12  ;;  %v2800_v33 = vunpack.i.h.bf16 %v2798_v46  ;;  %v2804_v44 = vunpack.i.l.bf16 %v2803_v15  ;;  %v2805_v59 = vunpack.i.h.bf16 %v2803_v15  ;;  %v923_v12 = vld [vmem:[#allocation7 + $0x20] sm:$0xff] }
 0x284   : > { %v2512_v27 = vpack.c.bf16 %v758_v22, %v756_v17 }
 0x286   : > { %v860_v31 = vpop.permute.xlu0 %859  ;;  %v862_v32 = vpop.permute.xlu1 %861  ;;  %2513 = vmatprep.subr.bf16.mxu1 %v2512_v27 }
 0x287   : > { %2515 = vmatpush1.bf16.msra.mxu1 %v2514_v29  ;;  %v871_v47 = vsel %vm479_vm9, %v860_v31, %v862_v32  ;;  %v872_v48 = vsel %vm479_vm9, %v862_v32, %v2804_v44 }
 0x288   : > { %2893 = vmatprep.subr.msk.bf16.mxu1 %vm3442_vm13, %v2892_v23 }
 0x28a   : > { %v832_v36 = vpop.permute.xlu0 %831  ;;  %v796_v37 = vpop.permute.xlu1 %795 }
 0x28b   : > { %v838_v58 = vsel %vm468_vm6, %v832_v36, %v2800_v33  ;;  %v801_v0 = vsel %vm457_vm7, %v794_v39, %v796_v37  ;;  %v802_v1 = vsel %vm457_vm7, %v796_v37, %v2795_v24  ;;  %2896 = vmatpush1.bf16.msk.msra.mxu1 %vm3464_vm14, %v2895_v18  ;;  %v836_v39 = vsel %vm468_vm6, %v3422_v45, %v2799_v34 }
 0x28c   : > { %v2520_v25 = vpack.c.bf16 %v802_v1, %v800_v38  ;;  %v2522_v30 = vpack.c.bf16 %v801_v0, %v799_v35  ;;  %v837_v40 = vsel %vm468_vm6, %v830_v4, %v832_v36  ;;  %v2524_v43 = vpack.c.bf16 %v838_v58, %v836_v39 }
 0x28d   : > { %v2526_v5 = vpack.c.bf16 %v837_v40, %v835_v56 }
 0x28e   : > { %v898_v41 = vpop.permute.xlu0 %897  ;;  %v866_v42 = vpop.permute.xlu1 %865  ;;  %2521 = vmatprep.subr.bf16.mxu1 %v2520_v25 }
 0x28f   : > { %2523 = vmatpush1.bf16.msra.mxu1 %v2522_v30 }
 0x290   : > { %2525 = vmatprep.subr.bf16.mxu1 %v2524_v43 }
 0x292   : > { %v904_v6 = vpop.permute.xlu0 %903  ;;  %v868_v46 = vpop.permute.xlu1 %867 }
 0x293   : > { %v873_v49 = vsel %vm479_vm9, %v866_v42, %v868_v46  ;;  %v874_v50 = vsel %vm479_vm9, %v868_v46, %v2805_v59  ;;  %2527 = vmatpush1.bf16.msra.mxu1 %v2526_v5 }
 0x294   : > { %v2528_v51 = vpack.c.bf16 %v874_v50, %v872_v48  ;;  %v2530_v52 = vpack.c.bf16 %v873_v49, %v871_v47 }
 0x296   : > { %v2808_v53 = vpop.permute.xlu1 %2807  ;;  %2529 = vmatprep.subr.bf16.mxu1 %v2528_v51  ;;  %v902_v55 = vpop.permute.xlu0 %901 }
 0x297   : > { %v2810_v54 = vunpack.i.h.bf16 %v2808_v53  ;;  %v2809_v45 = vunpack.i.l.bf16 %v2808_v53  ;;  %2531 = vmatpush1.bf16.msra.mxu1 %v2530_v52  ;;  %v909_v63 = vsel %vm490_vm8, %v902_v55, %v904_v6 }
 0x299   : > { %v910_v57 = vsel %vm490_vm8, %v904_v6, %v2810_v54  ;;  %v908_v60 = vsel %vm490_vm8, %v898_v41, %v2809_v45  ;;  %v1705_v45 = vld [vmem:[#allocation9 + $0x8] sm:$0xff] }
 0x29a   : > { %v896_v61 = vpop.permute.xlu1 %895  ;;  %v2532_v62 = vpack.c.bf16 %v910_v57, %v908_v60  ;;  %1937 = vmatprep.mubr.f32.mxu0 %v1705_v45 }
 0x29b   : > { %v907_v3 = vsel %vm490_vm8, %v896_v61, %v898_v41 }
 0x29c   : > { %2533 = vmatprep.subr.bf16.mxu1 %v2532_v62  ;;  %v2534_v4 = vpack.c.bf16 %v909_v63, %v907_v3 }
 0x29e   : > { %2535 = vmatpush1.bf16.msra.mxu1 %v2534_v4 }
 0x2a1   : > { %1064 = vmatmul.mubr.f32.vlgmr.msra.gmra.mrb[0].mxu1 %v919_v8 }
 0x2a2   : > { %2466 = vmatprep.mubr.msk.f32.mxu1 %vm516_vm10, %v922_v9 }
 0x2a5   : > { %1070 = vmatmul.mubr.f32.gmra.mrb[2].mxu1 %v921_v10 }
 0x2a6   : > { %2467 = vmatprep.mubr.msk.f32.mxu1 %vm516_vm10, %v924_v11 }
 0x2a7   : > { %v975_v29 = vpop.permute.xlu0 %974 }
 0x2a9   : > { %1076 = vmatmul.mubr.f32.gmra.mrb[4].mxu1 %v923_v12 }
 0x2aa   : > { %2468 = vmatprep.mubr.msk.f32.mxu1 %vm516_vm10, %v926_v13 }
 0x2ab   : > { %v970_v15 = vpop.permute.xlu1 %969  ;;  %v985_v39 = vpop.permute.xlu0 %984 }
 0x2ad   : > { %1082 = vmatmul.mubr.f32.gmra.mrb[6].mxu1 %v925_v14 }
 0x2af   : > { %v980_v36 = vpop.permute.xlu1 %979  ;;  %v3654_v20 = vpop.permute.xlu0 %2817 }
 0x2b3   : > { %v3660_v21 = vpop.permute.xlu0 %2827  ;;  %v3662_v48 = vpop.permute.xlu1 %2812 }
 0x2b4   : > { %v2814_v55 = vunpack.i.l.bf16 %v3662_v48 }
 0x2b7   : > { %v3672_v49 = vpop.permute.xlu0 %2837  ;;  %v3674_v50 = vpop.permute.xlu1 %2822 }
 0x2b8   : > { %v2824_v62 = vunpack.i.l.bf16 %v3674_v50 }
 0x2bb   : > { %v3680_v51 = vpop.permute.xlu0 %2847  ;;  %v3682_v52 = vpop.permute.xlu1 %2832 }
 0x2bc   : > { %v2834_v9 = vunpack.i.l.bf16 %v3682_v52 }
 0x2bf   : > { %v3692_v53 = vpop.permute.xlu0 %2852  ;;  %v3694_v54 = vpop.permute.xlu1 %2842 }
 0x2c0   : > { %v2844_v14 = vunpack.i.l.bf16 %v3694_v54 }
 0x374   : > { %v1065_v19 = vpop.f32.mrb[0].mxu1 }
 0x375   : > { %v3494_v17 = vadd.f32 %v1065_v19, %v970_v15  ;;  %v1067_v22 = vpop.f32.mrb[1].mxu1 }
 0x376   : > { %v3496_v26 = vadd.f32 %v1067_v22, %v970_v15 }
 0x377   : > { %v1088_v27 = vmax.f32 %v3494_v17, 0.0 }
 0x378   : > { %v1089_v31 = vmax.f32 %v3496_v26, 0.0  ;;  %v1071_v32 = vpop.f32.mrb[2].mxu1  ;;  %v2153_v26 = vld [vmem:[%s4228_s8 + $0x130] sm:$0xff] }
 0x379   : > { %v3504_v24 = vsel %vm613_vm11, %v1088_v27, 0.0  ;;  %v3506_v23 = vadd.f32 %v1071_v32, %v975_v29  ;;  %v1073_v28 = vpop.f32.mrb[3].mxu1  ;;  %v2854_v32 = vunpack.i.l.bf16 %v3692_v53 }
 0x37a   : > { %v3512_v33 = vsel %vm614_vm12, %v1089_v31, 0.0  ;;  %v3514_v34 = vadd.f32 %v1073_v28, %v975_v29  ;;  %1440 = vrot.lane.b32.xlu0 %v3504_v24, %s3057_s29  ;;  %1138 = vrot.lane.b32.xlu1 %v3504_v24, %s3052_s11 }
 0x37b   : > { %v1090_v35 = vmax.f32 %v3506_v23, 0.0 }
 0x37c   : > { %v1091_v37 = vmax.f32 %v3514_v34, 0.0  ;;  %v1077_v38 = vpop.f32.mrb[4].mxu1 }
 0x37d   : > { %v3526_v58 = vsel %vm613_vm11, %v1090_v35, 0.0  ;;  %v3528_v0 = vadd.f32 %v1077_v38, %v980_v36  ;;  %v1079_v1 = vpop.f32.mrb[5].mxu1  ;;  %v2901_v34 = vpack.c.bf16 %v1090_v35, %v1088_v27 }
 0x37e   : > { %v3534_v18 = vsel %vm614_vm12, %v1091_v37, 0.0  ;;  %v3536_v25 = vadd.f32 %v1079_v1, %v980_v36  ;;  %1140 = vrot.lane.b32.xlu0 %v3512_v33, %s3052_s11  ;;  %1210 = vrot.lane.b32.xlu1 %v3504_v24, %s3055_s27  ;;  %v2815_v1 = vunpack.i.h.bf16 %v3662_v48  ;;  %v1801_v48 = vld [vmem:[%s4226_s6 + $0x8] sm:$0xff] }
 0x37f   : > { %v1092_v30 = vmax.f32 %v3528_v0, 0.0 }
 0x380   : > { %v1093_v40 = vmax.f32 %v3536_v25, 0.0  ;;  %v1083_v41 = vpop.f32.mrb[6].mxu1  ;;  %v2155_v25 = vld [vmem:[%s4228_s8 + $0x140] sm:$0xff] }
 0x381   : > { %v3548_v42 = vsel %vm613_vm11, %v1092_v30, 0.0  ;;  %v3550_v43 = vadd.f32 %v1083_v41, %v985_v39  ;;  %v1085_v44 = vpop.f32.mrb[7].mxu1 }
 0x382   : > { %v3556_v56 = vsel %vm614_vm12, %v1093_v40, 0.0  ;;  %v3558_v59 = vadd.f32 %v1085_v44, %v985_v39  ;;  %1212 = vrot.lane.b32.xlu0 %v3512_v33, %s3055_s27  ;;  %1282 = vrot.lane.b32.xlu1 %v3504_v24, %s3051_s25 }
 0x383   : > { %v1094_v5 = vmax.f32 %v3550_v43, 0.0 }
 0x384   : > { %v1095_v6 = vmax.f32 %v3558_v59, 0.0 }
 0x385   : > { %v3570_v46 = vsel %vm613_vm11, %v1094_v5, 0.0 }
 0x386   : > { %v3576_v47 = vsel %vm614_vm12, %v1095_v6, 0.0  ;;  %1284 = vrot.lane.b32.xlu0 %v3512_v33, %s3051_s25  ;;  %1354 = vrot.lane.b32.xlu1 %v3504_v24, %s3054_s26 }
 0x38a   : > { %1356 = vrot.lane.b32.xlu0 %v3512_v33, %s3054_s26  ;;  %1442 = vrot.lane.b32.xlu1 %v3512_v33, %s3057_s29 }
 0x38e   : > { %1146 = vrot.lane.b32.xlu0 %v3534_v18, %s3052_s11  ;;  %1144 = vrot.lane.b32.xlu1 %v3526_v58, %s3052_s11 }
 0x392   : > { %1218 = vrot.lane.b32.xlu0 %v3534_v18, %s3055_s27  ;;  %1216 = vrot.lane.b32.xlu1 %v3526_v58, %s3055_s27 }
 0x396   : > { %1290 = vrot.lane.b32.xlu0 %v3534_v18, %s3051_s25  ;;  %1288 = vrot.lane.b32.xlu1 %v3526_v58, %s3051_s25 }
 0x39a   : > { %1362 = vrot.lane.b32.xlu0 %v3534_v18, %s3054_s26  ;;  %1360 = vrot.lane.b32.xlu1 %v3526_v58, %s3054_s26 }
 0x39e   : > { %1150 = vrot.lane.b32.xlu0 %v3548_v42, %s3052_s11  ;;  %1446 = vrot.lane.b32.xlu1 %v3526_v58, %s3057_s29 }
 0x3a2   : > { %1222 = vrot.lane.b32.xlu0 %v3548_v42, %s3055_s27  ;;  %1448 = vrot.lane.b32.xlu1 %v3534_v18, %s3057_s29 }
 0x3a6   : > { %1294 = vrot.lane.b32.xlu0 %v3548_v42, %s3051_s25  ;;  %1152 = vrot.lane.b32.xlu1 %v3556_v56, %s3052_s11 }
 0x3aa   : > { %1366 = vrot.lane.b32.xlu0 %v3548_v42, %s3054_s26  ;;  %1224 = vrot.lane.b32.xlu1 %v3556_v56, %s3055_s27 }
 0x3ae   : > { %1454 = vrot.lane.b32.xlu0 %v3556_v56, %s3057_s29  ;;  %1296 = vrot.lane.b32.xlu1 %v3556_v56, %s3051_s25 }
 0x3b2   : > { %1156 = vrot.lane.b32.xlu0 %v3570_v46, %s3052_s11  ;;  %1368 = vrot.lane.b32.xlu1 %v3556_v56, %s3054_s26 }
 0x3b6   : > { %1228 = vrot.lane.b32.xlu0 %v3570_v46, %s3055_s27  ;;  %1158 = vrot.lane.b32.xlu1 %v3576_v47, %s3052_s11 }
 0x3ba   : > { %1300 = vrot.lane.b32.xlu0 %v3570_v46, %s3051_s25  ;;  %2857 = vrot.lane.b32.xlu1 %v3053_v7, %s3057_s29 }
 0x3be   : > { %1372 = vrot.lane.b32.xlu0 %v3570_v46, %s3054_s26  ;;  %1230 = vrot.lane.b32.xlu1 %v3576_v47, %s3055_s27 }
 0x3c2   : > { %1458 = vrot.lane.b32.xlu0 %v3570_v46, %s3057_s29  ;;  %1452 = vrot.lane.b32.xlu1 %v3548_v42, %s3057_s29 }
 0x3c6   : > { %2862 = vrot.lane.b32.xlu0 %v3053_v7, %s3056_s28  ;;  %1302 = vrot.lane.b32.xlu1 %v3576_v47, %s3051_s25 }
 0x3ca   : > { %1512 = vrot.lane.b32.xlu0 %v3504_v24, %s3056_s28  ;;  %1514 = vrot.lane.b32.xlu1 %v3512_v33, %s3056_s28 }
 0x3ce   : > { %1526 = vrot.lane.b32.xlu0 %v3556_v56, %s3056_s28  ;;  %1374 = vrot.lane.b32.xlu1 %v3576_v47, %s3054_s26 }
 0x3d2   : > { %1530 = vrot.lane.b32.xlu0 %v3570_v46, %s3056_s28  ;;  %1520 = vrot.lane.b32.xlu1 %v3534_v18, %s3056_s28 }
 0x3d6   : > { %2872 = vrot.lane.b32.xlu0 %v3053_v7, %s3059_s14  ;;  %1518 = vrot.lane.b32.xlu1 %v3526_v58, %s3056_s28 }
 0x3da   : > { %1460 = vrot.lane.b32.xlu0 %v3576_v47, %s3057_s29  ;;  %2867 = vrot.lane.b32.xlu1 %v3053_v7, %s3056_s28 }
 0x3de   : > { %1584 = vrot.lane.b32.xlu0 %v3504_v24, %s3059_s14  ;;  %1524 = vrot.lane.b32.xlu1 %v3548_v42, %s3056_s28 }
 0x3e2   : > { %1532 = vrot.lane.b32.xlu0 %v3576_v47, %s3056_s28  ;;  %1586 = vrot.lane.b32.xlu1 %v3512_v33, %s3059_s14 }
 0x3e6   : > { %1598 = vrot.lane.b32.xlu0 %v3556_v56, %s3059_s14  ;;  %1592 = vrot.lane.b32.xlu1 %v3534_v18, %s3059_s14 }
 0x3ea   : > { %1604 = vrot.lane.b32.xlu0 %v3576_v47, %s3059_s14  ;;  %1590 = vrot.lane.b32.xlu1 %v3526_v58, %s3059_s14 }
 0x3ec   : > { %v1441_v57 = vpop.permute.xlu0 %1440  ;;  %v1139_v60 = vpop.permute.xlu1 %1138 }
 0x3ed   : > { %v1160_v61 = vsel %vm406_vm3, %v2814_v55, %v1139_v60 }
 0x3ee   : > { %1176 = vst [vmem:[#allocation4] sm:$0xff] %v1160_v61  ;;  %1602 = vrot.lane.b32.xlu0 %v3570_v46, %s3059_s14  ;;  %2877 = vrot.lane.b32.xlu1 %v3053_v7, %s3059_s14 }
 0x3f0   : > { %v1141_v63 = vpop.permute.xlu0 %1140  ;;  %v1211_v3 = vpop.permute.xlu1 %1210 }
 0x3f1   : > { %v1161_v4 = vsel %vm406_vm3, %v1139_v60, %v1141_v63  ;;  %v3709_v8 = vsel %vm420_vm5, %v2824_v62, %v1211_v3 }
 0x3f2   : > { %1177 = vst [vmem:[#allocation4 + $0x8] sm:$0xff] %v1161_v4  ;;  %2882 = vrot.lane.b32.xlu0 %v3053_v7, %s3058_s10  ;;  %1596 = vrot.lane.b32.xlu1 %v3548_v42, %s3059_s14 }
 0x3f4   : > { %v1213_v10 = vpop.permute.xlu0 %1212  ;;  %v1283_v11 = vpop.permute.xlu1 %1282 }
 0x3f5   : > { %v3717_v12 = vsel %vm420_vm5, %v1211_v3, %v1213_v10  ;;  %v3720_v13 = vsel %vm431_vm2, %v2834_v9, %v1283_v11  ;;  %v1802_v9 = vld [vmem:[%s4226_s6 + $0x10] sm:$0xff] }
 0x3f6   : > { %1656 = vrot.lane.b32.xlu0 %v3504_v24, %s3058_s10  ;;  %1658 = vrot.lane.b32.xlu1 %v3512_v33, %s3058_s10 }
 0x3f8   : > { %v1285_v15 = vpop.permute.xlu0 %1284  ;;  %v1355_v19 = vpop.permute.xlu1 %1354 }
 0x3f9   : > { %v3728_v22 = vsel %vm431_vm2, %v1283_v11, %v1285_v15  ;;  %v3731_v29 = vsel %vm442_vm4, %v2844_v14, %v1355_v19 }
 0x3fa   : > { %1670 = vrot.lane.b32.xlu0 %v3556_v56, %s3058_s10  ;;  %1664 = vrot.lane.b32.xlu1 %v3534_v18, %s3058_s10 }
 0x3fc   : > { %v1357_v24 = vpop.permute.xlu0 %1356  ;;  %v1443_v28 = vpop.permute.xlu1 %1442 }
 0x3fd   : > { %v3739_v33 = vsel %vm442_vm4, %v1355_v19, %v1357_v24  ;;  %v3742_v36 = vsel %vm457_vm7, %v1441_v57, %v1443_v28  ;;  %v3745_v38 = vsel %vm457_vm7, %v1443_v28, %v2854_v32  ;;  %v1807_v19 = vld [vmem:[%s4226_s6 + $0x38] sm:$0xff]  ;;  %v1804_v32 = vld [vmem:[%s4226_s6 + $0x20] sm:$0xff] }
 0x3fe   : > { %1676 = vrot.lane.b32.xlu0 %v3576_v47, %s3058_s10  ;;  %1662 = vrot.lane.b32.xlu1 %v3526_v58, %s3058_s10  ;;  %v2825_v58 = vunpack.i.h.bf16 %v3674_v50  ;;  %v1803_v50 = vld [vmem:[%s4226_s6 + $0x18] sm:$0xff] }
 0x400   : > { %v1147_v18 = vpop.permute.xlu0 %1146  ;;  %v1145_v39 = vpop.permute.xlu1 %1144 }
 0x401   : > { %v1162_v41 = vsel %vm406_vm3, %v2815_v1, %v1145_v39  ;;  %v1163_v44 = vsel %vm406_vm3, %v1145_v39, %v1147_v18  ;;  %v2829_v18 = vunpack.i.l.bf16 %v3660_v21  ;;  %v2855_v39 = vunpack.i.h.bf16 %v3692_v53 }
 0x402   : > { %1178 = vst [vmem:[#allocation4 + $0x10] sm:$0xff] %v1162_v41  ;;  %1179 = vst [vmem:[#allocation4 + $0x18] sm:$0xff] %v1163_v44  ;;  %1674 = vrot.lane.b32.xlu0 %v3570_v46, %s3058_s10  ;;  %2887 = vrot.lane.b32.xlu1 %v3053_v7, %s3058_s10  ;;  %v2536_v56 = vpack.c.bf16 %v1163_v44, %v1161_v4  ;;  %v2538_v47 = vpack.c.bf16 %v1162_v41, %v1160_v61  ;;  %v2835_v46 = vunpack.i.h.bf16 %v3682_v52  ;;  %v1800_v61 = vld [vmem:[%s4226_s6] sm:$0xff]  ;;  %v1805_v52 = vld [vmem:[%s4226_s6 + $0x28] sm:$0xff] }
 0x403   : > { %v1806_v41 = vld [vmem:[%s4226_s6 + $0x30] sm:$0xff] }
 0x404   : > { %v1219_v45 = vpop.permute.xlu0 %1218  ;;  %v1217_v55 = vpop.permute.xlu1 %1216  ;;  %2537 = vmatprep.subr.bf16.mxu0 %v2536_v56 }
 0x405   : > { %v3763_v57 = vsel %vm420_vm5, %v2825_v58, %v1217_v55  ;;  %v3766_v60 = vsel %vm420_vm5, %v1217_v55, %v1219_v45  ;;  %2539 = vmatpush1.bf16.msra.mxu0 %v2538_v47  ;;  %v2839_v45 = vunpack.i.l.bf16 %v3672_v49 }
 0x406   : > { %1815 = vperm.xlu0 %2769, %v1801_v48   ;;  %1668 = vrot.lane.b32.xlu1 %v3548_v42, %s3058_s10  ;;  %v2845_v42 = vunpack.i.h.bf16 %v3694_v54  ;;  %v2819_v54 = vunpack.i.l.bf16 %v3654_v20 }
 0x408   : > { %v1291_v62 = vpop.permute.xlu0 %1290  ;;  %v1289_v63 = vpop.permute.xlu1 %1288 }
 0x409   : > { %v3778_v3 = vsel %vm431_vm2, %v2835_v46, %v1289_v63  ;;  %v3781_v4 = vsel %vm431_vm2, %v1289_v63, %v1291_v62 }
 0x40a   : > { %1825 = vperm.xlu0 %2769, %v1803_v50   ;;  %1810 = vperm.xlu1 %2770, %v1800_v61   ;;  %v2849_v61 = vunpack.i.l.bf16 %v3680_v51 }
 0x40c   : > { %v1363_v10 = vpop.permute.xlu0 %1362  ;;  %v1361_v11 = vpop.permute.xlu1 %1360 }
 0x40d   : > { %v3791_v14 = vsel %vm442_vm4, %v2845_v42, %v1361_v11  ;;  %v3794_v15 = vsel %vm442_vm4, %v1361_v11, %v1363_v10 }
 0x40e   : > { %1835 = vperm.xlu0 %2769, %v1805_v52   ;;  %1820 = vperm.xlu1 %2770, %v1802_v9  }
 0x410   : > { %v1151_v24 = vpop.permute.xlu0 %1150  ;;  %v1447_v28 = vpop.permute.xlu1 %1446 }
 0x411   : > { %v3804_v1 = vsel %vm406_vm3, %v2819_v54, %v1151_v24  ;;  %v2820_v54 = vunpack.i.h.bf16 %v3654_v20  ;;  %v2115_v20 = vld [vmem:[%s4228_s8] sm:$0xff] }
 0x412   : > { %1845 = vperm.xlu0 %2769, %v1807_v19   ;;  %1830 = vperm.xlu1 %2770, %v1804_v32  }
 0x414   : > { %v1223_v44 = vpop.permute.xlu0 %1222  ;;  %v1449_v56 = vpop.permute.xlu1 %1448 }
 0x415   : > { %v3812_v47 = vsel %vm420_vm5, %v2829_v18, %v1223_v44  ;;  %v3815_v58 = vsel %vm457_vm7, %v1447_v28, %v1449_v56  ;;  %v3818_v48 = vsel %vm457_vm7, %v1449_v56, %v2855_v39  ;;  %v2830_v18 = vunpack.i.h.bf16 %v3660_v21  ;;  %v2116_v39 = vld [vmem:[%s4228_s8 + $0x8] sm:$0xff] }
 0x416   : > { %1840 = vperm.xlu1 %2770, %v1806_v41   ;;  %v2118_v41 = vld [vmem:[%s4228_s8 + $0x18] sm:$0xff]  ;;  %v2120_v21 = vld [vmem:[%s4228_s8 + $0x28] sm:$0xff]  ;;  %v2578_v0 = vpack.c.bf16 %v3815_v58, %v3742_v36 }
 0x417   : > { %v2164_v36 = vld [vmem:[%s4228_s8 + $0x188] sm:$0xff]  ;;  %v2166_v58 = vld [vmem:[%s4228_s8 + $0x198] sm:$0xff] }
 0x418   : > { %v1295_v55 = vpop.permute.xlu0 %1294  ;;  %v1153_v53 = vpop.permute.xlu1 %1152 }
 0x419   : > { %v3822_v46 = vsel %vm431_vm2, %v2839_v45, %v1295_v55  ;;  %v1165_v50 = vsel %vm406_vm3, %v1151_v24, %v1153_v53  ;;  %v2608_v45 = vpack.c.bf16 %v2118_v41, %v2116_v39  ;;  %v2122_v53 = vld [vmem:[%s4228_s8 + $0x38] sm:$0xff]  ;;  %v2124_v39 = vld [vmem:[%s4228_s8 + $0x48] sm:$0xff] }
 0x41b   : > { %2609 = vmatprep.subr.bf16.mxu1 %v2608_v45  ;;  %v2123_v45 = vld [vmem:[%s4228_s8 + $0x40] sm:$0xff] }
 0x41c   : > { %v1367_v62 = vpop.permute.xlu0 %1366  ;;  %v1225_v63 = vpop.permute.xlu1 %1224 }
 0x41d   : > { %v3827_v42 = vsel %vm442_vm4, %v2849_v61, %v1367_v62  ;;  %v3830_v52 = vsel %vm420_vm5, %v1223_v44, %v1225_v63 }
 0x420   : > { %v3832_v9 = vpop.permute.xlu0 %1454  ;;  %v1297_v10 = vpop.permute.xlu1 %1296 }
 0x421   : > { %v3835_v11 = vsel %vm431_vm2, %v1295_v55, %v1297_v10  ;;  %v2117_v55 = vld [vmem:[%s4228_s8 + $0x10] sm:$0xff]  ;;  %v2612_v10 = vpack.c.bf16 %v2122_v53, %v2120_v21  ;;  %v2544_v53 = vpack.c.bf16 %v3766_v60, %v3717_v12  ;;  %v2128_v12 = vld [vmem:[%s4228_s8 + $0x68] sm:$0xff]  ;;  %v2130_v60 = vld [vmem:[%s4228_s8 + $0x78] sm:$0xff] }
 0x422   : > { %v2610_v63 = vpack.c.bf16 %v2117_v55, %v2115_v20 }
 0x424   : > { %v1157_v19 = vpop.permute.xlu0 %1156  ;;  %v1369_v32 = vpop.permute.xlu1 %1368  ;;  %2611 = vmatpush1.bf16.msra.mxu1 %v2610_v63 }
 0x425   : > { %v1166_v24 = vsel %vm406_vm3, %v2820_v54, %v1157_v19  ;;  %v3840_v28 = vsel %vm442_vm4, %v1367_v62, %v1369_v32  ;;  %v2119_v54 = vld [vmem:[%s4228_s8 + $0x20] sm:$0xff]  ;;  %v2121_v32 = vld [vmem:[%s4228_s8 + $0x30] sm:$0xff]  ;;  %2613 = vmatprep.subr.bf16.mxu1 %v2612_v10  ;;  %v2546_v10 = vpack.c.bf16 %v3763_v57, %v3709_v8  ;;  %v2132_v57 = vld [vmem:[%s4228_s8 + $0x88] sm:$0xff] }
 0x426   : > { %v2542_v20 = vpack.c.bf16 %v1166_v24, %v3804_v1 }
 0x428   : > { %v1229_v44 = vpop.permute.xlu0 %1228  ;;  %v1159_v56 = vpop.permute.xlu1 %1158 }
 0x429   : > { %v1238_v61 = vsel %vm420_vm5, %v2830_v18, %v1229_v44  ;;  %v1167_v62 = vsel %vm406_vm3, %v1157_v19, %v1159_v56  ;;  %v2126_v19 = vld [vmem:[%s4228_s8 + $0x58] sm:$0xff]  ;;  %v2840_v18 = vunpack.i.h.bf16 %v3672_v49  ;;  %v2614_v56 = vpack.c.bf16 %v2121_v32, %v2119_v54  ;;  %v2125_v49 = vld [vmem:[%s4228_s8 + $0x50] sm:$0xff] }
 0x42a   : > { %v2540_v41 = vpack.c.bf16 %v1167_v62, %v1165_v50  ;;  %v2616_v50 = vpack.c.bf16 %v2126_v19, %v2124_v39  ;;  %v2850_v62 = vunpack.i.h.bf16 %v3680_v51  ;;  %v2618_v54 = vpack.c.bf16 %v2125_v49, %v2123_v45  ;;  %v2127_v19 = vld [vmem:[%s4228_s8 + $0x60] sm:$0xff]  ;;  %v2129_v51 = vld [vmem:[%s4228_s8 + $0x70] sm:$0xff] }
 0x42b   : > { %2615 = vmatpush1.bf16.msra.mxu1 %v2614_v56 }
 0x42c   : > { %v1301_v55 = vpop.permute.xlu0 %1300  ;;  %v3877_v21 = vpop.permute.xlu1 %2857  ;;  %2541 = vmatprep.subr.bf16.mxu0 %v2540_v41  ;;  %2617 = vmatprep.subr.bf16.mxu1 %v2616_v50  ;;  %v2620_v41 = vpack.c.bf16 %v2130_v60, %v2128_v12  ;;  %v2622_v50 = vpack.c.bf16 %v2129_v51, %v2127_v19  ;;  %v2131_v12 = vld [vmem:[%s4228_s8 + $0x80] sm:$0xff] }
 0x42d   : > { %v3888_v1 = vsel %vm431_vm2, %v2840_v18, %v1301_v55  ;;  %v2859_v24 = vunpack.i.l.bf16 %v3877_v21  ;;  %2543 = vmatpush1.bf16.msra.mxu0 %v2542_v20  ;;  %v2134_v20 = vld [vmem:[%s4228_s8 + $0x98] sm:$0xff]  ;;  %v2860_v17 = vunpack.i.h.bf16 %v3877_v21 }
 0x42e   : > { %2545 = vmatprep.subr.bf16.mxu0 %v2544_v53  ;;  %v2550_v53 = vpack.c.bf16 %v1238_v61, %v3812_v47  ;;  %v2136_v61 = vld [vmem:[%s4228_s8 + $0xa8] sm:$0xff]  ;;  %v2162_v21 = vld [vmem:[%s4228_s8 + $0x178] sm:$0xff] }
 0x42f   : > { %v3900_v63 = vsel %vm457_vm7, %v3832_v9, %v2859_v24  ;;  %2619 = vmatpush1.bf16.msra.mxu1 %v2618_v54  ;;  %v2624_v24 = vpack.c.bf16 %v2134_v20, %v2132_v57  ;;  %v2135_v54 = vld [vmem:[%s4228_s8 + $0xa0] sm:$0xff] }
 0x430   : > { %v3904_v32 = vpop.permute.xlu0 %1372  ;;  %v1231_v39 = vpop.permute.xlu1 %1230  ;;  %2621 = vmatprep.subr.bf16.mxu1 %v2620_v41 }
 0x431   : > { %v3914_v18 = vsel %vm442_vm4, %v2850_v62, %v3904_v32  ;;  %v1239_v8 = vsel %vm420_vm5, %v1229_v44, %v1231_v39  ;;  %2547 = vmatpush1.bf16.msra.mxu0 %v2546_v10  ;;  %v2552_v44 = vpack.c.bf16 %v3781_v4, %v3728_v22  ;;  %v2138_v22 = vld [vmem:[%s4228_s8 + $0xb8] sm:$0xff]  ;;  %v2554_v4 = vpack.c.bf16 %v3778_v3, %v3720_v13  ;;  %v2137_v39 = vld [vmem:[%s4228_s8 + $0xb0] sm:$0xff]  ;;  %v2140_v13 = vld [vmem:[%s4228_s8 + $0xc8] sm:$0xff] }
 0x432   : > { %v2548_v56 = vpack.c.bf16 %v1239_v8, %v3830_v52  ;;  %v2133_v52 = vld [vmem:[%s4228_s8 + $0x90] sm:$0xff]  ;;  %v2142_v3 = vld [vmem:[%s4228_s8 + $0xd8] sm:$0xff]  ;;  %v2558_v8 = vpack.c.bf16 %v3888_v1, %v3822_v46  ;;  %v2630_v57 = vpack.c.bf16 %v2137_v39, %v2135_v54 }
 0x433   : > { %2623 = vmatpush1.bf16.msra.mxu1 %v2622_v50  ;;  %v2626_v60 = vpack.c.bf16 %v2133_v52, %v2131_v12  ;;  %v2139_v50 = vld [vmem:[%s4228_s8 + $0xc0] sm:$0xff] }
 0x434   : > { %v3925_v45 = vpop.permute.xlu0 %1458  ;;  %v1453_v49 = vpop.permute.xlu1 %1452  ;;  %2549 = vmatprep.subr.bf16.mxu0 %v2548_v56  ;;  %2625 = vmatprep.subr.bf16.mxu1 %v2624_v24 }
 0x435   : > { %v3937_v47 = vsel %vm457_vm7, %v1453_v49, %v3832_v9  ;;  %2551 = vmatpush1.bf16.msra.mxu0 %v2550_v53  ;;  %v2628_v9 = vpack.c.bf16 %v2138_v22, %v2136_v61  ;;  %v2632_v53 = vpack.c.bf16 %v2142_v3, %v2140_v13  ;;  %v2562_v49 = vpack.c.bf16 %v3791_v14, %v3731_v29  ;;  %v2143_v61 = vld [vmem:[%s4228_s8 + $0xe0] sm:$0xff]  ;;  %v2145_v22 = vld [vmem:[%s4228_s8 + $0xf0] sm:$0xff]  ;;  %v2148_v29 = vld [vmem:[%s4228_s8 + $0x108] sm:$0xff] }
 0x436   : > { %2553 = vmatprep.subr.bf16.mxu0 %v2552_v44  ;;  %v2150_v14 = vld [vmem:[%s4228_s8 + $0x118] sm:$0xff]  ;;  %v2638_v54 = vpack.c.bf16 %v2145_v22, %v2143_v61  ;;  %v2898_v13 = vpack.c.bf16 %v1091_v37, %v1089_v31  ;;  %v2156_v37 = vld [vmem:[%s4228_s8 + $0x148] sm:$0xff] }
 0x437   : > { %2627 = vmatpush1.bf16.msra.mxu1 %v2626_v60 }
 0x438   : > { %v2863_v62 = vpop.permute.xlu0 %2862  ;;  %v1303_v10 = vpop.permute.xlu1 %1302  ;;  %2629 = vmatprep.subr.bf16.mxu1 %v2628_v9  ;;  %v2566_v9 = vpack.c.bf16 %v3914_v18, %v3827_v42  ;;  %v2152_v42 = vld [vmem:[%s4228_s8 + $0x128] sm:$0xff]  ;;  %v2154_v18 = vld [vmem:[%s4228_s8 + $0x138] sm:$0xff] }
 0x439   : > { %v2864_v41 = vunpack.i.l.bf16 %v2863_v62  ;;  %v1311_v19 = vsel %vm431_vm2, %v1301_v55, %v1303_v10  ;;  %2555 = vmatpush1.bf16.msra.mxu0 %v2554_v4  ;;  %v2560_v55 = vpack.c.bf16 %v3794_v15, %v3739_v33  ;;  %v2144_v33 = vld [vmem:[%s4228_s8 + $0xe8] sm:$0xff]  ;;  %v2146_v15 = vld [vmem:[%s4228_s8 + $0xf8] sm:$0xff]  ;;  %v2865_v10 = vunpack.i.h.bf16 %v2863_v62  ;;  %vm4189_vm2 = vmor %vm2341_vm1, %vm2340_vm0 }
 0x43a   : > { %v2556_v51 = vpack.c.bf16 %v1311_v19, %v3835_v11  ;;  %v2141_v11 = vld [vmem:[%s4228_s8 + $0xd0] sm:$0xff]  ;;  %v2636_v52 = vpack.c.bf16 %v2146_v15, %v2144_v33  ;;  %v2147_v19 = vld [vmem:[%s4228_s8 + $0x100] sm:$0xff] }
 0x43b   : > { %2631 = vmatpush1.bf16.msra.mxu1 %v2630_v57  ;;  %v2634_v44 = vpack.c.bf16 %v2141_v11, %v2139_v50  ;;  %v2644_v57 = vpack.c.bf16 %v2154_v18, %v2152_v42  ;;  %v2159_v33 = vld [vmem:[%s4228_s8 + $0x160] sm:$0xff]  ;;  %v2161_v15 = vld [vmem:[%s4228_s8 + $0x170] sm:$0xff] }
 0x43c   : > { %v1513_v20 = vpop.permute.xlu0 %1512  ;;  %v1515_v56 = vpop.permute.xlu1 %1514  ;;  %2557 = vmatprep.subr.bf16.mxu0 %v2556_v51  ;;  %2633 = vmatprep.subr.bf16.mxu1 %v2632_v53  ;;  %v2576_v53 = vpack.c.bf16 %v3818_v48, %v3745_v38  ;;  %v2907_v38 = vpack.c.bf16 %v1094_v5, %v1092_v30  ;;  %v2160_v48 = vld [vmem:[%s4228_s8 + $0x168] sm:$0xff]  ;;  %v2650_v30 = vpack.c.bf16 %v2157_v16, %v2155_v25  ;;  %v2167_v18 = vld [vmem:[%s4228_s8 + $0x1a0] sm:$0xff] }
 0x43d   : > { %v3972_v46 = vsel %vm468_vm6, %v1513_v20, %v1515_v56  ;;  %v3975_v1 = vsel %vm468_vm6, %v1515_v56, %v2864_v41  ;;  %2559 = vmatpush1.bf16.msra.mxu0 %v2558_v8  ;;  %v2640_v41 = vpack.c.bf16 %v2150_v14, %v2148_v29  ;;  %v2151_v20 = vld [vmem:[%s4228_s8 + $0x120] sm:$0xff]  ;;  %v2158_v56 = vld [vmem:[%s4228_s8 + $0x158] sm:$0xff]  ;;  %v2652_v11 = vpack.c.bf16 %v2162_v21, %v2160_v48  ;;  %v2165_v14 = vld [vmem:[%s4228_s8 + $0x190] sm:$0xff] }
 0x43e   : > { %2561 = vmatprep.subr.bf16.mxu0 %v2560_v55  ;;  %v2904_v55 = vpack.c.bf16 %v1095_v6, %v1093_v40  ;;  %v2646_v27 = vpack.c.bf16 %v2153_v26, %v2151_v20  ;;  %v2648_v50 = vpack.c.bf16 %v2158_v56, %v2156_v37  ;;  %v2163_v29 = vld [vmem:[%s4228_s8 + $0x180] sm:$0xff] }
 0x43f   : > { %2635 = vmatpush1.bf16.msra.mxu1 %v2634_v44 }
 0x440   : > { %v3985_v24 = vpop.permute.xlu0 %1526  ;;  %v1375_v12 = vpop.permute.xlu1 %1374  ;;  %2637 = vmatprep.subr.bf16.mxu1 %v2636_v52  ;;  %v2654_v52 = vpack.c.bf16 %v2161_v15, %v2159_v33  ;;  %v1707_v33 = vld [vmem:[#allocation9 + $0x18] sm:$0xff] }
 0x441   : > { %v1383_v4 = vsel %vm442_vm4, %v3904_v32, %v1375_v12  ;;  %2563 = vmatpush1.bf16.msra.mxu0 %v2562_v49 }
 0x442   : > { %v2564_v60 = vpack.c.bf16 %v1383_v4, %v3840_v28  ;;  %v2149_v28 = vld [vmem:[%s4228_s8 + $0x110] sm:$0xff]  ;;  %v2656_v4 = vpack.c.bf16 %v2166_v58, %v2164_v36 }
 0x443   : > { %2639 = vmatpush1.bf16.msra.mxu1 %v2638_v54  ;;  %v2642_v3 = vpack.c.bf16 %v2149_v28, %v2147_v19  ;;  %v2170_v54 = vld [vmem:[%s4228_s8 + $0x1b8] sm:$0xff] }
 0x444   : > { %v4004_v39 = vpop.permute.xlu0 %1530  ;;  %v1521_v32 = vpop.permute.xlu1 %1520  ;;  %2565 = vmatprep.subr.bf16.mxu0 %v2564_v60  ;;  %2641 = vmatprep.subr.bf16.mxu1 %v2640_v41  ;;  %v2658_v41 = vpack.c.bf16 %v2165_v14, %v2163_v29 }
 0x445   : > { %v4013_v62 = vsel %vm468_vm6, %v1521_v32, %v2865_v10  ;;  %2567 = vmatpush1.bf16.msra.mxu0 %v2566_v9 }
 0x446   : > { %2899 = vmatprep.subr.msk.bf16.mxu0 %vm3442_vm13, %v2898_v13  ;;  %v2169_v13 = vld [vmem:[%s4228_s8 + $0x1b0] sm:$0xff] }
 0x447   : > { %2643 = vmatpush1.bf16.msra.mxu1 %v2642_v3 }
 0x448   : > { %v4027_v51 = vpop.permute.xlu0 %2872  ;;  %v1519_v8 = vpop.permute.xlu1 %1518  ;;  %2645 = vmatprep.subr.bf16.mxu1 %v2644_v57  ;;  %v2662_v57 = vpack.c.bf16 %v2169_v13, %v2167_v18  ;;  %v1726_v18 = vld [vmem:[#allocation9 + $0xb0] sm:$0xff]  ;;  %v1725_v13 = vld [vmem:[#allocation9 + $0xa8] sm:$0xff] }
 0x449   : > { %v4036_v31 = vsel %vm468_vm6, %v1519_v8, %v1521_v32  ;;  %2902 = vmatpush1.bf16.msk.msra.mxu0 %vm3464_vm14, %v2901_v34  ;;  %v2875_v32 = vunpack.i.h.bf16 %v4027_v51 }
 0x44a   : > { %2905 = vmatprep.subr.msk.bf16.mxu0 %vm3442_vm13, %v2904_v55 }
 0x44b   : > { %2647 = vmatpush1.bf16.msra.mxu1 %v2646_v27 }
 0x44c   : > { %v1461_v23 = vpop.permute.xlu0 %1460  ;;  %v2868_v35 = vpop.permute.xlu1 %2867  ;;  %2649 = vmatprep.subr.bf16.mxu1 %v2648_v50 }
 0x44d   : > { %v1470_v40 = vsel %vm457_vm7, %v3925_v45, %v1461_v23  ;;  %v1471_v59 = vsel %vm457_vm7, %v1461_v23, %v2860_v17  ;;  %v2869_v6 = vunpack.i.l.bf16 %v2868_v35  ;;  %2908 = vmatpush1.bf16.msk.msra.mxu0 %vm3464_vm14, %v2907_v38  ;;  %v2870_v44 = vunpack.i.h.bf16 %v2868_v35 }
 0x44e   : > { %2577 = vmatprep.subr.bf16.mxu0 %v2576_v53  ;;  %v2580_v5 = vpack.c.bf16 %v1471_v59, %v3900_v63  ;;  %v2874_v63 = vunpack.i.l.bf16 %v4027_v51  ;;  %v2582_v12 = vpack.c.bf16 %v1470_v40, %v3937_v47  ;;  %v2174_v51 = vld [vmem:[%s4228_s8 + $0x1d8] sm:$0xff] }
 0x44f   : > { %v1541_v45 = vsel %vm468_vm6, %v3985_v24, %v2869_v6  ;;  %2651 = vmatpush1.bf16.msra.mxu1 %v2650_v30 }
 0x450   : > { %v1585_v43 = vpop.permute.xlu0 %1584  ;;  %v1525_v2 = vpop.permute.xlu1 %1524  ;;  %2653 = vmatprep.subr.bf16.mxu1 %v2652_v11 }
 0x451   : > { %v1540_v49 = vsel %vm468_vm6, %v1525_v2, %v3985_v24  ;;  %2579 = vmatpush1.bf16.msra.mxu0 %v2578_v0  ;;  %v2584_v24 = vpack.c.bf16 %v4013_v62, %v3975_v1  ;;  %v2168_v1 = vld [vmem:[%s4228_s8 + $0x1a8] sm:$0xff]  ;;  %v1708_v2 = vld [vmem:[#allocation9 + $0x20] sm:$0xff] }
 0x452   : > { %2581 = vmatprep.subr.bf16.mxu0 %v2580_v5  ;;  %v2660_v42 = vpack.c.bf16 %v2170_v54, %v2168_v1 }
 0x453   : > { %2655 = vmatpush1.bf16.msra.mxu1 %v2654_v52  ;;  %v1714_v52 = vld [vmem:[#allocation9 + $0x50] sm:$0xff] }
 0x454   : > { %v1533_v61 = vpop.permute.xlu0 %1532  ;;  %v1587_v22 = vpop.permute.xlu1 %1586  ;;  %2657 = vmatprep.subr.bf16.mxu1 %v2656_v4  ;;  %v1713_v4 = vld [vmem:[#allocation9 + $0x48] sm:$0xff] }
 0x455   : > { %v1542_v47 = vsel %vm468_vm6, %v4004_v39, %v1533_v61  ;;  %v1543_v60 = vsel %vm468_vm6, %v1533_v61, %v2870_v44  ;;  %v1608_v10 = vsel %vm479_vm9, %v1585_v43, %v1587_v22  ;;  %v1609_v9 = vsel %vm479_vm9, %v1587_v22, %v2874_v63  ;;  %2583 = vmatpush1.bf16.msra.mxu0 %v2582_v12  ;;  %v1710_v44 = vld [vmem:[#allocation9 + $0x30] sm:$0xff] }
 0x456   : > { %2585 = vmatprep.subr.bf16.mxu0 %v2584_v24  ;;  %v2586_v39 = vpack.c.bf16 %v4036_v31, %v3972_v46  ;;  %v2588_v62 = vpack.c.bf16 %v1543_v60, %v1541_v45  ;;  %v2172_v46 = vld [vmem:[%s4228_s8 + $0x1c8] sm:$0xff]  ;;  %v2590_v8 = vpack.c.bf16 %v1542_v47, %v1540_v49  ;;  %v1704_v45 = vld [vmem:[#allocation9] sm:$0xff]  ;;  %v1717_v60 = vld [vmem:[#allocation9 + $0x68] sm:$0xff] }
 0x457   : > { %2659 = vmatpush1.bf16.msra.mxu1 %v2658_v41  ;;  %v2664_v34 = vpack.c.bf16 %v2174_v51, %v2172_v46  ;;  %v1711_v49 = vld [vmem:[#allocation9 + $0x38] sm:$0xff]  ;;  %v1720_v41 = vld [vmem:[#allocation9 + $0x80] sm:$0xff]  ;;  %v1709_v46 = vld [vmem:[#allocation9 + $0x28] sm:$0xff] }
 0x458   : > { %v1599_v19 = vpop.permute.xlu0 %1598  ;;  %v1593_v28 = vpop.permute.xlu1 %1592  ;;  %2661 = vmatprep.subr.bf16.mxu1 %v2660_v42  ;;  %v1722_v42 = vld [vmem:[#allocation9 + $0x90] sm:$0xff]  ;;  %v1712_v51 = vld [vmem:[#allocation9 + $0x40] sm:$0xff] }
 0x459   : > { %v1611_v3 = vsel %vm479_vm9, %v1593_v28, %v2875_v32  ;;  %2587 = vmatpush1.bf16.msra.mxu0 %v2586_v39  ;;  %v1716_v32 = vld [vmem:[#allocation9 + $0x60] sm:$0xff] }
 0x45a   : > { %2589 = vmatprep.subr.bf16.mxu0 %v2588_v62  ;;  %v2592_v31 = vpack.c.bf16 %v1611_v3, %v1609_v9  ;;  %v1723_v62 = vld [vmem:[#allocation9 + $0x98] sm:$0xff]  ;;  %v1706_v3 = vld [vmem:[#allocation9 + $0x10] sm:$0xff] }
 0x45b   : > { %2663 = vmatpush1.bf16.msra.mxu1 %v2662_v57  ;;  %v1718_v57 = vld [vmem:[#allocation9 + $0x70] sm:$0xff] }
 0x45c   : > { %v1605_v20 = vpop.permute.xlu0 %1604  ;;  %v1591_v26 = vpop.permute.xlu1 %1590  ;;  %2665 = vmatprep.subr.bf16.mxu1 %v2664_v34  ;;  %v2171_v34 = vld [vmem:[%s4228_s8 + $0x1c0] sm:$0xff] }
 0x45d   : > { %v1610_v37 = vsel %vm479_vm9, %v1591_v26, %v1593_v28  ;;  %2591 = vmatpush1.bf16.msra.mxu0 %v2590_v8  ;;  %v1719_v28 = vld [vmem:[#allocation9 + $0x78] sm:$0xff]  ;;  %v1724_v26 = vld [vmem:[#allocation9 + $0xa0] sm:$0xff] }
 0x45e   : > { %2593 = vmatprep.subr.bf16.mxu0 %v2592_v31  ;;  %v2594_v56 = vpack.c.bf16 %v1610_v37, %v1608_v10  ;;  %v1715_v8 = vld [vmem:[#allocation9 + $0x58] sm:$0xff]  ;;  %v2173_v37 = vld [vmem:[%s4228_s8 + $0x1d0] sm:$0xff] }
 0x45f   : > { %v1727_v31 = vld [vmem:[#allocation9 + $0xb8] sm:$0xff] }
 0x460   : > { %v1603_v55 = vpop.permute.xlu0 %1602  ;;  %v2878_v17 = vpop.permute.xlu1 %2877 }
 0x461   : > { %v1614_v27 = vsel %vm479_vm9, %v1603_v55, %v1605_v20  ;;  %v2880_v23 = vunpack.i.h.bf16 %v2878_v17  ;;  %v2879_v35 = vunpack.i.l.bf16 %v2878_v17  ;;  %2595 = vmatpush1.bf16.msra.mxu0 %v2594_v56  ;;  %v2666_v56 = vpack.c.bf16 %v2173_v37, %v2171_v34  ;;  %v2176_v55 = vld [vmem:[%s4228_s8 + $0x1e8] sm:$0xff] }
 0x463   : > { %v1615_v53 = vsel %vm479_vm9, %v1605_v20, %v2880_v23  ;;  %v1613_v50 = vsel %vm479_vm9, %v1599_v19, %v2879_v35  ;;  %v1721_v20 = vld [vmem:[#allocation9 + $0x88] sm:$0xff]  ;;  %2667 = vmatpush1.bf16.msra.mxu1 %v2666_v56  ;;  %v2177_v23 = vld [vmem:[%s4228_s8 + $0x1f0] sm:$0xff] }
 0x464   : > { %v2883_v25 = vpop.permute.xlu0 %2882  ;;  %v1597_v16 = vpop.permute.xlu1 %1596  ;;  %v2596_v40 = vpack.c.bf16 %v1615_v53, %v1613_v50 }
 0x465   : > { %v2884_v59 = vunpack.i.l.bf16 %v2883_v25  ;;  %v1612_v6 = vsel %vm479_vm9, %v1597_v16, %v1599_v19  ;;  %v2885_v0 = vunpack.i.h.bf16 %v2883_v25 }
 0x466   : > { %2597 = vmatprep.subr.bf16.mxu0 %v2596_v40  ;;  %v2598_v38 = vpack.c.bf16 %v1614_v27, %v1612_v6  ;;  %v2175_v27 = vld [vmem:[%s4228_s8 + $0x1e0] sm:$0xff] }
 0x467   : > { %v2670_v35 = vpack.c.bf16 %v2177_v23, %v2175_v27 }
 0x468   : > { %v1657_v48 = vpop.permute.xlu0 %1656  ;;  %v1659_v21 = vpop.permute.xlu1 %1658  ;;  %2599 = vmatpush1.bf16.msra.mxu0 %v2598_v38 }
 0x469   : > { %v1680_v30 = vsel %vm490_vm8, %v1657_v48, %v1659_v21  ;;  %v1681_v43 = vsel %vm490_vm8, %v1659_v21, %v2884_v59 }
 0x46b   : > { %1938 = vmatmul.mubr.f32.vlgmr.msra.gmra.mrb[4].mxu0 %v1704_v45 }
 0x46c   : > { %v1671_v5 = vpop.permute.xlu0 %1670  ;;  %v1665_v11 = vpop.permute.xlu1 %1664  ;;  %1943 = vmatprep.mubr.f32.mxu0 %v1708_v2 }
 0x46d   : > { %v1683_v15 = vsel %vm490_vm8, %v1665_v11, %v2885_v0 }
 0x46e   : > { %v2600_v36 = vpack.c.bf16 %v1683_v15, %v1681_v43 }
 0x46f   : > { %1944 = vmatmul.mubr.f32.gmra.mrb[6].mxu0 %v1707_v33 }
 0x470   : > { %v1677_v58 = vpop.permute.xlu0 %1676  ;;  %v1663_v63 = vpop.permute.xlu1 %1662  ;;  %2601 = vmatprep.subr.bf16.mxu0 %v2600_v36  ;;  %1949 = vmatprep.mubr.f32.mxu0 %v1711_v49 }
 0x471   : > { %v1682_v12 = vsel %vm490_vm8, %v1663_v63, %v1665_v11 }
 0x472   : > { %v2602_v61 = vpack.c.bf16 %v1682_v12, %v1680_v30 }
 0x473   : > { %1950 = vmatmul.mubr.f32.gmra.mrb[8].mxu0 %v1710_v44 }
 0x474   : > { %v1675_v22 = vpop.permute.xlu0 %1674  ;;  %v2888_v24 = vpop.permute.xlu1 %2887  ;;  %2603 = vmatpush1.bf16.msra.mxu0 %v2602_v61  ;;  %1955 = vmatprep.mubr.f32.mxu0 %v1714_v52 }
 0x475   : > { %v1686_v29 = vsel %vm490_vm8, %v1675_v22, %v1677_v58  ;;  %v2890_v14 = vunpack.i.h.bf16 %v2888_v24  ;;  %v2889_v47 = vunpack.i.l.bf16 %v2888_v24 }
 0x477   : > { %v1687_v10 = vsel %vm490_vm8, %v1677_v58, %v2890_v14  ;;  %v1685_v9 = vsel %vm490_vm8, %v1671_v5, %v2889_v47  ;;  %1956 = vmatmul.mubr.f32.gmra.mrb[10].mxu0 %v1713_v4 }
 0x478   : > { %v1669_v1 = vpop.permute.xlu1 %1668  ;;  %1961 = vmatprep.mubr.f32.mxu0 %v1717_v60  ;;  %v2604_v54 = vpack.c.bf16 %v1687_v10, %v1685_v9 }
 0x479   : > { %v1684_v39 = vsel %vm490_vm8, %v1669_v1, %v1671_v5 }
 0x47a   : > { %2605 = vmatprep.subr.bf16.mxu0 %v2604_v54  ;;  %v2606_v19 = vpack.c.bf16 %v1686_v29, %v1684_v39 }
 0x47b   : > { %1962 = vmatmul.mubr.f32.gmra.mrb[12].mxu0 %v1716_v32 }
 0x47c   : > { %2607 = vmatpush1.bf16.msra.mxu0 %v2606_v19  ;;  %1967 = vmatprep.mubr.f32.mxu0 %v1720_v41 }
 0x47f   : > { %1968 = vmatmul.mubr.f32.gmra.mrb[14].mxu0 %v1719_v28 }
 0x480   : > { %1973 = vmatprep.mubr.f32.mxu0 %v1723_v62 }
 0x483   : > { %1974 = vmatmul.mubr.f32.gmra.mrb[16].mxu0 %v1722_v42 }
 0x484   : > { %1979 = vmatprep.mubr.f32.mxu0 %v1726_v18 }
 0x485   : > { %v1816_v59 = vpop.permute.xlu0 %1815 }
 0x487   : > { %1980 = vmatmul.mubr.f32.gmra.mrb[18].mxu0 %v1725_v13 }
 0x488   : > { %2050 = vmatprep.mubr.f32.mxu0 %v3053_v7 }
 0x489   : > { %v1811_v53 = vpop.permute.xlu1 %1810  ;;  %v1826_v49 = vpop.permute.xlu0 %1825 }
 0x48b   : > { %2469 = vmatmul.mubr.msk.f32.vlgmr.msra.gmra.mrb[4].mxu0 %vm1848_vm15, %v1706_v3 }
 0x48c   : > { %2056 = vmatprep.mubr.f32.mxu0 %v3053_v7 }
 0x48d   : > { %v1821_v30 = vpop.permute.xlu1 %1820  ;;  %v1836_v60 = vpop.permute.xlu0 %1835 }
 0x48f   : > { %2470 = vmatmul.mubr.msk.f32.gmra.mrb[6].mxu0 %vm1848_vm15, %v1709_v46 }
 0x490   : > { %2062 = vmatprep.mubr.f32.mxu0 %v3053_v7 }
 0x491   : > { %v1831_v61 = vpop.permute.xlu1 %1830  ;;  %v1846_v3 = vpop.permute.xlu0 %1845 }
 0x493   : > { %2471 = vmatmul.mubr.msk.f32.gmra.mrb[8].mxu0 %vm1848_vm15, %v1712_v51 }
 0x494   : > { %2068 = vmatprep.mubr.f32.mxu0 %v3053_v7 }
 0x495   : > { %v1841_v41 = vpop.permute.xlu1 %1840 }
 0x497   : > { %2472 = vmatmul.mubr.msk.f32.gmra.mrb[10].mxu0 %vm1848_vm15, %v1715_v8 }
 0x498   : > { %2074 = vmatprep.mubr.f32.mxu0 %v3053_v7 }
 0x49b   : > { %2473 = vmatmul.mubr.msk.f32.gmra.mrb[12].mxu0 %vm1848_vm15, %v1718_v57 }
 0x49c   : > { %2080 = vmatprep.mubr.f32.mxu0 %v3053_v7 }
 0x49f   : > { %2474 = vmatmul.mubr.msk.f32.gmra.mrb[14].mxu0 %vm1848_vm15, %v1721_v20 }
 0x4a0   : > { %2086 = vmatprep.mubr.f32.mxu0 %v3053_v7 }
 0x4a3   : > { %2475 = vmatmul.mubr.msk.f32.gmra.mrb[16].mxu0 %vm1848_vm15, %v1724_v26 }
 0x4a4   : > { %2092 = vmatprep.mubr.f32.mxu0 %v3053_v7  ;;  %v2178_v7 = vld [vmem:[%s4228_s8 + $0x1f8] sm:$0xff] }
 0x4a5   : > { %v2668_v17 = vpack.c.bf16 %v2178_v7, %v2176_v55 }
 0x4a7   : > { %2476 = vmatmul.mubr.msk.f32.gmra.mrb[18].mxu0 %vm1848_vm15, %v1727_v31  ;;  %2669 = vmatprep.subr.bf16.mxu1 %v2668_v17 }
 0x4a8   : > { %2671 = vmatpush1.bf16.msra.mxu1 %v2670_v35 }
 0x55e   : > { %v2052_v50 = vpop.f32.mrb[4].mxu0 }
 0x55f   : > { %v2672_v25 = vadd.f32 %v2052_v50, %v1811_v53  ;;  %v2054_v16 = vpop.f32.mrb[5].mxu0 }
 0x560   : > { %v2673_v40 = vadd.f32 %v2054_v16, %v1811_v53 }
 0x561   : > { %v2099_v48 = vmax.f32 %v2672_v25, 0.0 }
 0x562   : > { %v2100_v6 = vmax.f32 %v2673_v40, 0.0  ;;  %v2058_v38 = vpop.f32.mrb[6].mxu0 }
 0x563   : > { %v2674_v21 = vadd.f32 %v2058_v38, %v1816_v59  ;;  %v2060_v45 = vpop.f32.mrb[7].mxu0 }
 0x564   : > { %v2675_v0 = vadd.f32 %v2060_v45, %v1816_v59  ;;  %2243 = vmatprep.mubr.f32.mxu1 %v2100_v6 }
 0x565   : > { %2244 = vmatmul.mubr.f32.vlgmr.msra.gmra.mrb[8].mxu1 %v2099_v48  ;;  %v2101_v5 = vmax.f32 %v2674_v21, 0.0 }
 0x566   : > { %v2102_v43 = vmax.f32 %v2675_v0, 0.0  ;;  %v2064_v2 = vpop.f32.mrb[8].mxu0 }
 0x567   : > { %v2676_v11 = vadd.f32 %v2064_v2, %v1821_v30  ;;  %v2066_v33 = vpop.f32.mrb[9].mxu0 }
 0x568   : > { %v2677_v15 = vadd.f32 %v2066_v33, %v1821_v30  ;;  %2249 = vmatprep.mubr.f32.mxu1 %v2102_v43 }
 0x569   : > { %2250 = vmatmul.mubr.f32.gmra.mrb[10].mxu1 %v2101_v5  ;;  %v2103_v63 = vmax.f32 %v2676_v11, 0.0 }
 0x56a   : > { %v2104_v36 = vmax.f32 %v2677_v15, 0.0  ;;  %v2070_v58 = vpop.f32.mrb[10].mxu0 }
 0x56b   : > { %v2678_v44 = vadd.f32 %v2070_v58, %v1826_v49  ;;  %v2072_v12 = vpop.f32.mrb[11].mxu0 }
 0x56c   : > { %v2679_v52 = vadd.f32 %v2072_v12, %v1826_v49  ;;  %2255 = vmatprep.mubr.f32.mxu1 %v2104_v36 }
 0x56d   : > { %2256 = vmatmul.mubr.f32.gmra.mrb[12].mxu1 %v2103_v63  ;;  %v2105_v4 = vmax.f32 %v2678_v44, 0.0 }
 0x56e   : > { %v2106_v22 = vmax.f32 %v2679_v52, 0.0  ;;  %v2076_v24 = vpop.f32.mrb[12].mxu0 }
 0x56f   : > { %v2680_v29 = vadd.f32 %v2076_v24, %v1831_v61  ;;  %v2078_v14 = vpop.f32.mrb[13].mxu0 }
 0x570   : > { %v2681_v47 = vadd.f32 %v2078_v14, %v1831_v61  ;;  %2261 = vmatprep.mubr.f32.mxu1 %v2106_v22 }
 0x571   : > { %2262 = vmatmul.mubr.f32.gmra.mrb[14].mxu1 %v2105_v4  ;;  %v2107_v1 = vmax.f32 %v2680_v29, 0.0 }
 0x572   : > { %v2108_v10 = vmax.f32 %v2681_v47, 0.0  ;;  %v2082_v9 = vpop.f32.mrb[14].mxu0 }
 0x573   : > { %v2682_v54 = vadd.f32 %v2082_v9, %v1836_v60  ;;  %v2084_v32 = vpop.f32.mrb[15].mxu0 }
 0x574   : > { %v2683_v39 = vadd.f32 %v2084_v32, %v1836_v60  ;;  %2267 = vmatprep.mubr.f32.mxu1 %v2108_v10 }
 0x575   : > { %2268 = vmatmul.mubr.f32.gmra.mrb[16].mxu1 %v2107_v1  ;;  %v2109_v62 = vmax.f32 %v2682_v54, 0.0 }
 0x576   : > { %v2110_v19 = vmax.f32 %v2683_v39, 0.0  ;;  %v2088_v28 = vpop.f32.mrb[16].mxu0 }
 0x577   : > { %v2684_v42 = vadd.f32 %v2088_v28, %v1841_v41  ;;  %v2090_v18 = vpop.f32.mrb[17].mxu0 }
 0x578   : > { %v2685_v13 = vadd.f32 %v2090_v18, %v1841_v41  ;;  %2273 = vmatprep.mubr.f32.mxu1 %v2110_v19 }
 0x579   : > { %2274 = vmatmul.mubr.f32.gmra.mrb[18].mxu1 %v2109_v62  ;;  %v2111_v8 = vmax.f32 %v2684_v42, 0.0 }
 0x57a   : > { %v2112_v46 = vmax.f32 %v2685_v13, 0.0  ;;  %v2094_v51 = vpop.f32.mrb[18].mxu0 }
 0x57b   : > { %v2686_v57 = vadd.f32 %v2094_v51, %v1846_v3  ;;  %v2096_v20 = vpop.f32.mrb[19].mxu0 }
 0x57c   : > { %v2687_v26 = vadd.f32 %v2096_v20, %v1846_v3  ;;  %2279 = vmatprep.mubr.f32.mxu1 %v2112_v46 }
 0x57d   : > { %2280 = vmatmul.mubr.f32.gmra.mrb[20].mxu1 %v2111_v8  ;;  %v2113_v34 = vmax.f32 %v2686_v57, 0.0 }
 0x57e   : > { %v2114_v31 = vmax.f32 %v2687_v26, 0.0 }
 0x580   : > { %2285 = vmatprep.mubr.f32.mxu1 %v2114_v31 }
 0x581   : > { %2286 = vmatmul.mubr.f32.gmra.mrb[22].mxu1 %v2113_v34 }
 0x638   : > { %v2245_v37 = vpop.f32.mrb[8].mxu1 }
 0x639   : > { %v2247_v56 = vpop.f32.mrb[9].mxu1 }
 0x63a   : > { %v2488_v7 = vpack.c.bf16 %v2247_v56, %v2245_v37 }
 0x63c   : > { %2343 = vst.msk [vmem:[%s4187_s13] sm:$0xff] %vm4189_vm2, %v2488_v7  ;;  %v2251_v17 = vpop.f32.mrb[10].mxu1 }
 0x63d   : > { %v2253_v27 = vpop.f32.mrb[11].mxu1 }
 0x63e   : > { %v2489_v23 = vpack.c.bf16 %v2253_v27, %v2251_v17 }
 0x640   : > { %2344 = vst.msk [vmem:[%s4187_s13 + $0x8] sm:$0xff] %vm4189_vm2, %v2489_v23  ;;  %v2257_v35 = vpop.f32.mrb[12].mxu1 }
 0x641   : > { %v2259_v53 = vpop.f32.mrb[13].mxu1 }
 0x642   : > { %v2490_v50 = vpack.c.bf16 %v2259_v53, %v2257_v35 }
 0x644   : > { %2345 = vst.msk [vmem:[%s4187_s13 + $0x10] sm:$0xff] %vm4189_vm2, %v2490_v50  ;;  %v2263_v25 = vpop.f32.mrb[14].mxu1 }
 0x645   : > { %v2265_v16 = vpop.f32.mrb[15].mxu1 }
 0x646   : > { %v2491_v40 = vpack.c.bf16 %v2265_v16, %v2263_v25 }
 0x648   : > { %2346 = vst.msk [vmem:[%s4187_s13 + $0x18] sm:$0xff] %vm4189_vm2, %v2491_v40  ;;  %v2269_v59 = vpop.f32.mrb[16].mxu1 }
 0x649   : > { %v2271_v6 = vpop.f32.mrb[17].mxu1 }
 0x64a   : > { %v2492_v38 = vpack.c.bf16 %v2271_v6, %v2269_v59 }
 0x64c   : > { %2347 = vst.msk [vmem:[%s4187_s13 + $0x20] sm:$0xff] %vm4189_vm2, %v2492_v38  ;;  %v2275_v48 = vpop.f32.mrb[18].mxu1 }
 0x64d   : > { %v2277_v21 = vpop.f32.mrb[19].mxu1 }
 0x64e   : > { %v2493_v45 = vpack.c.bf16 %v2277_v21, %v2275_v48 }
 0x650   : > { %2348 = vst.msk [vmem:[%s4187_s13 + $0x28] sm:$0xff] %vm4189_vm2, %v2493_v45  ;;  %v2281_v0 = vpop.f32.mrb[20].mxu1 }
 0x651   : > { %v2283_v30 = vpop.f32.mrb[21].mxu1 }
 0x652   : > { %v2494_v43 = vpack.c.bf16 %v2283_v30, %v2281_v0 }
 0x654   : > { %2349 = vst.msk [vmem:[%s4187_s13 + $0x30] sm:$0xff] %vm4189_vm2, %v2494_v43  ;;  %v2287_v2 = vpop.f32.mrb[22].mxu1 }
 0x655   : > { %v2289_v5 = vpop.f32.mrb[23].mxu1 }
 0x656   : > { %v2495_v11 = vpack.c.bf16 %v2289_v5, %v2287_v2 }
 0x658   : > { %2350 = vst.msk [vmem:[%s4187_s13 + $0x38] sm:$0xff] %vm4189_vm2, %v2495_v11 }
 0x659 PF: > { %s22_s30 = sadd.s32 1, %s3039_s30  }
 0x65a   : > { %p19_p1 = scmp.ge.s32.totalorder %s22_s30, 4  }
 0x65c   :  { %21 = sbr.rel (!%p19_p1) target bundleno = 3 (0x3), region = 111 }
 0x663   :  { %2372 = vsyncpa [#allocation6], 1 }
 0x664   :  { %2374 = vsyncpa [#allocation6 + $0x1], 1 }
 0x665   :  { %2375 = vsyncpa [#allocation8], 1 }
 0x666   :  { %2376 = vsyncpa [#allocation11], 1 }

// kernel: conv_dqn_forward.3
= control target key start
LH: loop header
LB: loop body
LE: loop exit
PB: predicated region body
PF: predicated region fallthrough
CT: control target
= control target key end

     0   :  { %10 = vsyncpa [#allocation4], 0  ;;  %s4400_s0 = inlined_call_operand.vmem [shape: bf16[2,10880], index: 0, kind: input, shape index: {}]   ;;  %s4401_s1 = inlined_call_operand.hbm [shape: bf16[10880,256], index: 1, kind: input, shape index: {}]   ;;  %s4402_s2 = inlined_call_operand.hbm [shape: f32[1,256], index: 2, kind: input, shape index: {}]   ;;  %s4403_s3 = inlined_call_operand.vmem [shape: f32[256,6], index: 3, kind: input, shape index: {}]   ;;  %s4404_s4 = inlined_call_operand.hbm [shape: f32[1,6], index: 4, kind: input, shape index: {}]   ;;  %s4405_s5 = inlined_call_operand.hbm [shape: f32[2,6], index: 5, kind: output, shape index: {}]  }
   0x1   :  { %12 = vsyncpa [#allocation4 + $0x1], 0 }
   0x2   :  { %13 = vsyncpa [#allocation7], 0 }
   0x3   :  { %14 = vsyncpa [#allocation5], 0  ;;  %s3737_s18 = smov 0   ;;  %s3739_s19 = smov 0  }
   0x4   :  { %s3741_s20 = smov 0   ;;  %s3743_s21 = smov 0  }
   0x5 LB: > { %s3756_s22 = sadd.s32 4294967295, %s3695_s21   ;;  %s3759_s23 = sadd.s32 1, %s3695_s21   ;;  %s3695_s21 = sphi %s3743_s21, %s4424_s21   ;;  %s3691_s20 = sphi %s3741_s20, %s4423_s20   ;;  %s3687_s19 = sphi %s3739_s19, %s4422_s19   ;;  %s3683_s18 = sphi %s3737_s18, %s4421_s18  }
   0x6   : > { %s50_s24 = ssub.s32 %s3695_s21, %s3759_s23  ;;  %s53_s25 = sadd.s32 1, %s3691_s20 }
   0x7   : > { %p51_p0 = scmp.eq.s32.totalorder %s50_s24, 0  ;;  %p60_p1 = scmp.ne.s32.totalorder %s3691_s20, %s3687_s19 }
   0x8   : > { %p61_p2 = scmp.eq.s32.totalorder %s3695_s21, 0  ;;  %p66_p3 = scmp.ne.s32.totalorder %s3687_s19, %s3683_s18 }
   0x9   : > { %s3769_s26 = scalar_select %p51_p0, %s3691_s20, %s53_s25  }
   0xa   : > { %p3771_p4 = por %p61_p2, %p60_p1  ;;  %p4406_p5 = scmp.eq.s32.totalorder %s3756_s22, 0 }
   0xb   : > { %p2667_p6 = scmp.ge.s32.totalorder %s3695_s21, 1  ;;  %p161_p7 = scmp.lt.s32.totalorder %s3695_s21, 6 }
   0xc   : > { %p3780_p8 = por %p4406_p5, %p66_p3  ;;  %s3697_s30 = smov [#allocation6]  }
   0xd   : > { %p3785_p10 = pnand %p2667_p6, %p161_p7  ;;  %s174_s6 = sshll.u32 %s3697_s30, 4  ;;  %s175_s6 = int_to_ptr.vmem [resolvable:$true] %s174_s6 }
   0xe   : > { %s4411_s28 = scalar_select %p3780_p8, 1, 0 }
   0xf   : > { %s4412_s29 = scalar_select %p3785_p10, 1, 0 }
  0x10   : > { %p3072_p11 = pneg %p3785_p10  ;;  %p3085_p12 = scmp.lt.s32.totalorder %s3695_s21, 5 }
  0x11   : > { %s3698_s8 = smov [#allocation8]   ;;  %s207_s11 = sand.u32 1, %s3691_s20  }
  0x12   : > { %p3794_p13 = pnand %p3072_p11, %p4406_p5  ;;  %s188_s9 = sshll.u32 %s3698_s8, 4  ;;  %s3804_s9 = int_to_ptr.vmem [resolvable:$true] %s188_s9 }
  0x13   : > { %p3800_p0 = pnand %p3085_p12, %p3771_p4  ;;  %s3541_s14 = scalar_lea.hbm %s4402_s2, 32 }
  0x14   : > { %p3542_p1 = scmp.ne.s32.totalorder %s4402_s2, %s3541_s14  ;;  %p3543_p2 = pneg %p3794_p13 }
  0x15   : > { %s4414_s10 = scalar_select %p3800_p0, 1, 0 }
  0x16   : > { %p3544_p3 = pnand %p3543_p2, %p3542_p1  ;;  %p3548_p6 = scmp.lt.u32.totalorder %s3541_s14, %s4402_s2 }
  0x18   : > { %p3545_p4 = pneg %p3544_p3 }
  0x1a   : > { %p3550_p7 = pnand %p3548_p6, %p3545_p4 }
  0x1c   : > { %3553 = shalt.err (!%p3550_p7)
}
  0x1d   : > { %s3554_s24 = scalar_lea.vmem %s175_s6, 32  ;;  %p3562_p5 = scmp.lt.s32.totalorder %s175_s6, %s175_s6 }
  0x1e   : > { %p3555_p11 = scmp.ne.s32.totalorder %s175_s6, %s3554_s24  ;;  %p3563_p8 = scmp.lt.s32.totalorder %s3554_s24, %s3554_s24 }
  0x20   : > { %p3557_p12 = pnand %p3555_p11, %p3543_p2  ;;  %p3564_p10 = por %p3563_p8, %p3562_p5 }
  0x22   : > { %p3558_p9 = pneg %p3557_p12 }
  0x24   : > { %p3565_p0 = pnand %p3564_p10, %p3558_p9 }
  0x26   : > { %3568 = shalt.err (!%p3565_p0)
}
  0x27   : > { %3075 = dma.hbm_to_vmem [thread:$0]  (!%p3794_p13), %s4402_s2, 32, %s175_s6, [#allocation7]  }
  0x28   : > { %s3569_s12 = scalar_lea.hbm %s4404_s4, 16 }
  0x29   : > { %p3570_p1 = scmp.ne.s32.totalorder %s4404_s4, %s3569_s12  ;;  %p3576_p9 = scmp.lt.u32.totalorder %s3569_s12, %s4404_s4 }
  0x2b   : > { %p3572_p5 = pnand %p3570_p1, %p3543_p2 }
  0x2d   : > { %p3573_p8 = pneg %p3572_p5 }
  0x2f   : > { %p3578_p10 = pnand %p3576_p9, %p3573_p8 }
  0x31   : > { %3581 = shalt.err (!%p3578_p10)
}
  0x32   : > { %s3582_s6 = scalar_lea.vmem %s3804_s9, 16  ;;  %s3589_s17 = scalar_lea.vmem %s3804_s9, 32 }
  0x33   : > { %p3583_p0 = scmp.ne.s32.totalorder %s3804_s9, %s3582_s6  ;;  %p3590_p6 = scmp.lt.s32.totalorder %s3804_s9, %s3804_s9 }
  0x34   : > { %p3591_p7 = scmp.lt.s32.totalorder %s3589_s17, %s3582_s6 }
  0x35   : > { %p3585_p3 = pnand %p3583_p0, %p3543_p2 }
  0x36   : > { %p3592_p11 = por %p3591_p7, %p3590_p6 }
  0x37   : > { %p3586_p4 = pneg %p3585_p3 }
  0x39   : > { %p3593_p12 = pnand %p3592_p11, %p3586_p4 }
  0x3b   : > { %3596 = shalt.err (!%p3593_p12)
}
  0x3c   : > { %3078 = dma.hbm_to_vmem [thread:$0]  (!%p3794_p13), %s4404_s4, 16, %s3804_s9, [#allocation7]  }
  0x3d   : > { %s3056_s25 = smul.u32 2176, %s207_s11  ;;  %s3867_s14 = scalar_lea.sflag [#allocation4], %s207_s11 }
  0x3e   : > { %s2958_s27 = smul.u32 34816, %s3695_s21  ;;  %p4415_p2 = scmp.ne.s32.totalorder %s4414_s10, 0 }
  0x3f   : > { %s211_s7 = scalar_lea.vmem [#allocation3], %s3056_s25  ;;  %s3602_s16 = scalar_lea.hbm %s4401_s1, 174080 }
  0x40   : > { %s3861_s12 = scalar_lea.hbm %s4401_s1, %s2958_s27  ;;  %s219_s13 = sshll.u32 %s211_s7, 4  ;;  %s3863_s13 = int_to_ptr.vmem [resolvable:$true] %s219_s13 }
  0x41   : > { %s3597_s9 = scalar_lea.hbm %s3861_s12, 34816  ;;  %p3599_p1 = pneg %p4415_p2 }
  0x42   : > { %p3598_p13 = scmp.ne.s32.totalorder %s3861_s12, %s3597_s9  ;;  %p3603_p9 = scmp.lt.u32.totalorder %s3861_s12, %s4401_s1 }
  0x43   : > { %p3604_p10 = scmp.lt.u32.totalorder %s3602_s16, %s3597_s9  ;;  %p3606_p3 = scmp.lt.u32.totalorder %s3597_s9, %s3861_s12 }
  0x44   : > { %p3600_p5 = pnand %p3599_p1, %p3598_p13 }
  0x45   : > { %p3605_p0 = por %p3604_p10, %p3603_p9 }
  0x46   : > { %p3601_p8 = pneg %p3600_p5 }
  0x47   : > { %p3607_p4 = por %p3606_p3, %p3605_p0 }
  0x49   : > { %p3608_p6 = pnand %p3607_p4, %p3601_p8 }
  0x4b   : > { %3611 = shalt.err (!%p3608_p6)
}
  0x4c   : > { %s3612_s11 = scalar_lea.vmem %s3863_s13, 34816  ;;  %s3699_s18 = smov [#allocation3]  }
  0x4d   : > { %p3613_p7 = scmp.ne.s32.totalorder %s3863_s13, %s3612_s11  ;;  %s3617_s24 = sshll.u32 %s3699_s18, 4  ;;  %s3618_s24 = int_to_ptr.vmem [resolvable:$false] %s3617_s24 }
  0x4e   : > { %s3619_s25 = scalar_lea.vmem %s3618_s24, 69632  ;;  %p3620_p13 = scmp.lt.s32.totalorder %s3863_s13, %s3618_s24 }
  0x4f   : > { %p3615_p11 = pnand %p3613_p7, %p3599_p1  ;;  %p3621_p5 = scmp.lt.s32.totalorder %s3619_s25, %s3612_s11 }
  0x51   : > { %p3616_p12 = pneg %p3615_p11  ;;  %p3622_p9 = por %p3621_p5, %p3620_p13 }
  0x53   : > { %p3623_p10 = pnand %p3622_p9, %p3616_p12 }
  0x55   : > { %3626 = shalt.err (!%p3623_p10)
}
  0x56   : > { %s3700_s27 = smov 128   ;;  %s3701_s30 = smov 8  }
  0x57   : > { %3082 = dma.hbm_to_vmem [thread:$0]  (!%p4415_p2), %s3861_s12, 34816, %s3863_s13, %s3867_s14, %s3700_s27, %s3700_s27, %s3701_s30  }
  0x58   : > { %p4416_p1 = scmp.ne.s32.totalorder %s4412_s29, 0 }
  0x59   : > { %s233_s8 = sand.u32 (!%p4416_p1), 1, %s3687_s19   ;;  %p4417_p8 = scmp.ne.s32.totalorder (!%p4416_p1), %s4411_s28, 0 }
  0x5a   : > { %231 = sbr.rel (%p4416_p1) target bundleno = 881 (0x371), region = 40  ;;  %s234_s9 = scalar_lea.sflag (!%p4416_p1), [#allocation4], %s233_s8 }
  0x5b   : > { %s3057_s7 = smul.u32 (!%p4416_p1), 2176, %s233_s8 }
  0x5d   : > { %s3898_s21 = scalar_lea.vmem (!%p4416_p1), [#allocation3], %s3057_s7 }
  0x61   : > { %3670 = dma.done.wait (%p4417_p8), %s234_s9, 34816  }
  0x62   : > { %3672 = vsyncadd (%p4417_p8), %s234_s9, 4294932480  ;;  %p4418_p0 = scmp.eq.s32.totalorder %s3756_s22, 0 }
  0x64   : > { %3674 = dma.done.wait (%p4418_p0), [#allocation7], 48   ;;  %p4419_p2 = pmov %p4418_p0 }
  0x65   : > { %s271_s29 = smul.u32 17, %s3756_s22  ;;  %p4420_p4 = scmp.ne.s32.totalorder %s3756_s22, 0 }
  0x66   : > { %3676 = vsyncadd (%p4419_p2), [#allocation7], 4294967248  ;;  %v3702_v0 = vmov (!%p4420_p4), 0.0  }
  0x67   : > { %p272_p3 = scmp.lt.s32.totalorder %s271_s29, 84  ;;  %281 = sbr.rel (%p4420_p4) target bundleno = 110 (0x6e), region = 56  ;;  %282 = vst [vmem:[#allocation2] sm:$0xf] (!%p4420_p4), %v3702_v0 }
  0x69   : > { %s4426_s29 = smov (!%p272_p3, %s271_s29), 84 }
  0x6a   : > { %s3912_s13 = scalar_lea.vmem %s4400_s0, %s4426_s29 }
  0x6e PF: > { %v3131_v1 = vld [vmem:[%s3898_s21 + $0x4] ss:$8 sps:$4 sm:$0xff]   ;;  %v3135_v3 = vld [vmem:[%s3898_s21] ss:$8 sps:$4 sm:$0xff]   ;;  %v3137_v5 = vld [vmem:[%s3898_s21 + $0x14] ss:$8 sps:$4 sm:$0xff]   ;;  %v566_v39 = vlaneseq }
  0x6f   : > { %v3133_v2 = vld [vmem:[%s3898_s21 + $0x404] ss:$8 sps:$4 sm:$0xff]   ;;  %2051 = vmatprep.subr.bf16.mxu1 %v3131_v1  ;;  %v3136_v4 = vld [vmem:[%s3898_s21 + $0x400] ss:$8 sps:$4 sm:$0xff]   ;;  %v3139_v6 = vld [vmem:[%s3898_s21 + $0x414] ss:$8 sps:$4 sm:$0xff]  }
  0x70   : > { %2215 = vmatprep.subr.bf16.mxu0 %v3133_v2  ;;  %2052 = vmatpush1.bf16.msra.mxu1 %v3135_v3  ;;  %v3141_v7 = vld [vmem:[%s3898_s21 + $0x10] ss:$8 sps:$4 sm:$0xff]   ;;  %v3143_v9 = vld [vmem:[%s3898_s21 + $0x24] ss:$8 sps:$4 sm:$0xff]   ;;  %v3147_v11 = vld [vmem:[%s3898_s21 + $0x20] ss:$8 sps:$4 sm:$0xff]  }
  0x71   : > { %2216 = vmatpush1.bf16.msra.mxu0 %v3136_v4  ;;  %2053 = vmatprep.subr.bf16.mxu1 %v3137_v5  ;;  %v3142_v8 = vld [vmem:[%s3898_s21 + $0x410] ss:$8 sps:$4 sm:$0xff]   ;;  %v3145_v10 = vld [vmem:[%s3898_s21 + $0x424] ss:$8 sps:$4 sm:$0xff]   ;;  %v3148_v12 = vld [vmem:[%s3898_s21 + $0x420] ss:$8 sps:$4 sm:$0xff]  }
  0x72   : > { %2217 = vmatprep.subr.bf16.mxu0 %v3139_v6  ;;  %v3149_v13 = vld [vmem:[%s3898_s21 + $0x34] ss:$8 sps:$4 sm:$0xff]   ;;  %v3153_v15 = vld [vmem:[%s3898_s21 + $0x30] ss:$8 sps:$4 sm:$0xff]   ;;  %v3155_v17 = vld [vmem:[%s3898_s21 + $0x44] ss:$8 sps:$4 sm:$0xff]  }
  0x73   : > { %v3151_v14 = vld [vmem:[%s3898_s21 + $0x434] ss:$8 sps:$4 sm:$0xff]   ;;  %v3154_v16 = vld [vmem:[%s3898_s21 + $0x430] ss:$8 sps:$4 sm:$0xff]   ;;  %v3157_v18 = vld [vmem:[%s3898_s21 + $0x444] ss:$8 sps:$4 sm:$0xff]  }
  0x74   : > { %2054 = vmatpush1.bf16.msra.mxu1 %v3141_v7  ;;  %v3159_v19 = vld [vmem:[%s3898_s21 + $0x40] ss:$8 sps:$4 sm:$0xff]   ;;  %v3161_v21 = vld [vmem:[%s3898_s21 + $0x54] ss:$8 sps:$4 sm:$0xff]   ;;  %v3165_v23 = vld [vmem:[%s3898_s21 + $0x50] ss:$8 sps:$4 sm:$0xff]  }
  0x75   : > { %2218 = vmatpush1.bf16.msra.mxu0 %v3142_v8  ;;  %2055 = vmatprep.subr.bf16.mxu1 %v3143_v9  ;;  %v3160_v20 = vld [vmem:[%s3898_s21 + $0x440] ss:$8 sps:$4 sm:$0xff]   ;;  %v3163_v22 = vld [vmem:[%s3898_s21 + $0x454] ss:$8 sps:$4 sm:$0xff]   ;;  %v3166_v24 = vld [vmem:[%s3898_s21 + $0x450] ss:$8 sps:$4 sm:$0xff]  }
  0x76   : > { %2219 = vmatprep.subr.bf16.mxu0 %v3145_v10  ;;  %v3167_v25 = vld [vmem:[%s3898_s21 + $0x64] ss:$8 sps:$4 sm:$0xff]   ;;  %v3171_v27 = vld [vmem:[%s3898_s21 + $0x60] ss:$8 sps:$4 sm:$0xff]   ;;  %v3173_v29 = vld [vmem:[%s3898_s21 + $0x74] ss:$8 sps:$4 sm:$0xff]  }
  0x77   : > { %v3169_v26 = vld [vmem:[%s3898_s21 + $0x464] ss:$8 sps:$4 sm:$0xff]   ;;  %v3172_v28 = vld [vmem:[%s3898_s21 + $0x460] ss:$8 sps:$4 sm:$0xff]   ;;  %v3175_v30 = vld [vmem:[%s3898_s21 + $0x474] ss:$8 sps:$4 sm:$0xff]  }
  0x78   : > { %2056 = vmatpush1.bf16.msra.mxu1 %v3147_v11  ;;  %v3177_v31 = vld [vmem:[%s3898_s21 + $0x70] ss:$8 sps:$4 sm:$0xff]   ;;  %v3179_v33 = vld [vmem:[%s3898_s21 + $0x84] ss:$8 sps:$4 sm:$0xff]   ;;  %v3183_v35 = vld [vmem:[%s3898_s21 + $0x80] ss:$8 sps:$4 sm:$0xff]  }
  0x79   : > { %2220 = vmatpush1.bf16.msra.mxu0 %v3148_v12  ;;  %2057 = vmatprep.subr.bf16.mxu1 %v3149_v13  ;;  %v3178_v32 = vld [vmem:[%s3898_s21 + $0x470] ss:$8 sps:$4 sm:$0xff]   ;;  %v3181_v34 = vld [vmem:[%s3898_s21 + $0x484] ss:$8 sps:$4 sm:$0xff]   ;;  %v3184_v36 = vld [vmem:[%s3898_s21 + $0x480] ss:$8 sps:$4 sm:$0xff]  }
  0x7a   : > { %2221 = vmatprep.subr.bf16.mxu0 %v3151_v14  ;;  %v3703_v37 = vmov 1966171168   ;;  %v3185_v40 = vld [vmem:[%s3898_s21 + $0x94] ss:$8 sps:$4 sm:$0xff]   ;;  %v3189_v42 = vld [vmem:[%s3898_s21 + $0x90] ss:$8 sps:$4 sm:$0xff]  }
  0x7b   : > { %v564_v38 = vunpack.c.l.s4 %v3703_v37  ;;  %v3187_v41 = vld [vmem:[%s3898_s21 + $0x494] ss:$8 sps:$4 sm:$0xff]   ;;  %v3955_v44 = vshrl.u32 %v566_v39, 7  ;;  %v3190_v45 = vld [vmem:[%s3898_s21 + $0x490] ss:$8 sps:$4 sm:$0xff]   ;;  %v3975_v57 = vld [vmem:[%s3912_s13 + $0x8] sm:$0xff] }
  0x7c   : > { %2058 = vmatpush1.bf16.msra.mxu1 %v3153_v15  ;;  %v3191_v46 = vld [vmem:[%s3898_s21 + $0xa4] ss:$8 sps:$4 sm:$0xff]   ;;  %v3195_v48 = vld [vmem:[%s3898_s21 + $0xa0] ss:$8 sps:$4 sm:$0xff]   ;;  %v3197_v51 = vld [vmem:[%s3898_s21 + $0xb4] ss:$8 sps:$4 sm:$0xff]  }
  0x7d   : > { %2222 = vmatpush1.bf16.msra.mxu0 %v3154_v16  ;;  %2059 = vmatprep.subr.bf16.mxu1 %v3155_v17  ;;  %v565_v43 = vunpack.c.0.s8 %v564_v38  ;;  %v3193_v47 = vld [vmem:[%s3898_s21 + $0x4a4] ss:$8 sps:$4 sm:$0xff]   ;;  %v3196_v49 = vld [vmem:[%s3898_s21 + $0x4a0] ss:$8 sps:$4 sm:$0xff]   ;;  %v3199_v52 = vld [vmem:[%s3898_s21 + $0x4b4] ss:$8 sps:$4 sm:$0xff]  }
  0x7e   : > { %2223 = vmatprep.subr.bf16.mxu0 %v3157_v18  ;;  %v3968_v53 = vld [vmem:[%s3912_s13] sm:$0xff]  ;;  %v3201_v54 = vld [vmem:[%s3898_s21 + $0xb0] ss:$8 sps:$4 sm:$0xff]   ;;  %v3203_v58 = vld [vmem:[%s3898_s21 + $0xc4] ss:$8 sps:$4 sm:$0xff]   ;;  %p2950_p6 = scmp.ne.s32.totalorder %s3756_s22, 4 }
  0x7f   : > { %v3963_v50 = vsub.s32 %v565_v43, %v3955_v44  ;;  %v3202_v56 = vld [vmem:[%s3898_s21 + $0x4b0] ss:$8 sps:$4 sm:$0xff]   ;;  %v3205_v59 = vld [vmem:[%s3898_s21 + $0x4c4] ss:$8 sps:$4 sm:$0xff]   ;;  %v3207_v0 = vld [vmem:[%s3898_s21 + $0xc0] ss:$8 sps:$4 sm:$0xff]  }
  0x80   : > { %2060 = vmatpush1.bf16.msra.mxu1 %v3159_v19  ;;  %v3208_v1 = vld [vmem:[%s3898_s21 + $0x4c0] ss:$8 sps:$4 sm:$0xff]   ;;  %v3209_v2 = vld [vmem:[%s3898_s21 + $0xd4] ss:$8 sps:$4 sm:$0xff]   ;;  %v3213_v5 = vld [vmem:[%s3898_s21 + $0xd0] ss:$8 sps:$4 sm:$0xff]  }
  0x81   : > { %2224 = vmatpush1.bf16.msra.mxu0 %v3160_v20  ;;  %2061 = vmatprep.subr.bf16.mxu1 %v3161_v21  ;;  %v569_v55 = vrot.slane %v3968_v53, %v3963_v50  ;;  %v618_v61 = vrot.slane %v3975_v57, %v3963_v50  ;;  %v3211_v3 = vld [vmem:[%s3898_s21 + $0x4d4] ss:$8 sps:$4 sm:$0xff]   ;;  %v3214_v6 = vld [vmem:[%s3898_s21 + $0x4d0] ss:$8 sps:$4 sm:$0xff]   ;;  %v3215_v7 = vld [vmem:[%s3898_s21 + $0xe4] ss:$8 sps:$4 sm:$0xff]  }
  0x82   : > { %2225 = vmatprep.subr.bf16.mxu0 %v3163_v22  ;;  %v3217_v8 = vld [vmem:[%s3898_s21 + $0x4e4] ss:$8 sps:$4 sm:$0xff]   ;;  %v3219_v9 = vld [vmem:[%s3898_s21 + $0xe0] ss:$8 sps:$4 sm:$0xff]   ;;  %v3221_v11 = vld [vmem:[%s3898_s21 + $0xf4] ss:$8 sps:$4 sm:$0xff]  }
  0x83   : > { %v577_v60 = vcombine.high %v569_v55, %v569_v55  ;;  %v626_v63 = vcombine.high %v618_v61, %v618_v61  ;;  %v3220_v10 = vld [vmem:[%s3898_s21 + $0x4e0] ss:$8 sps:$4 sm:$0xff]   ;;  %v3223_v12 = vld [vmem:[%s3898_s21 + $0x4f4] ss:$8 sps:$4 sm:$0xff]   ;;  %v3225_v13 = vld [vmem:[%s3898_s21 + $0xf0] ss:$8 sps:$4 sm:$0xff]   ;;  %v4000_v17 = vrot.slane %v569_v55, %v3963_v50  ;;  %v4003_v18 = vrot.slane %v618_v61, %v3963_v50 }
  0x84   : > { %2062 = vmatpush1.bf16.msra.mxu1 %v3165_v23  ;;  %v3226_v14 = vld [vmem:[%s3898_s21 + $0x4f0] ss:$8 sps:$4 sm:$0xff]   ;;  %v3230_v15 = vld [vmem:[%s3898_s21 + $0x104] ss:$8 sps:$4 sm:$0xff]   ;;  %v3228_v19 = vld [vmem:[%s3898_s21 + $0x100] ss:$8 sps:$4 sm:$0xff]  }
  0x85   : > { %2226 = vmatpush1.bf16.msra.mxu0 %v3166_v24  ;;  %2063 = vmatprep.subr.bf16.mxu1 %v3167_v25  ;;  %v599_v62 = vrot.slane %v577_v60, %v3963_v50  ;;  %v648_v4 = vrot.slane %v626_v63, %v3963_v50  ;;  %v3234_v16 = vld [vmem:[%s3898_s21 + $0x504] ss:$8 sps:$4 sm:$0xff]   ;;  %v3232_v20 = vld [vmem:[%s3898_s21 + $0x500] ss:$8 sps:$4 sm:$0xff]   ;;  %v3237_v21 = vld [vmem:[%s3898_s21 + $0x114] ss:$8 sps:$4 sm:$0xff]  }
  0x86   : > { %2227 = vmatprep.subr.bf16.mxu0 %v3169_v26  ;;  %v3240_v22 = vld [vmem:[%s3898_s21 + $0x514] ss:$8 sps:$4 sm:$0xff]   ;;  %v3235_v25 = vld [vmem:[%s3898_s21 + $0x110] ss:$8 sps:$4 sm:$0xff]   ;;  %v3253_v37 = vld [vmem:[%s3898_s21 + $0x140] ss:$8 sps:$4 sm:$0xff]  }
  0x87   : > { %2083 = vmatprep.mubr.bf16.mxu1 %v599_v62  ;;  %2247 = vmatprep.mubr.bf16.mxu0 %v648_v4  ;;  %v609_v23 = vcombine.high %v599_v62, %v599_v62  ;;  %v658_v24 = vcombine.high %v648_v4, %v648_v4  ;;  %v3238_v26 = vld [vmem:[%s3898_s21 + $0x510] ss:$8 sps:$4 sm:$0xff]   ;;  %v3256_v38 = vld [vmem:[%s3898_s21 + $0x540] ss:$8 sps:$4 sm:$0xff]   ;;  %v3261_v39 = vld [vmem:[%s3898_s21 + $0x154] ss:$8 sps:$4 sm:$0xff]  }
  0x88   : > { %2064 = vmatpush1.bf16.msra.mxu1 %v3171_v27  ;;  %v3243_v27 = vld [vmem:[%s3898_s21 + $0x124] ss:$8 sps:$4 sm:$0xff]   ;;  %v3288_v60 = vld [vmem:[%s3898_s21 + $0x594] ss:$8 sps:$4 sm:$0xff]   ;;  %v3283_v61 = vld [vmem:[%s3898_s21 + $0x190] ss:$8 sps:$4 sm:$0xff]  }
  0x89   : > { %2228 = vmatpush1.bf16.msra.mxu0 %v3172_v28  ;;  %2065 = vmatprep.subr.bf16.mxu1 %v3173_v29  ;;  %v3246_v28 = vld [vmem:[%s3898_s21 + $0x524] ss:$8 sps:$4 sm:$0xff]   ;;  %v3241_v29 = vld [vmem:[%s3898_s21 + $0x120] ss:$8 sps:$4 sm:$0xff]   ;;  %v3286_v62 = vld [vmem:[%s3898_s21 + $0x590] ss:$8 sps:$4 sm:$0xff]  }
  0x8a   : > { %2229 = vmatprep.subr.bf16.mxu0 %v3175_v30  ;;  %v3244_v30 = vld [vmem:[%s3898_s21 + $0x520] ss:$8 sps:$4 sm:$0xff]   ;;  %v3267_v43 = vld [vmem:[%s3898_s21 + $0x164] ss:$8 sps:$4 sm:$0xff]   ;;  %v3300_v4 = vld [vmem:[%s3898_s21 + $0x5b4] ss:$8 sps:$4 sm:$0xff]  }
  0x8b   : > { %v3282_v55 = vld [vmem:[%s3898_s21 + $0x584] ss:$8 sps:$4 sm:$0xff]   ;;  %vm2579_vm0 = vcmask (!%p2950_p6), 41984  }
  0x8c   : > { %2066 = vmatpush1.bf16.msra.mxu1 %v3177_v31  ;;  %v3249_v31 = vld [vmem:[%s3898_s21 + $0x134] ss:$8 sps:$4 sm:$0xff]   ;;  %v3291_v63 = vld [vmem:[%s3898_s21 + $0x1a4] ss:$8 sps:$4 sm:$0xff]  }
  0x8d   : > { %2230 = vmatpush1.bf16.msra.mxu0 %v3178_v32  ;;  %2067 = vmatprep.subr.bf16.mxu1 %v3179_v33  ;;  %v3252_v32 = vld [vmem:[%s3898_s21 + $0x534] ss:$8 sps:$4 sm:$0xff]   ;;  %v3247_v33 = vld [vmem:[%s3898_s21 + $0x130] ss:$8 sps:$4 sm:$0xff]  }
  0x8e   : > { %2231 = vmatprep.subr.bf16.mxu0 %v3181_v34  ;;  %v3250_v34 = vld [vmem:[%s3898_s21 + $0x530] ss:$8 sps:$4 sm:$0xff]  }
  0x90   : > { %2068 = vmatpush1.bf16.msra.mxu1 %v3183_v35  ;;  %v3255_v35 = vld [vmem:[%s3898_s21 + $0x144] ss:$8 sps:$4 sm:$0xff]  }
  0x91   : > { %2232 = vmatpush1.bf16.msra.mxu0 %v3184_v36  ;;  %2069 = vmatprep.subr.bf16.mxu1 %v3185_v40  ;;  %v3258_v36 = vld [vmem:[%s3898_s21 + $0x544] ss:$8 sps:$4 sm:$0xff]   ;;  %v3264_v40 = vld [vmem:[%s3898_s21 + $0x554] ss:$8 sps:$4 sm:$0xff]  }
  0x92   : > { %2233 = vmatprep.subr.bf16.mxu0 %v3187_v41  ;;  %v3259_v41 = vld [vmem:[%s3898_s21 + $0x150] ss:$8 sps:$4 sm:$0xff]  }
  0x94   : > { %2070 = vmatpush1.bf16.msra.mxu1 %v3189_v42  ;;  %v3262_v42 = vld [vmem:[%s3898_s21 + $0x550] ss:$8 sps:$4 sm:$0xff]  }
  0x95   : > { %2234 = vmatpush1.bf16.msra.mxu0 %v3190_v45  ;;  %2071 = vmatprep.subr.bf16.mxu1 %v3191_v46  ;;  %v3270_v45 = vld [vmem:[%s3898_s21 + $0x564] ss:$8 sps:$4 sm:$0xff]   ;;  %v3265_v46 = vld [vmem:[%s3898_s21 + $0x160] ss:$8 sps:$4 sm:$0xff]  }
  0x96   : > { %2235 = vmatprep.subr.bf16.mxu0 %v3193_v47  ;;  %v3268_v47 = vld [vmem:[%s3898_s21 + $0x560] ss:$8 sps:$4 sm:$0xff]  }
  0x98   : > { %2072 = vmatpush1.bf16.msra.mxu1 %v3195_v48  ;;  %v3273_v48 = vld [vmem:[%s3898_s21 + $0x174] ss:$8 sps:$4 sm:$0xff]  }
  0x99   : > { %2236 = vmatpush1.bf16.msra.mxu0 %v3196_v49  ;;  %2073 = vmatprep.subr.bf16.mxu1 %v3197_v51  ;;  %v3276_v49 = vld [vmem:[%s3898_s21 + $0x574] ss:$8 sps:$4 sm:$0xff]   ;;  %v3271_v51 = vld [vmem:[%s3898_s21 + $0x170] ss:$8 sps:$4 sm:$0xff]  }
  0x9a   : > { %2237 = vmatprep.subr.bf16.mxu0 %v3199_v52  ;;  %v3274_v52 = vld [vmem:[%s3898_s21 + $0x570] ss:$8 sps:$4 sm:$0xff]  }
  0x9c   : > { %2074 = vmatpush1.bf16.msra.mxu1 %v3201_v54  ;;  %v3279_v54 = vld [vmem:[%s3898_s21 + $0x184] ss:$8 sps:$4 sm:$0xff]  }
  0x9d   : > { %2238 = vmatpush1.bf16.msra.mxu0 %v3202_v56  ;;  %2075 = vmatprep.subr.bf16.mxu1 %v3203_v58  ;;  %v3277_v56 = vld [vmem:[%s3898_s21 + $0x180] ss:$8 sps:$4 sm:$0xff]  }
  0x9e   : > { %2239 = vmatprep.subr.bf16.mxu0 %v3205_v59  ;;  %v3280_v58 = vld [vmem:[%s3898_s21 + $0x580] ss:$8 sps:$4 sm:$0xff]   ;;  %v3285_v59 = vld [vmem:[%s3898_s21 + $0x194] ss:$8 sps:$4 sm:$0xff]  }
  0xa0   : > { %2076 = vmatpush1.bf16.msra.mxu1 %v3207_v0  ;;  %v3294_v0 = vld [vmem:[%s3898_s21 + $0x5a4] ss:$8 sps:$4 sm:$0xff]  }
  0xa1   : > { %2240 = vmatpush1.bf16.msra.mxu0 %v3208_v1  ;;  %2077 = vmatprep.subr.bf16.mxu1 %v3209_v2  ;;  %v3289_v1 = vld [vmem:[%s3898_s21 + $0x1a0] ss:$8 sps:$4 sm:$0xff]  }
  0xa2   : > { %2241 = vmatprep.subr.bf16.mxu0 %v3211_v3  ;;  %v3292_v2 = vld [vmem:[%s3898_s21 + $0x5a0] ss:$8 sps:$4 sm:$0xff]   ;;  %v3297_v3 = vld [vmem:[%s3898_s21 + $0x1b4] ss:$8 sps:$4 sm:$0xff]  }
  0xa4   : > { %2078 = vmatpush1.bf16.msra.mxu1 %v3213_v5  ;;  %v3295_v5 = vld [vmem:[%s3898_s21 + $0x1b0] ss:$8 sps:$4 sm:$0xff]  }
  0xa5   : > { %2242 = vmatpush1.bf16.msra.mxu0 %v3214_v6  ;;  %2079 = vmatprep.subr.bf16.mxu1 %v3215_v7  ;;  %v3298_v6 = vld [vmem:[%s3898_s21 + $0x5b0] ss:$8 sps:$4 sm:$0xff]   ;;  %v3303_v7 = vld [vmem:[%s3898_s21 + $0x1c4] ss:$8 sps:$4 sm:$0xff]  }
  0xa6   : > { %2243 = vmatprep.subr.bf16.mxu0 %v3217_v8  ;;  %v3306_v8 = vld [vmem:[%s3898_s21 + $0x5c4] ss:$8 sps:$4 sm:$0xff]  }
  0xa8   : > { %2080 = vmatpush1.bf16.msra.mxu1 %v3219_v9  ;;  %v3301_v9 = vld [vmem:[%s3898_s21 + $0x1c0] ss:$8 sps:$4 sm:$0xff]  }
  0xa9   : > { %2244 = vmatpush1.bf16.msra.mxu0 %v3220_v10  ;;  %2081 = vmatprep.subr.bf16.mxu1 %v3221_v11  ;;  %v3304_v10 = vld [vmem:[%s3898_s21 + $0x5c0] ss:$8 sps:$4 sm:$0xff]   ;;  %v3309_v11 = vld [vmem:[%s3898_s21 + $0x1d4] ss:$8 sps:$4 sm:$0xff]  }
  0xaa   : > { %2245 = vmatprep.subr.bf16.mxu0 %v3223_v12  ;;  %v3312_v12 = vld [vmem:[%s3898_s21 + $0x5d4] ss:$8 sps:$4 sm:$0xff]  }
  0xac   : > { %2082 = vmatpush1.bf16.msra.mxu1 %v3225_v13  ;;  %v3307_v13 = vld [vmem:[%s3898_s21 + $0x1d0] ss:$8 sps:$4 sm:$0xff]  }
  0xad   : > { %2246 = vmatpush1.bf16.msra.mxu0 %v3226_v14  ;;  %2092 = vmatprep.subr.bf16.mxu1 %v3230_v15  ;;  %v3310_v14 = vld [vmem:[%s3898_s21 + $0x5d0] ss:$8 sps:$4 sm:$0xff]   ;;  %v3315_v15 = vld [vmem:[%s3898_s21 + $0x1e4] ss:$8 sps:$4 sm:$0xff]  }
  0xae   : > { %2256 = vmatprep.subr.bf16.mxu0 %v3234_v16  ;;  %v3318_v16 = vld [vmem:[%s3898_s21 + $0x5e4] ss:$8 sps:$4 sm:$0xff]  }
  0xaf   : > { %2084 = vmatmul.mubr.bf16.vlgmr.msra.gmra.mrb[0].mxu1 %v4000_v17 }
  0xb0   : > { %2248 = vmatmul.mubr.bf16.vlgmr.msra.gmra.mrb[0].mxu0 %v4003_v18  ;;  %2093 = vmatpush1.bf16.msra.mxu1 %v3228_v19  ;;  %v562_v19 = vcombine.high %v3968_v53, %v3968_v53  ;;  %v3319_v53 = vld [vmem:[%s3898_s21 + $0x1f0] ss:$8 sps:$4 sm:$0xff]  }
  0xb1   : > { %2257 = vmatpush1.bf16.msra.mxu0 %v3232_v20  ;;  %2094 = vmatprep.subr.bf16.mxu1 %v3237_v21  ;;  %v611_v20 = vcombine.high %v3975_v57, %v3975_v57  ;;  %v3313_v21 = vld [vmem:[%s3898_s21 + $0x1e0] ss:$8 sps:$4 sm:$0xff]   ;;  %v3322_v57 = vld [vmem:[%s3898_s21 + $0x5f0] ss:$8 sps:$4 sm:$0xff]  }
  0xb2   : > { %2258 = vmatprep.subr.bf16.mxu0 %v3240_v22  ;;  %2124 = vmatprep.mubr.bf16.mxu1 %v609_v23  ;;  %v3316_v22 = vld [vmem:[%s3898_s21 + $0x5e0] ss:$8 sps:$4 sm:$0xff]   ;;  %v3321_v23 = vld [vmem:[%s3898_s21 + $0x1f4] ss:$8 sps:$4 sm:$0xff]  }
  0xb3   : > { %2288 = vmatprep.mubr.bf16.mxu0 %v658_v24  ;;  %v3324_v24 = vld [vmem:[%s3898_s21 + $0x5f4] ss:$8 sps:$4 sm:$0xff]  }
  0xb4   : > { %2095 = vmatpush1.bf16.msra.mxu1 %v3235_v25  ;;  %v4072_v25 = vrot.slane %v562_v19, %v3963_v50  ;;  %v3391_v19 = vld [vmem:[%s3898_s21 + $0x2b0] ss:$8 sps:$4 sm:$0xff]  }
  0xb5   : > { %2259 = vmatpush1.bf16.msra.mxu0 %v3238_v26  ;;  %2096 = vmatprep.subr.bf16.mxu1 %v3243_v27  ;;  %v4075_v26 = vrot.slane %v611_v20, %v3963_v50  ;;  %v3327_v27 = vld [vmem:[%s3898_s21 + $0x204] ss:$8 sps:$4 sm:$0xff]   ;;  %v3394_v20 = vld [vmem:[%s3898_s21 + $0x6b0] ss:$8 sps:$4 sm:$0xff]  }
  0xb6   : > { %2260 = vmatprep.subr.bf16.mxu0 %v3246_v28  ;;  %v3330_v28 = vld [vmem:[%s3898_s21 + $0x604] ss:$8 sps:$4 sm:$0xff]  }
  0xb8   : > { %2097 = vmatpush1.bf16.msra.mxu1 %v3241_v29  ;;  %v578_v29 = vcombine.high %v4072_v25, %v4072_v25 }
  0xb9   : > { %2261 = vmatpush1.bf16.msra.mxu0 %v3244_v30  ;;  %2098 = vmatprep.subr.bf16.mxu1 %v3249_v31  ;;  %v627_v30 = vcombine.high %v4075_v26, %v4075_v26  ;;  %v607_v31 = vcombine.high %v4000_v17, %v4000_v17 }
  0xba   : > { %2262 = vmatprep.subr.bf16.mxu0 %v3252_v32  ;;  %v656_v32 = vcombine.high %v4003_v18, %v4003_v18  ;;  %v3331_v18 = vld [vmem:[%s3898_s21 + $0x210] ss:$8 sps:$4 sm:$0xff]  }
  0xbb   : > { %v4097_v17 = vrot.slane %v627_v30, %v3963_v50  ;;  %v3414_v30 = vld [vmem:[%s3898_s21 + $0x6e4] ss:$8 sps:$4 sm:$0xff]  }
  0xbc   : > { %2099 = vmatpush1.bf16.msra.mxu1 %v3247_v33  ;;  %v3325_v33 = vld [vmem:[%s3898_s21 + $0x200] ss:$8 sps:$4 sm:$0xff]  }
  0xbd   : > { %2263 = vmatpush1.bf16.msra.mxu0 %v3250_v34  ;;  %2100 = vmatprep.subr.bf16.mxu1 %v3255_v35  ;;  %v3328_v34 = vld [vmem:[%s3898_s21 + $0x600] ss:$8 sps:$4 sm:$0xff]   ;;  %v3333_v35 = vld [vmem:[%s3898_s21 + $0x214] ss:$8 sps:$4 sm:$0xff]  }
  0xbe   : > { %2264 = vmatprep.subr.bf16.mxu0 %v3258_v36  ;;  %v3336_v36 = vld [vmem:[%s3898_s21 + $0x614] ss:$8 sps:$4 sm:$0xff]  }
  0xc0   : > { %2101 = vmatpush1.bf16.msra.mxu1 %v3253_v37  ;;  %v4094_v37 = vrot.slane %v578_v29, %v3963_v50  ;;  %v3411_v29 = vld [vmem:[%s3898_s21 + $0x2e4] ss:$8 sps:$4 sm:$0xff]  }
  0xc1   : > { %2265 = vmatpush1.bf16.msra.mxu0 %v3256_v38  ;;  %2102 = vmatprep.subr.bf16.mxu1 %v3261_v39  ;;  %v3334_v38 = vld [vmem:[%s3898_s21 + $0x610] ss:$8 sps:$4 sm:$0xff]   ;;  %v3339_v39 = vld [vmem:[%s3898_s21 + $0x224] ss:$8 sps:$4 sm:$0xff]  }
  0xc2   : > { %2266 = vmatprep.subr.bf16.mxu0 %v3264_v40  ;;  %v3342_v40 = vld [vmem:[%s3898_s21 + $0x624] ss:$8 sps:$4 sm:$0xff]  }
  0xc4   : > { %2103 = vmatpush1.bf16.msra.mxu1 %v3259_v41  ;;  %v3337_v41 = vld [vmem:[%s3898_s21 + $0x220] ss:$8 sps:$4 sm:$0xff]  }
  0xc5   : > { %2267 = vmatpush1.bf16.msra.mxu0 %v3262_v42  ;;  %2104 = vmatprep.subr.bf16.mxu1 %v3267_v43  ;;  %v3340_v42 = vld [vmem:[%s3898_s21 + $0x620] ss:$8 sps:$4 sm:$0xff]   ;;  %v3345_v43 = vld [vmem:[%s3898_s21 + $0x234] ss:$8 sps:$4 sm:$0xff]  }
  0xc6   : > { %2268 = vmatprep.subr.bf16.mxu0 %v3270_v45  ;;  %v3348_v45 = vld [vmem:[%s3898_s21 + $0x634] ss:$8 sps:$4 sm:$0xff]  }
  0xc8   : > { %2105 = vmatpush1.bf16.msra.mxu1 %v3265_v46  ;;  %v3343_v46 = vld [vmem:[%s3898_s21 + $0x230] ss:$8 sps:$4 sm:$0xff]  }
  0xc9   : > { %2269 = vmatpush1.bf16.msra.mxu0 %v3268_v47  ;;  %2106 = vmatprep.subr.bf16.mxu1 %v3273_v48  ;;  %v3346_v47 = vld [vmem:[%s3898_s21 + $0x630] ss:$8 sps:$4 sm:$0xff]   ;;  %v3351_v48 = vld [vmem:[%s3898_s21 + $0x244] ss:$8 sps:$4 sm:$0xff]  }
  0xca   : > { %2270 = vmatprep.subr.bf16.mxu0 %v3276_v49  ;;  %v3354_v49 = vld [vmem:[%s3898_s21 + $0x644] ss:$8 sps:$4 sm:$0xff]  }
  0xcc   : > { %2107 = vmatpush1.bf16.msra.mxu1 %v3271_v51  ;;  %v3349_v51 = vld [vmem:[%s3898_s21 + $0x240] ss:$8 sps:$4 sm:$0xff]  }
  0xcd   : > { %2271 = vmatpush1.bf16.msra.mxu0 %v3274_v52  ;;  %2108 = vmatprep.subr.bf16.mxu1 %v3279_v54  ;;  %v3352_v52 = vld [vmem:[%s3898_s21 + $0x640] ss:$8 sps:$4 sm:$0xff]   ;;  %v3357_v54 = vld [vmem:[%s3898_s21 + $0x254] ss:$8 sps:$4 sm:$0xff]  }
  0xce   : > { %2272 = vmatprep.subr.bf16.mxu0 %v3282_v55  ;;  %v3360_v55 = vld [vmem:[%s3898_s21 + $0x654] ss:$8 sps:$4 sm:$0xff]  }
  0xd0   : > { %2109 = vmatpush1.bf16.msra.mxu1 %v3277_v56  ;;  %v3355_v56 = vld [vmem:[%s3898_s21 + $0x250] ss:$8 sps:$4 sm:$0xff]  }
  0xd1   : > { %2273 = vmatpush1.bf16.msra.mxu0 %v3280_v58  ;;  %2110 = vmatprep.subr.bf16.mxu1 %v3285_v59  ;;  %v3358_v58 = vld [vmem:[%s3898_s21 + $0x650] ss:$8 sps:$4 sm:$0xff]   ;;  %v3363_v59 = vld [vmem:[%s3898_s21 + $0x264] ss:$8 sps:$4 sm:$0xff]  }
  0xd2   : > { %2274 = vmatprep.subr.bf16.mxu0 %v3288_v60  ;;  %v3366_v60 = vld [vmem:[%s3898_s21 + $0x664] ss:$8 sps:$4 sm:$0xff]  }
  0xd4   : > { %2111 = vmatpush1.bf16.msra.mxu1 %v3283_v61  ;;  %v3361_v61 = vld [vmem:[%s3898_s21 + $0x260] ss:$8 sps:$4 sm:$0xff]  }
  0xd5   : > { %2275 = vmatpush1.bf16.msra.mxu0 %v3286_v62  ;;  %2112 = vmatprep.subr.bf16.mxu1 %v3291_v63  ;;  %v3364_v62 = vld [vmem:[%s3898_s21 + $0x660] ss:$8 sps:$4 sm:$0xff]   ;;  %v3369_v63 = vld [vmem:[%s3898_s21 + $0x274] ss:$8 sps:$4 sm:$0xff]  }
  0xd6   : > { %2276 = vmatprep.subr.bf16.mxu0 %v3294_v0  ;;  %v3372_v0 = vld [vmem:[%s3898_s21 + $0x674] ss:$8 sps:$4 sm:$0xff]  }
  0xd8   : > { %2113 = vmatpush1.bf16.msra.mxu1 %v3289_v1  ;;  %v3367_v1 = vld [vmem:[%s3898_s21 + $0x270] ss:$8 sps:$4 sm:$0xff]  }
  0xd9   : > { %2277 = vmatpush1.bf16.msra.mxu0 %v3292_v2  ;;  %2114 = vmatprep.subr.bf16.mxu1 %v3297_v3  ;;  %v3370_v2 = vld [vmem:[%s3898_s21 + $0x670] ss:$8 sps:$4 sm:$0xff]   ;;  %v3375_v3 = vld [vmem:[%s3898_s21 + $0x284] ss:$8 sps:$4 sm:$0xff]  }
  0xda   : > { %2278 = vmatprep.subr.bf16.mxu0 %v3300_v4  ;;  %v3378_v4 = vld [vmem:[%s3898_s21 + $0x684] ss:$8 sps:$4 sm:$0xff]  }
  0xdc   : > { %2115 = vmatpush1.bf16.msra.mxu1 %v3295_v5  ;;  %v3373_v5 = vld [vmem:[%s3898_s21 + $0x280] ss:$8 sps:$4 sm:$0xff]  }
  0xdd   : > { %2279 = vmatpush1.bf16.msra.mxu0 %v3298_v6  ;;  %2116 = vmatprep.subr.bf16.mxu1 %v3303_v7  ;;  %v3376_v6 = vld [vmem:[%s3898_s21 + $0x680] ss:$8 sps:$4 sm:$0xff]   ;;  %v3381_v7 = vld [vmem:[%s3898_s21 + $0x294] ss:$8 sps:$4 sm:$0xff]  }
  0xde   : > { %2280 = vmatprep.subr.bf16.mxu0 %v3306_v8  ;;  %v3384_v8 = vld [vmem:[%s3898_s21 + $0x694] ss:$8 sps:$4 sm:$0xff]  }
  0xe0   : > { %2117 = vmatpush1.bf16.msra.mxu1 %v3301_v9  ;;  %v3379_v9 = vld [vmem:[%s3898_s21 + $0x290] ss:$8 sps:$4 sm:$0xff]  }
  0xe1   : > { %2281 = vmatpush1.bf16.msra.mxu0 %v3304_v10  ;;  %2118 = vmatprep.subr.bf16.mxu1 %v3309_v11  ;;  %v3382_v10 = vld [vmem:[%s3898_s21 + $0x690] ss:$8 sps:$4 sm:$0xff]   ;;  %v3387_v11 = vld [vmem:[%s3898_s21 + $0x2a4] ss:$8 sps:$4 sm:$0xff]  }
  0xe2   : > { %2282 = vmatprep.subr.bf16.mxu0 %v3312_v12  ;;  %v3390_v12 = vld [vmem:[%s3898_s21 + $0x6a4] ss:$8 sps:$4 sm:$0xff]  }
  0xe4   : > { %2119 = vmatpush1.bf16.msra.mxu1 %v3307_v13  ;;  %v3385_v13 = vld [vmem:[%s3898_s21 + $0x2a0] ss:$8 sps:$4 sm:$0xff]  }
  0xe5   : > { %2283 = vmatpush1.bf16.msra.mxu0 %v3310_v14  ;;  %2120 = vmatprep.subr.bf16.mxu1 %v3315_v15  ;;  %v3388_v14 = vld [vmem:[%s3898_s21 + $0x6a0] ss:$8 sps:$4 sm:$0xff]   ;;  %v3393_v15 = vld [vmem:[%s3898_s21 + $0x2b4] ss:$8 sps:$4 sm:$0xff]  }
  0xe6   : > { %2284 = vmatprep.subr.bf16.mxu0 %v3318_v16  ;;  %v3396_v16 = vld [vmem:[%s3898_s21 + $0x6b4] ss:$8 sps:$4 sm:$0xff]  }
  0xe8   : > { %2121 = vmatpush1.bf16.msra.mxu1 %v3313_v21  ;;  %v3399_v21 = vld [vmem:[%s3898_s21 + $0x2c4] ss:$8 sps:$4 sm:$0xff]  }
  0xe9   : > { %2285 = vmatpush1.bf16.msra.mxu0 %v3316_v22  ;;  %2122 = vmatprep.subr.bf16.mxu1 %v3321_v23  ;;  %v3402_v22 = vld [vmem:[%s3898_s21 + $0x6c4] ss:$8 sps:$4 sm:$0xff]   ;;  %v3397_v23 = vld [vmem:[%s3898_s21 + $0x2c0] ss:$8 sps:$4 sm:$0xff]  }
  0xea   : > { %2286 = vmatprep.subr.bf16.mxu0 %v3324_v24  ;;  %v3400_v24 = vld [vmem:[%s3898_s21 + $0x6c0] ss:$8 sps:$4 sm:$0xff]  }
  0xec   : > { %2123 = vmatpush1.bf16.msra.mxu1 %v3319_v53  ;;  %v3405_v53 = vld [vmem:[%s3898_s21 + $0x2d4] ss:$8 sps:$4 sm:$0xff]  }
  0xed   : > { %2287 = vmatpush1.bf16.msra.mxu0 %v3322_v57  ;;  %2133 = vmatprep.subr.bf16.mxu1 %v3327_v27  ;;  %v3408_v57 = vld [vmem:[%s3898_s21 + $0x6d4] ss:$8 sps:$4 sm:$0xff]   ;;  %v3403_v27 = vld [vmem:[%s3898_s21 + $0x2d0] ss:$8 sps:$4 sm:$0xff]  }
  0xee   : > { %2297 = vmatprep.subr.bf16.mxu0 %v3330_v28  ;;  %v3406_v28 = vld [vmem:[%s3898_s21 + $0x6d0] ss:$8 sps:$4 sm:$0xff]  }
  0xef   : > { %2125 = vmatmul.mubr.bf16.vlgmr.msra.gmra.mrb[0].mxu1 %v607_v31  ;;  %v3409_v31 = vld [vmem:[%s3898_s21 + $0x2e0] ss:$8 sps:$4 sm:$0xff]  }
  0xf0   : > { %2289 = vmatmul.mubr.bf16.vlgmr.msra.gmra.mrb[0].mxu0 %v656_v32  ;;  %2134 = vmatpush1.bf16.msra.mxu1 %v3325_v33  ;;  %v3412_v32 = vld [vmem:[%s3898_s21 + $0x6e0] ss:$8 sps:$4 sm:$0xff]   ;;  %v3417_v33 = vld [vmem:[%s3898_s21 + $0x2f4] ss:$8 sps:$4 sm:$0xff]  }
  0xf1   : > { %2298 = vmatpush1.bf16.msra.mxu0 %v3328_v34  ;;  %2135 = vmatprep.subr.bf16.mxu1 %v3333_v35  ;;  %v3420_v34 = vld [vmem:[%s3898_s21 + $0x6f4] ss:$8 sps:$4 sm:$0xff]   ;;  %v3415_v35 = vld [vmem:[%s3898_s21 + $0x2f0] ss:$8 sps:$4 sm:$0xff]  }
  0xf2   : > { %2299 = vmatprep.subr.bf16.mxu0 %v3336_v36  ;;  %2165 = vmatprep.mubr.bf16.mxu1 %v4094_v37  ;;  %v3418_v36 = vld [vmem:[%s3898_s21 + $0x6f0] ss:$8 sps:$4 sm:$0xff]  }
  0xf3   : > { %2329 = vmatprep.mubr.bf16.mxu0 %v4097_v17 }
  0xf4   : > { %2136 = vmatpush1.bf16.msra.mxu1 %v3331_v18  ;;  %v3423_v18 = vld [vmem:[%s3898_s21 + $0x304] ss:$8 sps:$4 sm:$0xff]  }
  0xf5   : > { %2300 = vmatpush1.bf16.msra.mxu0 %v3334_v38  ;;  %2137 = vmatprep.subr.bf16.mxu1 %v3339_v39  ;;  %v3426_v38 = vld [vmem:[%s3898_s21 + $0x704] ss:$8 sps:$4 sm:$0xff]   ;;  %v4163_v39 = vrot.slane %v4072_v25, %v3963_v50  ;;  %v610_v25 = vcombine.high %v4094_v37, %v4094_v37 }
  0xf6   : > { %2301 = vmatprep.subr.bf16.mxu0 %v3342_v40  ;;  %v4167_v40 = vrot.slane %v4075_v26, %v3963_v50  ;;  %v3427_v26 = vld [vmem:[%s3898_s21 + $0x310] ss:$8 sps:$4 sm:$0xff]   ;;  %v3435_v37 = vld [vmem:[%s3898_s21 + $0x324] ss:$8 sps:$4 sm:$0xff]  }
  0xf8   : > { %2138 = vmatpush1.bf16.msra.mxu1 %v3337_v41  ;;  %v3421_v41 = vld [vmem:[%s3898_s21 + $0x300] ss:$8 sps:$4 sm:$0xff]  }
  0xf9   : > { %2302 = vmatpush1.bf16.msra.mxu0 %v3340_v42  ;;  %2139 = vmatprep.subr.bf16.mxu1 %v3345_v43  ;;  %v3424_v42 = vld [vmem:[%s3898_s21 + $0x700] ss:$8 sps:$4 sm:$0xff]   ;;  %v3429_v43 = vld [vmem:[%s3898_s21 + $0x314] ss:$8 sps:$4 sm:$0xff]  }
  0xfa   : > { %2303 = vmatprep.subr.bf16.mxu0 %v3348_v45  ;;  %v3432_v45 = vld [vmem:[%s3898_s21 + $0x714] ss:$8 sps:$4 sm:$0xff]  }
  0xfc   : > { %2140 = vmatpush1.bf16.msra.mxu1 %v3343_v46  ;;  %v659_v46 = vcombine.high %v4097_v17, %v4097_v17  ;;  %v3433_v17 = vld [vmem:[%s3898_s21 + $0x320] ss:$8 sps:$4 sm:$0xff]  }
  0xfd   : > { %2304 = vmatpush1.bf16.msra.mxu0 %v3346_v47  ;;  %2141 = vmatprep.subr.bf16.mxu1 %v3351_v48  ;;  %v3430_v47 = vld [vmem:[%s3898_s21 + $0x710] ss:$8 sps:$4 sm:$0xff]   ;;  %v3438_v48 = vld [vmem:[%s3898_s21 + $0x724] ss:$8 sps:$4 sm:$0xff]  }
  0xfe   : > { %2305 = vmatprep.subr.bf16.mxu0 %v3354_v49  ;;  %v3436_v49 = vld [vmem:[%s3898_s21 + $0x720] ss:$8 sps:$4 sm:$0xff]  }
 0x100   : > { %2142 = vmatpush1.bf16.msra.mxu1 %v3349_v51  ;;  %v3441_v51 = vld [vmem:[%s3898_s21 + $0x334] ss:$8 sps:$4 sm:$0xff]  }
 0x101   : > { %2306 = vmatpush1.bf16.msra.mxu0 %v3352_v52  ;;  %2143 = vmatprep.subr.bf16.mxu1 %v3357_v54  ;;  %v3444_v52 = vld [vmem:[%s3898_s21 + $0x734] ss:$8 sps:$4 sm:$0xff]   ;;  %v3439_v54 = vld [vmem:[%s3898_s21 + $0x330] ss:$8 sps:$4 sm:$0xff]  }
 0x102   : > { %2307 = vmatprep.subr.bf16.mxu0 %v3360_v55  ;;  %v3442_v55 = vld [vmem:[%s3898_s21 + $0x730] ss:$8 sps:$4 sm:$0xff]  }
 0x104   : > { %2144 = vmatpush1.bf16.msra.mxu1 %v3355_v56  ;;  %v3447_v56 = vld [vmem:[%s3898_s21 + $0x344] ss:$8 sps:$4 sm:$0xff]  }
 0x105   : > { %2308 = vmatpush1.bf16.msra.mxu0 %v3358_v58  ;;  %2145 = vmatprep.subr.bf16.mxu1 %v3363_v59  ;;  %v3450_v58 = vld [vmem:[%s3898_s21 + $0x744] ss:$8 sps:$4 sm:$0xff]   ;;  %v3445_v59 = vld [vmem:[%s3898_s21 + $0x340] ss:$8 sps:$4 sm:$0xff]  }
 0x106   : > { %2309 = vmatprep.subr.bf16.mxu0 %v3366_v60  ;;  %v3448_v60 = vld [vmem:[%s3898_s21 + $0x740] ss:$8 sps:$4 sm:$0xff]  }
 0x108   : > { %2146 = vmatpush1.bf16.msra.mxu1 %v3361_v61  ;;  %v3453_v61 = vld [vmem:[%s3898_s21 + $0x354] ss:$8 sps:$4 sm:$0xff]  }
 0x109   : > { %2310 = vmatpush1.bf16.msra.mxu0 %v3364_v62  ;;  %2147 = vmatprep.subr.bf16.mxu1 %v3369_v63  ;;  %v3456_v62 = vld [vmem:[%s3898_s21 + $0x754] ss:$8 sps:$4 sm:$0xff]   ;;  %v3451_v63 = vld [vmem:[%s3898_s21 + $0x350] ss:$8 sps:$4 sm:$0xff]  }
 0x10a   : > { %2311 = vmatprep.subr.bf16.mxu0 %v3372_v0  ;;  %v3454_v0 = vld [vmem:[%s3898_s21 + $0x750] ss:$8 sps:$4 sm:$0xff]  }
 0x10c   : > { %2148 = vmatpush1.bf16.msra.mxu1 %v3367_v1  ;;  %v3459_v1 = vld [vmem:[%s3898_s21 + $0x364] ss:$8 sps:$4 sm:$0xff]  }
 0x10d   : > { %2312 = vmatpush1.bf16.msra.mxu0 %v3370_v2  ;;  %2149 = vmatprep.subr.bf16.mxu1 %v3375_v3  ;;  %v3462_v2 = vld [vmem:[%s3898_s21 + $0x764] ss:$8 sps:$4 sm:$0xff]   ;;  %v3457_v3 = vld [vmem:[%s3898_s21 + $0x360] ss:$8 sps:$4 sm:$0xff]  }
 0x10e   : > { %2313 = vmatprep.subr.bf16.mxu0 %v3378_v4  ;;  %v3460_v4 = vld [vmem:[%s3898_s21 + $0x760] ss:$8 sps:$4 sm:$0xff]  }
 0x110   : > { %2150 = vmatpush1.bf16.msra.mxu1 %v3373_v5  ;;  %v3465_v5 = vld [vmem:[%s3898_s21 + $0x374] ss:$8 sps:$4 sm:$0xff]  }
 0x111   : > { %2314 = vmatpush1.bf16.msra.mxu0 %v3376_v6  ;;  %2151 = vmatprep.subr.bf16.mxu1 %v3381_v7  ;;  %v3468_v6 = vld [vmem:[%s3898_s21 + $0x774] ss:$8 sps:$4 sm:$0xff]   ;;  %v3463_v7 = vld [vmem:[%s3898_s21 + $0x370] ss:$8 sps:$4 sm:$0xff]  }
 0x112   : > { %2315 = vmatprep.subr.bf16.mxu0 %v3384_v8  ;;  %v3466_v8 = vld [vmem:[%s3898_s21 + $0x770] ss:$8 sps:$4 sm:$0xff]  }
 0x114   : > { %2152 = vmatpush1.bf16.msra.mxu1 %v3379_v9  ;;  %v3471_v9 = vld [vmem:[%s3898_s21 + $0x384] ss:$8 sps:$4 sm:$0xff]  }
 0x115   : > { %2316 = vmatpush1.bf16.msra.mxu0 %v3382_v10  ;;  %2153 = vmatprep.subr.bf16.mxu1 %v3387_v11  ;;  %v3474_v10 = vld [vmem:[%s3898_s21 + $0x784] ss:$8 sps:$4 sm:$0xff]   ;;  %v3469_v11 = vld [vmem:[%s3898_s21 + $0x380] ss:$8 sps:$4 sm:$0xff]  }
 0x116   : > { %2317 = vmatprep.subr.bf16.mxu0 %v3390_v12  ;;  %v3472_v12 = vld [vmem:[%s3898_s21 + $0x780] ss:$8 sps:$4 sm:$0xff]  }
 0x118   : > { %2154 = vmatpush1.bf16.msra.mxu1 %v3385_v13  ;;  %v3477_v13 = vld [vmem:[%s3898_s21 + $0x394] ss:$8 sps:$4 sm:$0xff]  }
 0x119   : > { %2318 = vmatpush1.bf16.msra.mxu0 %v3388_v14  ;;  %2155 = vmatprep.subr.bf16.mxu1 %v3393_v15  ;;  %v3480_v14 = vld [vmem:[%s3898_s21 + $0x794] ss:$8 sps:$4 sm:$0xff]   ;;  %v3475_v15 = vld [vmem:[%s3898_s21 + $0x390] ss:$8 sps:$4 sm:$0xff]  }
 0x11a   : > { %2319 = vmatprep.subr.bf16.mxu0 %v3396_v16  ;;  %v3478_v16 = vld [vmem:[%s3898_s21 + $0x790] ss:$8 sps:$4 sm:$0xff]  }
 0x11c   : > { %2156 = vmatpush1.bf16.msra.mxu1 %v3391_v19  ;;  %v3483_v19 = vld [vmem:[%s3898_s21 + $0x3a4] ss:$8 sps:$4 sm:$0xff]  }
 0x11d   : > { %2320 = vmatpush1.bf16.msra.mxu0 %v3394_v20  ;;  %2157 = vmatprep.subr.bf16.mxu1 %v3399_v21  ;;  %v3486_v20 = vld [vmem:[%s3898_s21 + $0x7a4] ss:$8 sps:$4 sm:$0xff]   ;;  %v3481_v21 = vld [vmem:[%s3898_s21 + $0x3a0] ss:$8 sps:$4 sm:$0xff]  }
 0x11e   : > { %2321 = vmatprep.subr.bf16.mxu0 %v3402_v22  ;;  %v3484_v22 = vld [vmem:[%s3898_s21 + $0x7a0] ss:$8 sps:$4 sm:$0xff]  }
 0x120   : > { %2158 = vmatpush1.bf16.msra.mxu1 %v3397_v23  ;;  %v3489_v23 = vld [vmem:[%s3898_s21 + $0x3b4] ss:$8 sps:$4 sm:$0xff]  }
 0x121   : > { %2322 = vmatpush1.bf16.msra.mxu0 %v3400_v24  ;;  %2159 = vmatprep.subr.bf16.mxu1 %v3405_v53  ;;  %v3492_v24 = vld [vmem:[%s3898_s21 + $0x7b4] ss:$8 sps:$4 sm:$0xff]   ;;  %v3487_v53 = vld [vmem:[%s3898_s21 + $0x3b0] ss:$8 sps:$4 sm:$0xff]  }
 0x122   : > { %2323 = vmatprep.subr.bf16.mxu0 %v3408_v57  ;;  %v3490_v57 = vld [vmem:[%s3898_s21 + $0x7b0] ss:$8 sps:$4 sm:$0xff]  }
 0x124   : > { %2160 = vmatpush1.bf16.msra.mxu1 %v3403_v27  ;;  %v3495_v27 = vld [vmem:[%s3898_s21 + $0x3c4] ss:$8 sps:$4 sm:$0xff]  }
 0x125   : > { %2324 = vmatpush1.bf16.msra.mxu0 %v3406_v28  ;;  %2161 = vmatprep.subr.bf16.mxu1 %v3411_v29  ;;  %v3498_v28 = vld [vmem:[%s3898_s21 + $0x7c4] ss:$8 sps:$4 sm:$0xff]   ;;  %v3493_v29 = vld [vmem:[%s3898_s21 + $0x3c0] ss:$8 sps:$4 sm:$0xff]  }
 0x126   : > { %2325 = vmatprep.subr.bf16.mxu0 %v3414_v30  ;;  %v3496_v30 = vld [vmem:[%s3898_s21 + $0x7c0] ss:$8 sps:$4 sm:$0xff]  }
 0x128   : > { %2162 = vmatpush1.bf16.msra.mxu1 %v3409_v31  ;;  %v3501_v31 = vld [vmem:[%s3898_s21 + $0x3d4] ss:$8 sps:$4 sm:$0xff]  }
 0x129   : > { %2326 = vmatpush1.bf16.msra.mxu0 %v3412_v32  ;;  %2163 = vmatprep.subr.bf16.mxu1 %v3417_v33  ;;  %v3504_v32 = vld [vmem:[%s3898_s21 + $0x7d4] ss:$8 sps:$4 sm:$0xff]   ;;  %v3499_v33 = vld [vmem:[%s3898_s21 + $0x3d0] ss:$8 sps:$4 sm:$0xff]  }
 0x12a   : > { %2327 = vmatprep.subr.bf16.mxu0 %v3420_v34  ;;  %v3502_v34 = vld [vmem:[%s3898_s21 + $0x7d0] ss:$8 sps:$4 sm:$0xff]  }
 0x12c   : > { %2164 = vmatpush1.bf16.msra.mxu1 %v3415_v35  ;;  %v3507_v35 = vld [vmem:[%s3898_s21 + $0x3e4] ss:$8 sps:$4 sm:$0xff]  }
 0x12d   : > { %2328 = vmatpush1.bf16.msra.mxu0 %v3418_v36  ;;  %2174 = vmatprep.subr.bf16.mxu1 %v3423_v18  ;;  %v3510_v36 = vld [vmem:[%s3898_s21 + $0x7e4] ss:$8 sps:$4 sm:$0xff]   ;;  %v3505_v18 = vld [vmem:[%s3898_s21 + $0x3e0] ss:$8 sps:$4 sm:$0xff]  }
 0x12e   : > { %2338 = vmatprep.subr.bf16.mxu0 %v3426_v38  ;;  %v3508_v38 = vld [vmem:[%s3898_s21 + $0x7e0] ss:$8 sps:$4 sm:$0xff]  }
 0x12f   : > { %2166 = vmatmul.mubr.bf16.vlgmr.msra.gmra.mrb[0].mxu1 %v4163_v39 }
 0x130   : > { %2330 = vmatmul.mubr.bf16.vlgmr.msra.gmra.mrb[0].mxu0 %v4167_v40  ;;  %2175 = vmatpush1.bf16.msra.mxu1 %v3421_v41  ;;  %v3513_v41 = vld [vmem:[%s3898_s21 + $0x3f4] ss:$8 sps:$4 sm:$0xff]  }
 0x131   : > { %2339 = vmatpush1.bf16.msra.mxu0 %v3424_v42  ;;  %2176 = vmatprep.subr.bf16.mxu1 %v3429_v43  ;;  %v3516_v42 = vld [vmem:[%s3898_s21 + $0x7f4] ss:$8 sps:$4 sm:$0xff]   ;;  %v3511_v43 = vld [vmem:[%s3898_s21 + $0x3f0] ss:$8 sps:$4 sm:$0xff]  }
 0x132   : > { %2340 = vmatprep.subr.bf16.mxu0 %v3432_v45  ;;  %2206 = vmatprep.mubr.bf16.mxu1 %v610_v25  ;;  %v3514_v45 = vld [vmem:[%s3898_s21 + $0x7f0] ss:$8 sps:$4 sm:$0xff]   ;;  %v3519_v25 = vld [vmem:[%s3898_s21 + $0x804] ss:$8 sps:$4 sm:$0xff]  }
 0x133   : > { %2370 = vmatprep.mubr.bf16.mxu0 %v659_v46  ;;  %v608_v46 = vcombine.high %v4163_v39, %v4163_v39  ;;  %v3525_v39 = vld [vmem:[%s3898_s21 + $0x824] ss:$8 sps:$4 sm:$0xff]  }
 0x134   : > { %2177 = vmatpush1.bf16.msra.mxu1 %v3427_v26  ;;  %v657_v26 = vcombine.high %v4167_v40, %v4167_v40  ;;  %v3523_v40 = vld [vmem:[%s3898_s21 + $0x820] ss:$8 sps:$4 sm:$0xff]  }
 0x135   : > { %2341 = vmatpush1.bf16.msra.mxu0 %v3430_v47  ;;  %2178 = vmatprep.subr.bf16.mxu1 %v3435_v37  ;;  %v3517_v47 = vld [vmem:[%s3898_s21 + $0x800] ss:$8 sps:$4 sm:$0xff]   ;;  %v3522_v37 = vld [vmem:[%s3898_s21 + $0x814] ss:$8 sps:$4 sm:$0xff]  }
 0x136   : > { %2342 = vmatprep.subr.bf16.mxu0 %v3438_v48  ;;  %v3520_v48 = vld [vmem:[%s3898_s21 + $0x810] ss:$8 sps:$4 sm:$0xff]  }
 0x138   : > { %2179 = vmatpush1.bf16.msra.mxu1 %v3433_v17  ;;  %v3704_v17 = vmov 0  }
 0x139   : > { %2343 = vmatpush1.bf16.msra.mxu0 %v3436_v49  ;;  %2180 = vmatprep.subr.bf16.mxu1 %v3441_v51  ;;  %v3528_v49 = vld [vmem:[%s3898_s21 + $0x834] ss:$8 sps:$4 sm:$0xff]   ;;  %v3526_v51 = vld [vmem:[%s3898_s21 + $0x830] ss:$8 sps:$4 sm:$0xff]  }
 0x13a   : > { %2344 = vmatprep.subr.bf16.mxu0 %v3444_v52  ;;  %v3531_v52 = vld [vmem:[%s3898_s21 + $0x844] ss:$8 sps:$4 sm:$0xff]  }
 0x13c   : > { %2181 = vmatpush1.bf16.msra.mxu1 %v3439_v54  ;;  %v3529_v54 = vld [vmem:[%s3898_s21 + $0x840] ss:$8 sps:$4 sm:$0xff]  }
 0x13d   : > { %2345 = vmatpush1.bf16.msra.mxu0 %v3442_v55  ;;  %2182 = vmatprep.subr.bf16.mxu1 %v3447_v56  ;;  %v3534_v55 = vld [vmem:[%s3898_s21 + $0x854] ss:$8 sps:$4 sm:$0xff]   ;;  %v3532_v56 = vld [vmem:[%s3898_s21 + $0x850] ss:$8 sps:$4 sm:$0xff]  }
 0x13e   : > { %2346 = vmatprep.subr.bf16.mxu0 %v3450_v58  ;;  %v3537_v58 = vld [vmem:[%s3898_s21 + $0x864] ss:$8 sps:$4 sm:$0xff]  }
 0x140   : > { %2183 = vmatpush1.bf16.msra.mxu1 %v3445_v59  ;;  %v3535_v59 = vld [vmem:[%s3898_s21 + $0x860] ss:$8 sps:$4 sm:$0xff]  }
 0x141   : > { %2347 = vmatpush1.bf16.msra.mxu0 %v3448_v60  ;;  %2184 = vmatprep.subr.bf16.mxu1 %v3453_v61  ;;  %v3540_v60 = vld [vmem:[%s3898_s21 + $0x874] ss:$8 sps:$4 sm:$0xff]   ;;  %v3538_v61 = vld [vmem:[%s3898_s21 + $0x870] ss:$8 sps:$4 sm:$0xff]  }
 0x142   : > { %2348 = vmatprep.subr.bf16.mxu0 %v3456_v62  ;;  %v2677_v62 = vld.sshfl [vmem:[%s3912_s13 + $0x10] sm:$0x1 pattern:$0x75316420] }
 0x144   : > { %2185 = vmatpush1.bf16.msra.mxu1 %v3451_v63  ;;  %v673_v63 = vrot.slane %v2677_v62, %v3963_v50  ;;  %v283_v50 = vld [vmem:[#allocation2] sm:$0xf]  ;;  %v2488_v62 = vld [vmem:[%s4403_s3 + $0xe8] sm:$0xff] (!%p2950_p6) }
 0x145   : > { %2349 = vmatpush1.bf16.msra.mxu0 %v3454_v0  ;;  %2186 = vmatprep.subr.bf16.mxu1 %v3459_v1 }
 0x146   : > { %2350 = vmatprep.subr.bf16.mxu0 %v3462_v2 }
 0x148   : > { %2187 = vmatpush1.bf16.msra.mxu1 %v3457_v3 }
 0x149   : > { %2351 = vmatpush1.bf16.msra.mxu0 %v3460_v4  ;;  %2188 = vmatprep.subr.bf16.mxu1 %v3465_v5  ;;  %v3705_v4 = vmov 1983009808  }
 0x14a   : > { %2352 = vmatprep.subr.bf16.mxu0 %v3468_v6  ;;  %v2424_v5 = vunpack.c.l.s4 %v3705_v4  ;;  %v2472_v4 = vld [vmem:[%s4403_s3 + $0x68] sm:$0xff] (!%p2950_p6) }
 0x14c   : > { %2189 = vmatpush1.bf16.msra.mxu1 %v3463_v7  ;;  %v2425_v6 = vunpack.c.0.s8 %v2424_v5  ;;  %v2489_v5 = vld [vmem:[%s4403_s3 + $0xf0] sm:$0xff] (!%p2950_p6) }
 0x14d   : > { %2353 = vmatpush1.bf16.msra.mxu0 %v3466_v8  ;;  %2190 = vmatprep.subr.bf16.mxu1 %v3471_v9 }
 0x14e   : > { %2354 = vmatprep.subr.bf16.mxu0 %v3474_v10 }
 0x150   : > { %2191 = vmatpush1.bf16.msra.mxu1 %v3469_v11  ;;  %v4260_v11 = vsub.s32 %v2425_v6, %v3955_v44  ;;  %v2490_v6 = vld [vmem:[%s4403_s3 + $0xf8] sm:$0xff] (!%p2950_p6) }
 0x151   : > { %2355 = vmatpush1.bf16.msra.mxu0 %v3472_v12  ;;  %2192 = vmatprep.subr.bf16.mxu1 %v3477_v13 }
 0x152   : > { %2356 = vmatprep.subr.bf16.mxu0 %v3480_v14 }
 0x154   : > { %2193 = vmatpush1.bf16.msra.mxu1 %v3475_v15 }
 0x155   : > { %2357 = vmatpush1.bf16.msra.mxu0 %v3478_v16  ;;  %2194 = vmatprep.subr.bf16.mxu1 %v3483_v19  ;;  %v2475_v19 = vld [vmem:[%s4403_s3 + $0x80] sm:$0xff] (!%p2950_p6) }
 0x156   : > { %2358 = vmatprep.subr.bf16.mxu0 %v3486_v20  ;;  %v2476_v20 = vld [vmem:[%s4403_s3 + $0x88] sm:$0xff] (!%p2950_p6) }
 0x158   : > { %2195 = vmatpush1.bf16.msra.mxu1 %v3481_v21  ;;  %v2459_v21 = vld [vmem:[%s4403_s3] sm:$0xff] (!%p2950_p6) }
 0x159   : > { %2359 = vmatpush1.bf16.msra.mxu0 %v3484_v22  ;;  %2196 = vmatprep.subr.bf16.mxu1 %v3489_v23  ;;  %v2994_v22 = vpack.c.bf16 (!%p2950_p6), %v2476_v20, %v2475_v19  ;;  %v2460_v23 = vld [vmem:[%s4403_s3 + $0x8] sm:$0xff] (!%p2950_p6) }
 0x15a   : > { %2360 = vmatprep.subr.bf16.mxu0 %v3492_v24  ;;  %v2477_v24 = vld [vmem:[%s4403_s3 + $0x90] sm:$0xff] (!%p2950_p6) }
 0x15c   : > { %2197 = vmatpush1.bf16.msra.mxu1 %v3487_v53  ;;  %v2478_v53 = vld [vmem:[%s4403_s3 + $0x98] sm:$0xff] (!%p2950_p6) }
 0x15d   : > { %2361 = vmatpush1.bf16.msra.mxu0 %v3490_v57  ;;  %2198 = vmatprep.subr.bf16.mxu1 %v3495_v27  ;;  %v2996_v57 = vpack.c.bf16 (!%p2950_p6), %v2460_v23, %v2459_v21  ;;  %v2998_v27 = vpack.c.bf16 (!%p2950_p6), %v2478_v53, %v2477_v24 }
 0x15e   : > { %2362 = vmatprep.subr.bf16.mxu0 %v3498_v28  ;;  %v2461_v28 = vld [vmem:[%s4403_s3 + $0x10] sm:$0xff] (!%p2950_p6) }
 0x160   : > { %2199 = vmatpush1.bf16.msra.mxu1 %v3493_v29  ;;  %v2462_v29 = vld [vmem:[%s4403_s3 + $0x18] sm:$0xff] (!%p2950_p6) }
 0x161   : > { %2363 = vmatpush1.bf16.msra.mxu0 %v3496_v30  ;;  %2200 = vmatprep.subr.bf16.mxu1 %v3501_v31  ;;  %v2479_v30 = vld [vmem:[%s4403_s3 + $0xa0] sm:$0xff] (!%p2950_p6)  ;;  %v2480_v31 = vld [vmem:[%s4403_s3 + $0xa8] sm:$0xff] (!%p2950_p6) }
 0x162   : > { %2364 = vmatprep.subr.bf16.mxu0 %v3504_v32  ;;  %v3000_v32 = vpack.c.bf16 (!%p2950_p6), %v2462_v29, %v2461_v28 }
 0x164   : > { %2201 = vmatpush1.bf16.msra.mxu1 %v3499_v33  ;;  %v3002_v33 = vpack.c.bf16 (!%p2950_p6), %v2480_v31, %v2479_v30 }
 0x165   : > { %2365 = vmatpush1.bf16.msra.mxu0 %v3502_v34  ;;  %2202 = vmatprep.subr.bf16.mxu1 %v3507_v35  ;;  %v2463_v34 = vld [vmem:[%s4403_s3 + $0x20] sm:$0xff] (!%p2950_p6)  ;;  %v2464_v35 = vld [vmem:[%s4403_s3 + $0x28] sm:$0xff] (!%p2950_p6) }
 0x166   : > { %2366 = vmatprep.subr.bf16.mxu0 %v3510_v36  ;;  %v2481_v36 = vld [vmem:[%s4403_s3 + $0xb0] sm:$0xff] (!%p2950_p6) }
 0x168   : > { %2203 = vmatpush1.bf16.msra.mxu1 %v3505_v18  ;;  %v2482_v18 = vld [vmem:[%s4403_s3 + $0xb8] sm:$0xff] (!%p2950_p6) }
 0x169   : > { %2367 = vmatpush1.bf16.msra.mxu0 %v3508_v38  ;;  %2204 = vmatprep.subr.bf16.mxu1 %v3513_v41  ;;  %v3004_v38 = vpack.c.bf16 (!%p2950_p6), %v2464_v35, %v2463_v34  ;;  %v2442_v41 = vsub.s32 (!%p2950_p6), 0, %v3955_v44 }
 0x16a   : > { %2368 = vmatprep.subr.bf16.mxu0 %v3516_v42  ;;  %v2446_v42 = vsub.s32 (!%p2950_p6), 1, %v3955_v44 }
 0x16c   : > { %2205 = vmatpush1.bf16.msra.mxu1 %v3511_v43  ;;  %v3006_v43 = vpack.c.bf16 (!%p2950_p6), %v2482_v18, %v2481_v36 }
 0x16d   : > { %2369 = vmatpush1.bf16.msra.mxu0 %v3514_v45  ;;  %v2465_v45 = vld [vmem:[%s4403_s3 + $0x30] sm:$0xff] (!%p2950_p6) }
 0x16e   : > { %2379 = vmatprep.subr.bf16.mxu0 %v3519_v25  ;;  %v2466_v25 = vld [vmem:[%s4403_s3 + $0x38] sm:$0xff] (!%p2950_p6) }
 0x16f   : > { %2207 = vmatmul.mubr.bf16.vlgmr.msra.gmra.mrb[0].mxu1 %v608_v46  ;;  %v2483_v46 = vld [vmem:[%s4403_s3 + $0xc0] sm:$0xff] (!%p2950_p6)  ;;  %v3008_v44 = vpack.c.bf16 (!%p2950_p6), %v2466_v25, %v2465_v45 }
 0x170   : > { %2371 = vmatmul.mubr.bf16.vlgmr.msra.gmra.mrb[0].mxu0 %v657_v26  ;;  %v2484_v26 = vld [vmem:[%s4403_s3 + $0xc8] sm:$0xff] (!%p2950_p6) }
 0x171   : > { %2380 = vmatpush1.bf16.msra.mxu0 %v3517_v47  ;;  %2411 = vmatprep.mubr.bf16.mxu0 %v3704_v17  ;;  %v2438_v47 = vld [vmem:[#allocation6] sm:$0x3] (!%p2950_p6)  ;;  %v3010_v17 = vpack.c.bf16 (!%p2950_p6), %v2484_v26, %v2483_v46 }
 0x172   : > { %2381 = vmatprep.subr.bf16.mxu0 %v3522_v37  ;;  %v2443_v37 = vrot.slane (!%p2950_p6), %v2438_v47, %v2442_v41 }
 0x175   : > { %2382 = vmatpush1.bf16.msra.mxu0 %v3520_v48  ;;  %v2447_v48 = vrot.slane (!%p2950_p6), %v2438_v47, %v2446_v42 }
 0x176   : > { %2383 = vmatprep.subr.bf16.mxu0 %v3525_v39  ;;  %v2467_v39 = vld [vmem:[%s4403_s3 + $0x40] sm:$0xff] (!%p2950_p6) }
 0x179   : > { %2384 = vmatpush1.bf16.msra.mxu0 %v3523_v40  ;;  %v2468_v40 = vld [vmem:[%s4403_s3 + $0x48] sm:$0xff] (!%p2950_p6) }
 0x17a   : > { %2385 = vmatprep.subr.bf16.mxu0 %v3528_v49  ;;  %v2485_v49 = vld [vmem:[%s4403_s3 + $0xd0] sm:$0xff] (!%p2950_p6) }
 0x17d   : > { %2386 = vmatpush1.bf16.msra.mxu0 %v3526_v51  ;;  %v2486_v51 = vld [vmem:[%s4403_s3 + $0xd8] sm:$0xff] (!%p2950_p6) }
 0x17e   : > { %2387 = vmatprep.subr.bf16.mxu0 %v3531_v52  ;;  %v2448_v52 = vcombine.low (!%p2950_p6), %v2443_v37, %v2447_v48 }
 0x181   : > { %2388 = vmatpush1.bf16.msra.mxu0 %v3529_v54 }
 0x182   : > { %2389 = vmatprep.subr.bf16.mxu0 %v3534_v55  ;;  %v3012_v55 = vpack.c.bf16 (!%p2950_p6), %v2468_v40, %v2467_v39 }
 0x185   : > { %2390 = vmatpush1.bf16.msra.mxu0 %v3532_v56  ;;  %v2455_v56 = vrot.slane (!%p2950_p6), %v2448_v52, %v4260_v11 }
 0x186   : > { %2391 = vmatprep.subr.bf16.mxu0 %v3537_v58  ;;  %v3014_v58 = vpack.c.bf16 (!%p2950_p6), %v2486_v51, %v2485_v49 }
 0x189   : > { %2392 = vmatpush1.bf16.msra.mxu0 %v3535_v59  ;;  %v2469_v59 = vld [vmem:[%s4403_s3 + $0x50] sm:$0xff] (!%p2950_p6) }
 0x18a   : > { %2393 = vmatprep.subr.bf16.mxu0 %v3540_v60  ;;  %v2470_v60 = vld [vmem:[%s4403_s3 + $0x58] sm:$0xff] (!%p2950_p6) }
 0x18d   : > { %2394 = vmatpush1.bf16.msra.mxu0 %v3538_v61  ;;  %v2487_v61 = vld [vmem:[%s4403_s3 + $0xe0] sm:$0xff] (!%p2950_p6) }
 0x18e   : > { %2995 = vmatprep.subr.bf16.mxu0 (!%p2950_p6), %v2994_v22 }
 0x190   : > { %2412 = vmatmul.mubr.bf16.vlgmr.msra.gmra.mrb[0].mxu0 %v673_v63 }
 0x191   : > { %2997 = vmatpush3.bf16.msra.mxu0 (!%p2950_p6), %v2996_v57 }
 0x192   : > { %2999 = vmatprep.subr.bf16.mxu0 (!%p2950_p6), %v2998_v27 }
 0x195   : > { %3001 = vmatpush3.bf16.msra.mxu0 (!%p2950_p6), %v3000_v32 }
 0x196   : > { %3003 = vmatprep.subr.bf16.mxu0 (!%p2950_p6), %v3002_v33 }
 0x199   : > { %3005 = vmatpush3.bf16.msra.mxu0 (!%p2950_p6), %v3004_v38 }
 0x19a   : > { %3007 = vmatprep.subr.bf16.mxu0 (!%p2950_p6), %v3006_v43 }
 0x19d   : > { %3009 = vmatpush3.bf16.msra.mxu0 (!%p2950_p6), %v3008_v44 }
 0x19e   : > { %3011 = vmatprep.subr.bf16.mxu0 (!%p2950_p6), %v3010_v17 }
 0x1a1   : > { %3013 = vmatpush3.bf16.msra.mxu0 (!%p2950_p6), %v3012_v55 }
 0x1a2   : > { %3015 = vmatprep.subr.bf16.mxu0 (!%p2950_p6), %v3014_v58 }
 0x242   : > { %v2208_v0 = vpop.f32.mrb[0].mxu1 }
 0x243   : > { %v2210_v1 = vpop.f32.mrb[1].mxu1 }
 0x244   : > { %v2212_v2 = vpop.f32.mrb[2].mxu1 }
 0x245   : > { %v2213_v3 = vpop.f32.mrb[3].mxu1  ;;  %v3018_v2 = vpack.c.bf16 (!%p2950_p6), %v2488_v62, %v2487_v61 }
 0x246   : > { %v2471_v3 = vld [vmem:[%s4403_s3 + $0x60] sm:$0xff] (!%p2950_p6) }
 0x263   : > { %v2413_v7 = vpop.f32.mrb[0].mxu0 }
 0x264   : > { %v3026_v8 = vadd.f32 %v2413_v7, %v2208_v0  ;;  %v2415_v9 = vpop.f32.mrb[1].mxu0  ;;  %v3016_v0 = vpack.c.bf16 (!%p2950_p6), %v2470_v60, %v2469_v59 }
 0x265   : > { %v3027_v10 = vadd.f32 %v2415_v9, %v2210_v1  ;;  %v2417_v12 = vpop.f32.mrb[2].mxu0 }
 0x266   : > { %v2418_v13 = vpop.f32.mrb[3].mxu0  ;;  %3017 = vmatpush3.bf16.msra.mxu0 (!%p2950_p6), %v3016_v0  ;;  %v2473_v12 = vld [vmem:[%s4403_s3 + $0x70] sm:$0xff] (!%p2950_p6) }
 0x267   : > { %v2422_v14 = vcombine.low %v3026_v8, %v3027_v10  ;;  %2436 = sbr.rel (%p2950_p6) target bundleno = 856 (0x358), region = 60  ;;  %v3020_v8 = vpack.c.bf16 (!%p2950_p6), %v2472_v4, %v2471_v3  ;;  %3019 = vmatprep.subr.bf16.mxu0 (!%p2950_p6), %v3018_v2  ;;  %v3022_v10 = vpack.c.bf16 (!%p2950_p6), %v2490_v6, %v2489_v5  ;;  %v2474_v13 = vld [vmem:[%s4403_s3 + $0x78] sm:$0xff] (!%p2950_p6) }
 0x269   : > { %v2429_v15 = vrot.slane %v2422_v14, %v4260_v11  ;;  %v3024_v14 = vpack.c.bf16 (!%p2950_p6), %v2474_v13, %v2473_v12 }
 0x26a   : > { %3021 = vmatpush3.bf16.msra.mxu0 (!%p2950_p6), %v3020_v8 }
 0x26b   : > { %v2431_v16 = vadd.f32 %v2429_v15, %v283_v50  ;;  %3023 = vmatprep.subr.bf16.mxu0 (!%p2950_p6), %v3022_v10  ;;  %v2951_v50 = vld [vmem:[#allocation8] ss:$0 sm:$0xff] (!%p2950_p6) }
 0x26d   : > { %2432 = vst [vmem:[#allocation2] sm:$0xf] %v2431_v16 }
 0x26e   : > { %3025 = vmatpush3.bf16.msra.mxu0 %v3024_v14 }
 0x274   : > { %v2437_v54 = vld [vmem:[#allocation2] sm:$0xf] }
 0x275   : > { %v2457_v63 = vadd.f32 %v2455_v56, %v2437_v54 }
 0x277   : > { %v2458_v1 = vmax.f32 %v2457_v63, 0.0 }
 0x279   : > { %v2505_v7 = vrot.slane %v2458_v1, %v4260_v11 }
 0x27b   : > { %v2506_v9 = vcombine.high %v2505_v7, %v2505_v7 }
 0x27d   : > { %2573 = vmatprep.mubr.f32.mxu0 %v2506_v9 }
 0x27e   : > { %2574 = vmatmul.mubr.f32.vlgmr.msra.gmra.mrb[0].mxu0 %v2505_v7 }
 0x351   : > { %v2991_v11 = vpop.f32.mrb[0].mxu0 }
 0x352   : > { %v2992_v15 = vpop.f32.mrb[1].mxu0 }
 0x353   : > { %v2993_v16 = vadd.f32 %v2992_v15, %v2991_v11 }
 0x355   : > { %v2576_v19 = vadd.f32 %v2993_v16, %v2951_v50 }
 0x357   : > { %2580 = vst.msk [vmem:[#allocation9] sm:$0x3] %vm2579_vm0, %v2576_v19 }
 0x358 PF: > { %p3088_p7 = scmp.eq.s32.totalorder %s3756_s22, 4  ;;  %s3706_s6 = smov [#allocation9]  }
 0x359   : > { %s2588_s17 = sshll.u32 %s3706_s6, 4  ;;  %s2589_s17 = int_to_ptr.vmem [resolvable:$true] %s2588_s17 }
 0x35a   : > { %s3627_s11 = scalar_lea.vmem %s2589_s17, 32  ;;  %p3634_p5 = scmp.lt.s32.totalorder %s2589_s17, %s2589_s17 }
 0x35b   : > { %p3628_p11 = scmp.ne.s32.totalorder %s2589_s17, %s3627_s11  ;;  %p3635_p9 = scmp.lt.s32.totalorder %s3627_s11, %s3627_s11 }
 0x35d   : > { %p3629_p12 = pnand %p3628_p11, %p3088_p7  ;;  %p3636_p10 = por %p3635_p9, %p3634_p5 }
 0x35f   : > { %p3630_p13 = pneg %p3629_p12 }
 0x361   : > { %p3637_p1 = pnand %p3636_p10, %p3630_p13 }
 0x363   : > { %3640 = shalt.err (!%p3637_p1)
}
 0x364   : > { %s3641_s25 = scalar_lea.hbm %s4405_s5, 32 }
 0x365   : > { %p3642_p8 = scmp.ne.s32.totalorder %s4405_s5, %s3641_s25  ;;  %p3647_p3 = scmp.lt.u32.totalorder %s3641_s25, %s4405_s5 }
 0x367   : > { %p3643_p0 = pnand %p3642_p8, %p3088_p7 }
 0x369   : > { %p3644_p2 = pneg %p3643_p0 }
 0x36b   : > { %p3649_p4 = pnand %p3647_p3, %p3644_p2 }
 0x36d   : > { %3652 = shalt.err (!%p3649_p4)
}
 0x36e   : > { %3069 = dma.vmem_to_hbm [thread:$0]  (%p3088_p7), %s2589_s17, 32, %s4405_s5, [#allocation5]  }
 0x36f   : > { %3678 = dma.done.wait (%p3088_p7), [#allocation5], 32  }
 0x370   : > { %3680 = vsyncadd (%p3088_p7), [#allocation5], 4294967264 }
 0x371 PF: > { %p17_p6 = scmp.ge.s32.totalorder %s3759_s23, 7   ;;  %s4421_s18 = smov %s3687_s19 }
 0x372   : > { %s4422_s19 = smov %s3691_s20  ;;  %s4423_s20 = smov %s3769_s26 }
 0x373   : > { %s4424_s21 = smov %s3759_s23  ;;  %19 = sbr.rel (!%p17_p6) target bundleno = 5 (0x5), region = 96 }
 0x37a   :  { %2601 = vsyncpa [#allocation4], 1 }
 0x37b   :  { %2603 = vsyncpa [#allocation4 + $0x1], 1 }
 0x37c   :  { %2604 = vsyncpa [#allocation7], 1 }
 0x37d   :  { %2605 = vsyncpa [#allocation5], 1 }
 0x37e   :  { %2607 = vsyncpa [#allocation5 + $0x1], 1 }

</bundles_post_ra>
